<compile_context>
chip_gen: v7x
topology: tpu7x:2x2x1
jax: 0.10.0
libtpu: 0.0.40
codegen_flags: <defaults>
</compile_context>

<pallas_src>
import math

import jax
import jax.numpy as jnp
from jax.experimental import pallas as pl
from jax.experimental.pallas import tpu as pltpu

# ----------------------------- model config ---------------------------------
B = 2            # batch
S = 8            # sequence length
H = 32           # hidden size (config.hidden_size == args.hidden_dim)
N_HEADS = 4
D_HEAD = H // N_HEADS
N_LAYERS = 2
INTER = 64       # FFN intermediate size
VOCAB = 100
TYPE_VOCAB = 2
MAX_POS = 16
ATTN_HIDDEN = 24  # Attn module inner dim
LABEL_DIM = 3     # args.lebel_dim
LN_EPS = 1e-12


# --------------------------- in-kernel helpers --------------------------------
def _layer_norm(h, gamma, beta):
    mu = jnp.mean(h, axis=-1, keepdims=True)
    var = jnp.mean((h - mu) ** 2, axis=-1, keepdims=True)
    return (h - mu) * jax.lax.rsqrt(var + LN_EPS) * gamma + beta


def _gelu(y):
    # TODO(synk): HF BERT uses erf-exact GELU; tanh approximation used here.
    c = jnp.float32(0.7978845608028654)   # sqrt(2/pi)
    return 0.5 * y * (1.0 + jnp.tanh(c * (y + 0.044715 * y * y * y)))


def _softmax_lastdim(s):
    s = s - jnp.max(s, axis=-1, keepdims=True)
    p = jnp.exp(s)
    # EUP reciprocal (separate VLIW slot) instead of a VPU divide.
    return p * pl.reciprocal(jnp.sum(p, axis=-1, keepdims=True), approx=True)


# --------------------------- fully fused forward kernel -----------------------
def _fused_forward_kernel(
        emb_ref, mask_ref, eg_ref, eb_ref,
        wqkv_ref, bqkv_ref, wo_ref, bo_ref, g1_ref, b1_ref,
        wi_ref, bi_ref, wp_ref, bp_ref, g2_ref, b2_ref,
        aw1_ref, ab1_ref, aw2_ref, cw_ref, cb_ref,
        o_ref):
    f32 = jnp.float32

    # --- embedding LayerNorm (no zeros residual: just normalize the sum) ---
    x = _layer_norm(emb_ref[...], eg_ref[...], eb_ref[...])          # (B*S, H)

    # --- additive key-mask bias, BERT style: (1 - mask) * -10000 ---
    bias = (1.0 - mask_ref[...]) * jnp.float32(-10000.0)             # (B, S)

    scale = jnp.float32(1.0 / math.sqrt(D_HEAD))

    # --- transformer encoder layers (statically unrolled) ---
    for l in range(N_LAYERS):
        # fused QKV projection: one (B*S,H)@(H,3H) matmul, lane-dense output.
        qkv = jnp.dot(x, wqkv_ref[l], preferred_element_type=f32) + bqkv_ref[l]
        q = qkv[:, 0:H]
        k = qkv[:, H:2 * H]
        v = qkv[:, 2 * H:3 * H]

        # multi-head attention on VMEM-resident data; the head split is pure
        # value slicing (no XLA transpose / HBM round trip between calls).
        ctx_rows = []
        for b in range(B):
            r0, r1 = b * S, (b + 1) * S
            bias_b = bias[b:b + 1, :]                                # (1, S)
            head_ctx = []
            for h in range(N_HEADS):
                c0, c1 = h * D_HEAD, (h + 1) * D_HEAD
                qbh = q[r0:r1, c0:c1]                                # (S, dh)
                kbh = k[r0:r1, c0:c1]
                vbh = v[r0:r1, c0:c1]
                s = jnp.dot(qbh, kbh.T, preferred_element_type=f32) * scale
                s = s + bias_b                                       # key mask
                p = _softmax_lastdim(s)                              # (S, S)
                head_ctx.append(jnp.dot(p, vbh, preferred_element_type=f32))
            ctx_rows.append(jnp.concatenate(head_ctx, axis=-1))      # (S, H)
        ctx = jnp.concatenate(ctx_rows, axis=0)                      # (B*S, H)

        # attention output projection + residual LayerNorm
        attn_out = jnp.dot(ctx, wo_ref[l], preferred_element_type=f32) + bo_ref[l]
        x = _layer_norm(attn_out + x, g1_ref[l], b1_ref[l])

        # feed-forward + residual LayerNorm
        ff = _gelu(jnp.dot(x, wi_ref[l], preferred_element_type=f32) + bi_ref[l])
        ff = jnp.dot(ff, wp_ref[l], preferred_element_type=f32) + bp_ref[l]
        x = _layer_norm(ff + x, g2_ref[l], b2_ref[l])

    # --- Attn pooling module: Linear(H,24) -> ReLU -> Linear(24,1) -> softmax ---
    t = jnp.dot(x, aw1_ref[...], preferred_element_type=f32) + ab1_ref[...]
    t = jnp.maximum(t, 0.0)                                          # (B*S, 24)
    scores = jnp.dot(t, aw2_ref[...], preferred_element_type=f32)    # (B*S, 1)
    # (the scalar bias of Linear(24,1) is softmax-invariant, so it is dropped;
    #  the reference Attn does not mask the pooling softmax, so neither do we)

    feats_rows = []
    for b in range(B):
        r0, r1 = b * S, (b + 1) * S
        s_b = scores[r0:r1, :]                                       # (S, 1)
        s_b = s_b - jnp.max(s_b, axis=0, keepdims=True)
        p_b = jnp.exp(s_b)
        p_b = p_b * pl.reciprocal(jnp.sum(p_b, axis=0, keepdims=True), approx=True)
        h_b = x[r0:r1, :]                                            # (S, H)
        feats_rows.append(jnp.sum(h_b * p_b, axis=0, keepdims=True))  # (1, H)
    feats = jnp.concatenate(feats_rows, axis=0)                      # (B, H)

    # --- classifier ---
    o_ref[...] = jnp.dot(feats, cw_ref[...], preferred_element_type=f32) + cb_ref[...]


# ----------------------------- parameter init --------------------------------
def init_params(key):
    def nrm(k, shape, scale=0.02):
        return scale * jax.random.normal(k, shape, dtype=jnp.float32)

    keys = iter(jax.random.split(key, 32))
    L = N_LAYERS
    return {
        "word_emb": nrm(next(keys), (VOCAB, H)),
        "type_emb": nrm(next(keys), (TYPE_VOCAB, H)),
        "pos_emb": nrm(next(keys), (MAX_POS, H)),
        "emb_ln_g": jnp.ones((H,), jnp.float32),
        "emb_ln_b": jnp.zeros((H,), jnp.float32),
        # per-layer weights stacked on a leading layer axis; QKV pre-fused.
        "wqkv": nrm(next(keys), (L, H, 3 * H)),
        "bqkv": jnp.zeros((L, 3 * H), jnp.float32),
        "wo": nrm(next(keys), (L, H, H)),
        "bo": jnp.zeros((L, H), jnp.float32),
        "ln1_g": jnp.ones((L, H), jnp.float32),
        "ln1_b": jnp.zeros((L, H), jnp.float32),
        "wi": nrm(next(keys), (L, H, INTER)),
        "bi": jnp.zeros((L, INTER), jnp.float32),
        "wp": nrm(next(keys), (L, INTER, H)),
        "bp": jnp.zeros((L, H), jnp.float32),
        "ln2_g": jnp.ones((L, H), jnp.float32),
        "ln2_b": jnp.zeros((L, H), jnp.float32),
        # Attn module
        "attn_w1": nrm(next(keys), (H, ATTN_HIDDEN)),
        "attn_b1": jnp.zeros((ATTN_HIDDEN,), jnp.float32),
        "attn_w2": nrm(next(keys), (ATTN_HIDDEN, 1)),
        # classifier
        "cls_w": nrm(next(keys), (H, LABEL_DIM)),
        "cls_b": jnp.zeros((LABEL_DIM,), jnp.float32),
    }


# ----------------------------- forward pass ----------------------------------
def forward(params, input_ids, token_type_ids, attention_mask):
    b, s = input_ids.shape
    L = N_LAYERS

    # --- embedding gathers are XLA glue; everything else is one fused kernel ---
    pos_ids = jnp.arange(s, dtype=jnp.int32)
    emb = (jnp.take(params["word_emb"], input_ids, axis=0)
           + jnp.take(params["type_emb"], token_type_ids, axis=0)
           + params["pos_emb"][pos_ids][None, :, :])                 # (B, S, H)
    emb2 = emb.reshape(b * s, H)
    mask_f = attention_mask.astype(jnp.float32)                      # (B, S)

    logits = pl.pallas_call(
        _fused_forward_kernel,
        out_shape=jax.ShapeDtypeStruct((b, LABEL_DIM), jnp.float32),
        compiler_params=pltpu.CompilerParams(vmem_limit_bytes=8 * 1024 * 1024),
    )(
        emb2, mask_f,
        params["emb_ln_g"].reshape(1, H), params["emb_ln_b"].reshape(1, H),
        params["wqkv"], params["bqkv"].reshape(L, 1, 3 * H),
        params["wo"], params["bo"].reshape(L, 1, H),
        params["ln1_g"].reshape(L, 1, H), params["ln1_b"].reshape(L, 1, H),
        params["wi"], params["bi"].reshape(L, 1, INTER),
        params["wp"], params["bp"].reshape(L, 1, H),
        params["ln2_g"].reshape(L, 1, H), params["ln2_b"].reshape(L, 1, H),
        params["attn_w1"], params["attn_b1"].reshape(1, ATTN_HIDDEN),
        params["attn_w2"],
        params["cls_w"], params["cls_b"].reshape(1, LABEL_DIM),
    )
    return logits


# ----------------------------- main ------------------------------------------
if __name__ == "__main__":
    key = jax.random.PRNGKey(0)
    k_param, k_ids = jax.random.split(key)

    params = init_params(k_param)

    input_ids = jax.random.randint(k_ids, (B, S), 0, VOCAB, dtype=jnp.int32)
    token_type_ids = jnp.zeros((B, S), dtype=jnp.int32)
    attention_mask = jnp.array(
        [[1, 1, 1, 1, 1, 1, 1, 1],
         [1, 1, 1, 1, 1, 1, 0, 0]], dtype=jnp.int32)                 # second row padded

    fwd = jax.jit(forward)
    logits = fwd(params, input_ids, token_type_ids, attention_mask)
    jax.block_until_ready(logits)

    assert logits.shape == (B, LABEL_DIM) and logits.dtype == jnp.float32
    print("KERNEL_OK")
</pallas_src>

<mosaic_0001>
module attributes {stable_mosaic.version = 11 : i64} {
  func.func @_fused_forward_kernel(%arg0: memref<16x32xf32, #tpu.memory_space<vmem>>, %arg1: memref<2x8xf32, #tpu.memory_space<vmem>>, %arg2: memref<1x32xf32, #tpu.memory_space<vmem>>, %arg3: memref<1x32xf32, #tpu.memory_space<vmem>>, %arg4: memref<2x32x96xf32, #tpu.memory_space<vmem>>, %arg5: memref<2x1x96xf32, #tpu.memory_space<vmem>>, %arg6: memref<2x32x32xf32, #tpu.memory_space<vmem>>, %arg7: memref<2x1x32xf32, #tpu.memory_space<vmem>>, %arg8: memref<2x1x32xf32, #tpu.memory_space<vmem>>, %arg9: memref<2x1x32xf32, #tpu.memory_space<vmem>>, %arg10: memref<2x32x64xf32, #tpu.memory_space<vmem>>, %arg11: memref<2x1x64xf32, #tpu.memory_space<vmem>>, %arg12: memref<2x64x32xf32, #tpu.memory_space<vmem>>, %arg13: memref<2x1x32xf32, #tpu.memory_space<vmem>>, %arg14: memref<2x1x32xf32, #tpu.memory_space<vmem>>, %arg15: memref<2x1x32xf32, #tpu.memory_space<vmem>>, %arg16: memref<32x24xf32, #tpu.memory_space<vmem>>, %arg17: memref<1x24xf32, #tpu.memory_space<vmem>>, %arg18: memref<24x1xf32, #tpu.memory_space<vmem>>, %arg19: memref<32x3xf32, #tpu.memory_space<vmem>>, %arg20: memref<1x3xf32, #tpu.memory_space<vmem>>, %arg21: memref<2x3xf32, #tpu.memory_space<vmem>>) attributes {dimension_semantics = [], scalar_prefetch = 0 : i64, scratch_operands = 0 : i64, tpu.core_type = #tpu.core_type<tc>} {
    %c0 = arith.constant 0 : index
    %c0_0 = arith.constant 0 : index
    %0 = vector.load %arg0[%c0, %c0_0] : memref<16x32xf32, #tpu.memory_space<vmem>>, vector<16x32xf32>
    %c0_1 = arith.constant 0 : index
    %c0_2 = arith.constant 0 : index
    %1 = vector.load %arg2[%c0_1, %c0_2] : memref<1x32xf32, #tpu.memory_space<vmem>>, vector<1x32xf32>
    %c0_3 = arith.constant 0 : index
    %c0_4 = arith.constant 0 : index
    %2 = vector.load %arg3[%c0_3, %c0_4] : memref<1x32xf32, #tpu.memory_space<vmem>>, vector<1x32xf32>
    %cst = arith.constant dense<0.000000e+00> : vector<16xf32>
    %3 = vector.multi_reduction <add>, %0, %cst [1] : vector<16x32xf32> to vector<16xf32>
    %4 = vector.shape_cast %3 : vector<16xf32> to vector<16x1xf32>
    %cst_5 = arith.constant 3.200000e+01 : f32
    %5 = vector.broadcast %cst_5 : f32 to vector<16x1xf32>
    %6 = arith.divf %4, %5 : vector<16x1xf32>
    %7 = vector.broadcast %6 : vector<16x1xf32> to vector<16x32xf32>
    %8 = arith.subf %0, %7 : vector<16x32xf32>
    %9 = arith.mulf %8, %8 : vector<16x32xf32>
    %cst_6 = arith.constant dense<0.000000e+00> : vector<16xf32>
    %10 = vector.multi_reduction <add>, %9, %cst_6 [1] : vector<16x32xf32> to vector<16xf32>
    %11 = vector.shape_cast %10 : vector<16xf32> to vector<16x1xf32>
    %cst_7 = arith.constant 3.200000e+01 : f32
    %12 = vector.broadcast %cst_7 : f32 to vector<16x1xf32>
    %13 = arith.divf %11, %12 : vector<16x1xf32>
    %14 = vector.broadcast %6 : vector<16x1xf32> to vector<16x32xf32>
    %15 = arith.subf %0, %14 : vector<16x32xf32>
    %cst_8 = arith.constant 9.99999996E-13 : f32
    %16 = vector.broadcast %cst_8 : f32 to vector<16x1xf32>
    %17 = arith.addf %13, %16 : vector<16x1xf32>
    %18 = math.rsqrt %17 : vector<16x1xf32>
    %19 = vector.broadcast %18 : vector<16x1xf32> to vector<16x32xf32>
    %20 = arith.mulf %15, %19 : vector<16x32xf32>
    %21 = vector.broadcast %1 : vector<1x32xf32> to vector<16x32xf32>
    %22 = arith.mulf %20, %21 : vector<16x32xf32>
    %23 = vector.broadcast %2 : vector<1x32xf32> to vector<16x32xf32>
    %24 = arith.addf %22, %23 : vector<16x32xf32>
    %c0_9 = arith.constant 0 : index
    %c0_10 = arith.constant 0 : index
    %25 = vector.load %arg1[%c0_9, %c0_10] : memref<2x8xf32, #tpu.memory_space<vmem>>, vector<2x8xf32>
    %cst_11 = arith.constant 1.000000e+00 : f32
    %26 = vector.broadcast %cst_11 : f32 to vector<2x8xf32>
    %27 = arith.subf %26, %25 : vector<2x8xf32>
    %cst_12 = arith.constant -1.000000e+04 : f32
    %28 = vector.broadcast %cst_12 : f32 to vector<2x8xf32>
    %29 = arith.mulf %27, %28 : vector<2x8xf32>
    %c0_13 = arith.constant 0 : index
    %c0_14 = arith.constant 0 : index
    %c0_15 = arith.constant 0 : index
    %30 = vector.load %arg4[%c0_13, %c0_14, %c0_15] : memref<2x32x96xf32, #tpu.memory_space<vmem>>, vector<1x32x96xf32>
    %31 = vector.shape_cast %30 : vector<1x32x96xf32> to vector<32x96xf32>
    %cst_16 = arith.constant dense<0.000000e+00> : vector<16x96xf32>
    %32 = tpu.matmul %24, %31, %cst_16 {dimension_numbers = #tpu.dot_dimension_numbers<[1], [0], [0], [1], [0, 0, 1, 1], [], []>} : vector<16x32xf32>, vector<32x96xf32>, vector<16x96xf32> -> vector<16x96xf32>
    %c0_17 = arith.constant 0 : index
    %c0_18 = arith.constant 0 : index
    %c0_19 = arith.constant 0 : index
    %33 = vector.load %arg5[%c0_17, %c0_18, %c0_19] : memref<2x1x96xf32, #tpu.memory_space<vmem>>, vector<1x1x96xf32>
    %34 = vector.shape_cast %33 : vector<1x1x96xf32> to vector<1x96xf32>
    %35 = vector.broadcast %34 : vector<1x96xf32> to vector<16x96xf32>
    %36 = arith.addf %32, %35 : vector<16x96xf32>
    %37 = vector.extract_strided_slice %36 {offsets = [0, 0], sizes = [16, 32], strides = [1, 1]} : vector<16x96xf32> to vector<16x32xf32>
    %38 = vector.extract_strided_slice %36 {offsets = [0, 32], sizes = [16, 32], strides = [1, 1]} : vector<16x96xf32> to vector<16x32xf32>
    %39 = vector.extract_strided_slice %36 {offsets = [0, 64], sizes = [16, 32], strides = [1, 1]} : vector<16x96xf32> to vector<16x32xf32>
    %40 = vector.extract_strided_slice %29 {offsets = [0, 0], sizes = [1, 8], strides = [1, 1]} : vector<2x8xf32> to vector<1x8xf32>
    %41 = vector.extract_strided_slice %37 {offsets = [0, 0], sizes = [8, 8], strides = [1, 1]} : vector<16x32xf32> to vector<8x8xf32>
    %42 = vector.extract_strided_slice %38 {offsets = [0, 0], sizes = [8, 8], strides = [1, 1]} : vector<16x32xf32> to vector<8x8xf32>
    %43 = vector.extract_strided_slice %39 {offsets = [0, 0], sizes = [8, 8], strides = [1, 1]} : vector<16x32xf32> to vector<8x8xf32>
    %44 = tpu.transpose %42, [1, 0] : vector<8x8xf32> -> vector<8x8xf32>
    %cst_20 = arith.constant dense<0.000000e+00> : vector<8x8xf32>
    %45 = tpu.matmul %41, %44, %cst_20 {dimension_numbers = #tpu.dot_dimension_numbers<[1], [0], [0], [1], [0, 0, 1, 1], [], []>} : vector<8x8xf32>, vector<8x8xf32>, vector<8x8xf32> -> vector<8x8xf32>
    %cst_21 = arith.constant 0.353553385 : f32
    %46 = vector.broadcast %cst_21 : f32 to vector<8x8xf32>
    %47 = arith.mulf %45, %46 : vector<8x8xf32>
    %48 = vector.broadcast %40 : vector<1x8xf32> to vector<8x8xf32>
    %49 = arith.addf %47, %48 : vector<8x8xf32>
    %cst_22 = arith.constant dense<0xFF800000> : vector<8xf32>
    %50 = vector.multi_reduction <maximumf>, %49, %cst_22 [1] : vector<8x8xf32> to vector<8xf32>
    %51 = vector.shape_cast %50 : vector<8xf32> to vector<8x1xf32>
    %52 = vector.broadcast %51 : vector<8x1xf32> to vector<8x8xf32>
    %53 = arith.subf %49, %52 : vector<8x8xf32>
    %54 = math.exp %53 : vector<8x8xf32>
    %cst_23 = arith.constant dense<0.000000e+00> : vector<8xf32>
    %55 = vector.multi_reduction <add>, %54, %cst_23 [1] : vector<8x8xf32> to vector<8xf32>
    %56 = vector.shape_cast %55 : vector<8xf32> to vector<8x1xf32>
    %57 = tpu.reciprocal %56 {approx = true} : vector<8x1xf32> -> vector<8x1xf32>
    %58 = vector.broadcast %57 : vector<8x1xf32> to vector<8x8xf32>
    %59 = arith.mulf %54, %58 : vector<8x8xf32>
    %cst_24 = arith.constant dense<0.000000e+00> : vector<8x8xf32>
    %60 = tpu.matmul %59, %43, %cst_24 {dimension_numbers = #tpu.dot_dimension_numbers<[1], [0], [0], [1], [0, 0, 1, 1], [], []>} : vector<8x8xf32>, vector<8x8xf32>, vector<8x8xf32> -> vector<8x8xf32>
    %61 = vector.extract_strided_slice %37 {offsets = [0, 8], sizes = [8, 8], strides = [1, 1]} : vector<16x32xf32> to vector<8x8xf32>
    %62 = vector.extract_strided_slice %38 {offsets = [0, 8], sizes = [8, 8], strides = [1, 1]} : vector<16x32xf32> to vector<8x8xf32>
    %63 = vector.extract_strided_slice %39 {offsets = [0, 8], sizes = [8, 8], strides = [1, 1]} : vector<16x32xf32> to vector<8x8xf32>
    %64 = tpu.transpose %62, [1, 0] : vector<8x8xf32> -> vector<8x8xf32>
    %cst_25 = arith.constant dense<0.000000e+00> : vector<8x8xf32>
    %65 = tpu.matmul %61, %64, %cst_25 {dimension_numbers = #tpu.dot_dimension_numbers<[1], [0], [0], [1], [0, 0, 1, 1], [], []>} : vector<8x8xf32>, vector<8x8xf32>, vector<8x8xf32> -> vector<8x8xf32>
    %cst_26 = arith.constant 0.353553385 : f32
    %66 = vector.broadcast %cst_26 : f32 to vector<8x8xf32>
    %67 = arith.mulf %65, %66 : vector<8x8xf32>
    %68 = vector.broadcast %40 : vector<1x8xf32> to vector<8x8xf32>
    %69 = arith.addf %67, %68 : vector<8x8xf32>
    %cst_27 = arith.constant dense<0xFF800000> : vector<8xf32>
    %70 = vector.multi_reduction <maximumf>, %69, %cst_27 [1] : vector<8x8xf32> to vector<8xf32>
    %71 = vector.shape_cast %70 : vector<8xf32> to vector<8x1xf32>
    %72 = vector.broadcast %71 : vector<8x1xf32> to vector<8x8xf32>
    %73 = arith.subf %69, %72 : vector<8x8xf32>
    %74 = math.exp %73 : vector<8x8xf32>
    %cst_28 = arith.constant dense<0.000000e+00> : vector<8xf32>
    %75 = vector.multi_reduction <add>, %74, %cst_28 [1] : vector<8x8xf32> to vector<8xf32>
    %76 = vector.shape_cast %75 : vector<8xf32> to vector<8x1xf32>
    %77 = tpu.reciprocal %76 {approx = true} : vector<8x1xf32> -> vector<8x1xf32>
    %78 = vector.broadcast %77 : vector<8x1xf32> to vector<8x8xf32>
    %79 = arith.mulf %74, %78 : vector<8x8xf32>
    %cst_29 = arith.constant dense<0.000000e+00> : vector<8x8xf32>
    %80 = tpu.matmul %79, %63, %cst_29 {dimension_numbers = #tpu.dot_dimension_numbers<[1], [0], [0], [1], [0, 0, 1, 1], [], []>} : vector<8x8xf32>, vector<8x8xf32>, vector<8x8xf32> -> vector<8x8xf32>
    %81 = vector.extract_strided_slice %37 {offsets = [0, 16], sizes = [8, 8], strides = [1, 1]} : vector<16x32xf32> to vector<8x8xf32>
    %82 = vector.extract_strided_slice %38 {offsets = [0, 16], sizes = [8, 8], strides = [1, 1]} : vector<16x32xf32> to vector<8x8xf32>
    %83 = vector.extract_strided_slice %39 {offsets = [0, 16], sizes = [8, 8], strides = [1, 1]} : vector<16x32xf32> to vector<8x8xf32>
    %84 = tpu.transpose %82, [1, 0] : vector<8x8xf32> -> vector<8x8xf32>
    %cst_30 = arith.constant dense<0.000000e+00> : vector<8x8xf32>
    %85 = tpu.matmul %81, %84, %cst_30 {dimension_numbers = #tpu.dot_dimension_numbers<[1], [0], [0], [1], [0, 0, 1, 1], [], []>} : vector<8x8xf32>, vector<8x8xf32>, vector<8x8xf32> -> vector<8x8xf32>
    %cst_31 = arith.constant 0.353553385 : f32
    %86 = vector.broadcast %cst_31 : f32 to vector<8x8xf32>
    %87 = arith.mulf %85, %86 : vector<8x8xf32>
    %88 = vector.broadcast %40 : vector<1x8xf32> to vector<8x8xf32>
    %89 = arith.addf %87, %88 : vector<8x8xf32>
    %cst_32 = arith.constant dense<0xFF800000> : vector<8xf32>
    %90 = vector.multi_reduction <maximumf>, %89, %cst_32 [1] : vector<8x8xf32> to vector<8xf32>
    %91 = vector.shape_cast %90 : vector<8xf32> to vector<8x1xf32>
    %92 = vector.broadcast %91 : vector<8x1xf32> to vector<8x8xf32>
    %93 = arith.subf %89, %92 : vector<8x8xf32>
    %94 = math.exp %93 : vector<8x8xf32>
    %cst_33 = arith.constant dense<0.000000e+00> : vector<8xf32>
    %95 = vector.multi_reduction <add>, %94, %cst_33 [1] : vector<8x8xf32> to vector<8xf32>
    %96 = vector.shape_cast %95 : vector<8xf32> to vector<8x1xf32>
    %97 = tpu.reciprocal %96 {approx = true} : vector<8x1xf32> -> vector<8x1xf32>
    %98 = vector.broadcast %97 : vector<8x1xf32> to vector<8x8xf32>
    %99 = arith.mulf %94, %98 : vector<8x8xf32>
    %cst_34 = arith.constant dense<0.000000e+00> : vector<8x8xf32>
    %100 = tpu.matmul %99, %83, %cst_34 {dimension_numbers = #tpu.dot_dimension_numbers<[1], [0], [0], [1], [0, 0, 1, 1], [], []>} : vector<8x8xf32>, vector<8x8xf32>, vector<8x8xf32> -> vector<8x8xf32>
    %101 = vector.extract_strided_slice %37 {offsets = [0, 24], sizes = [8, 8], strides = [1, 1]} : vector<16x32xf32> to vector<8x8xf32>
    %102 = vector.extract_strided_slice %38 {offsets = [0, 24], sizes = [8, 8], strides = [1, 1]} : vector<16x32xf32> to vector<8x8xf32>
    %103 = vector.extract_strided_slice %39 {offsets = [0, 24], sizes = [8, 8], strides = [1, 1]} : vector<16x32xf32> to vector<8x8xf32>
    %104 = tpu.transpose %102, [1, 0] : vector<8x8xf32> -> vector<8x8xf32>
    %cst_35 = arith.constant dense<0.000000e+00> : vector<8x8xf32>
    %105 = tpu.matmul %101, %104, %cst_35 {dimension_numbers = #tpu.dot_dimension_numbers<[1], [0], [0], [1], [0, 0, 1, 1], [], []>} : vector<8x8xf32>, vector<8x8xf32>, vector<8x8xf32> -> vector<8x8xf32>
    %cst_36 = arith.constant 0.353553385 : f32
    %106 = vector.broadcast %cst_36 : f32 to vector<8x8xf32>
    %107 = arith.mulf %105, %106 : vector<8x8xf32>
    %108 = vector.broadcast %40 : vector<1x8xf32> to vector<8x8xf32>
    %109 = arith.addf %107, %108 : vector<8x8xf32>
    %cst_37 = arith.constant dense<0xFF800000> : vector<8xf32>
    %110 = vector.multi_reduction <maximumf>, %109, %cst_37 [1] : vector<8x8xf32> to vector<8xf32>
    %111 = vector.shape_cast %110 : vector<8xf32> to vector<8x1xf32>
    %112 = vector.broadcast %111 : vector<8x1xf32> to vector<8x8xf32>
    %113 = arith.subf %109, %112 : vector<8x8xf32>
    %114 = math.exp %113 : vector<8x8xf32>
    %cst_38 = arith.constant dense<0.000000e+00> : vector<8xf32>
    %115 = vector.multi_reduction <add>, %114, %cst_38 [1] : vector<8x8xf32> to vector<8xf32>
    %116 = vector.shape_cast %115 : vector<8xf32> to vector<8x1xf32>
    %117 = tpu.reciprocal %116 {approx = true} : vector<8x1xf32> -> vector<8x1xf32>
    %118 = vector.broadcast %117 : vector<8x1xf32> to vector<8x8xf32>
    %119 = arith.mulf %114, %118 : vector<8x8xf32>
    %cst_39 = arith.constant dense<0.000000e+00> : vector<8x8xf32>
    %120 = tpu.matmul %119, %103, %cst_39 {dimension_numbers = #tpu.dot_dimension_numbers<[1], [0], [0], [1], [0, 0, 1, 1], [], []>} : vector<8x8xf32>, vector<8x8xf32>, vector<8x8xf32> -> vector<8x8xf32>
    %121 = tpu.concatenate %60, %80, %100, %120 in 1 : vector<8x8xf32>, vector<8x8xf32>, vector<8x8xf32>, vector<8x8xf32> -> vector<8x32xf32>
    %122 = vector.extract_strided_slice %29 {offsets = [1, 0], sizes = [1, 8], strides = [1, 1]} : vector<2x8xf32> to vector<1x8xf32>
    %123 = vector.extract_strided_slice %37 {offsets = [8, 0], sizes = [8, 8], strides = [1, 1]} : vector<16x32xf32> to vector<8x8xf32>
    %124 = vector.extract_strided_slice %38 {offsets = [8, 0], sizes = [8, 8], strides = [1, 1]} : vector<16x32xf32> to vector<8x8xf32>
    %125 = vector.extract_strided_slice %39 {offsets = [8, 0], sizes = [8, 8], strides = [1, 1]} : vector<16x32xf32> to vector<8x8xf32>
    %126 = tpu.transpose %124, [1, 0] : vector<8x8xf32> -> vector<8x8xf32>
    %cst_40 = arith.constant dense<0.000000e+00> : vector<8x8xf32>
    %127 = tpu.matmul %123, %126, %cst_40 {dimension_numbers = #tpu.dot_dimension_numbers<[1], [0], [0], [1], [0, 0, 1, 1], [], []>} : vector<8x8xf32>, vector<8x8xf32>, vector<8x8xf32> -> vector<8x8xf32>
    %cst_41 = arith.constant 0.353553385 : f32
    %128 = vector.broadcast %cst_41 : f32 to vector<8x8xf32>
    %129 = arith.mulf %127, %128 : vector<8x8xf32>
    %130 = vector.broadcast %122 : vector<1x8xf32> to vector<8x8xf32>
    %131 = arith.addf %129, %130 : vector<8x8xf32>
    %cst_42 = arith.constant dense<0xFF800000> : vector<8xf32>
    %132 = vector.multi_reduction <maximumf>, %131, %cst_42 [1] : vector<8x8xf32> to vector<8xf32>
    %133 = vector.shape_cast %132 : vector<8xf32> to vector<8x1xf32>
    %134 = vector.broadcast %133 : vector<8x1xf32> to vector<8x8xf32>
    %135 = arith.subf %131, %134 : vector<8x8xf32>
    %136 = math.exp %135 : vector<8x8xf32>
    %cst_43 = arith.constant dense<0.000000e+00> : vector<8xf32>
    %137 = vector.multi_reduction <add>, %136, %cst_43 [1] : vector<8x8xf32> to vector<8xf32>
    %138 = vector.shape_cast %137 : vector<8xf32> to vector<8x1xf32>
    %139 = tpu.reciprocal %138 {approx = true} : vector<8x1xf32> -> vector<8x1xf32>
    %140 = vector.broadcast %139 : vector<8x1xf32> to vector<8x8xf32>
    %141 = arith.mulf %136, %140 : vector<8x8xf32>
    %cst_44 = arith.constant dense<0.000000e+00> : vector<8x8xf32>
    %142 = tpu.matmul %141, %125, %cst_44 {dimension_numbers = #tpu.dot_dimension_numbers<[1], [0], [0], [1], [0, 0, 1, 1], [], []>} : vector<8x8xf32>, vector<8x8xf32>, vector<8x8xf32> -> vector<8x8xf32>
    %143 = vector.extract_strided_slice %37 {offsets = [8, 8], sizes = [8, 8], strides = [1, 1]} : vector<16x32xf32> to vector<8x8xf32>
    %144 = vector.extract_strided_slice %38 {offsets = [8, 8], sizes = [8, 8], strides = [1, 1]} : vector<16x32xf32> to vector<8x8xf32>
    %145 = vector.extract_strided_slice %39 {offsets = [8, 8], sizes = [8, 8], strides = [1, 1]} : vector<16x32xf32> to vector<8x8xf32>
    %146 = tpu.transpose %144, [1, 0] : vector<8x8xf32> -> vector<8x8xf32>
    %cst_45 = arith.constant dense<0.000000e+00> : vector<8x8xf32>
    %147 = tpu.matmul %143, %146, %cst_45 {dimension_numbers = #tpu.dot_dimension_numbers<[1], [0], [0], [1], [0, 0, 1, 1], [], []>} : vector<8x8xf32>, vector<8x8xf32>, vector<8x8xf32> -> vector<8x8xf32>
    %cst_46 = arith.constant 0.353553385 : f32
    %148 = vector.broadcast %cst_46 : f32 to vector<8x8xf32>
    %149 = arith.mulf %147, %148 : vector<8x8xf32>
    %150 = vector.broadcast %122 : vector<1x8xf32> to vector<8x8xf32>
    %151 = arith.addf %149, %150 : vector<8x8xf32>
    %cst_47 = arith.constant dense<0xFF800000> : vector<8xf32>
    %152 = vector.multi_reduction <maximumf>, %151, %cst_47 [1] : vector<8x8xf32> to vector<8xf32>
    %153 = vector.shape_cast %152 : vector<8xf32> to vector<8x1xf32>
    %154 = vector.broadcast %153 : vector<8x1xf32> to vector<8x8xf32>
    %155 = arith.subf %151, %154 : vector<8x8xf32>
    %156 = math.exp %155 : vector<8x8xf32>
    %cst_48 = arith.constant dense<0.000000e+00> : vector<8xf32>
    %157 = vector.multi_reduction <add>, %156, %cst_48 [1] : vector<8x8xf32> to vector<8xf32>
    %158 = vector.shape_cast %157 : vector<8xf32> to vector<8x1xf32>
    %159 = tpu.reciprocal %158 {approx = true} : vector<8x1xf32> -> vector<8x1xf32>
    %160 = vector.broadcast %159 : vector<8x1xf32> to vector<8x8xf32>
    %161 = arith.mulf %156, %160 : vector<8x8xf32>
    %cst_49 = arith.constant dense<0.000000e+00> : vector<8x8xf32>
    %162 = tpu.matmul %161, %145, %cst_49 {dimension_numbers = #tpu.dot_dimension_numbers<[1], [0], [0], [1], [0, 0, 1, 1], [], []>} : vector<8x8xf32>, vector<8x8xf32>, vector<8x8xf32> -> vector<8x8xf32>
    %163 = vector.extract_strided_slice %37 {offsets = [8, 16], sizes = [8, 8], strides = [1, 1]} : vector<16x32xf32> to vector<8x8xf32>
    %164 = vector.extract_strided_slice %38 {offsets = [8, 16], sizes = [8, 8], strides = [1, 1]} : vector<16x32xf32> to vector<8x8xf32>
    %165 = vector.extract_strided_slice %39 {offsets = [8, 16], sizes = [8, 8], strides = [1, 1]} : vector<16x32xf32> to vector<8x8xf32>
    %166 = tpu.transpose %164, [1, 0] : vector<8x8xf32> -> vector<8x8xf32>
    %cst_50 = arith.constant dense<0.000000e+00> : vector<8x8xf32>
    %167 = tpu.matmul %163, %166, %cst_50 {dimension_numbers = #tpu.dot_dimension_numbers<[1], [0], [0], [1], [0, 0, 1, 1], [], []>} : vector<8x8xf32>, vector<8x8xf32>, vector<8x8xf32> -> vector<8x8xf32>
    %cst_51 = arith.constant 0.353553385 : f32
    %168 = vector.broadcast %cst_51 : f32 to vector<8x8xf32>
    %169 = arith.mulf %167, %168 : vector<8x8xf32>
    %170 = vector.broadcast %122 : vector<1x8xf32> to vector<8x8xf32>
    %171 = arith.addf %169, %170 : vector<8x8xf32>
    %cst_52 = arith.constant dense<0xFF800000> : vector<8xf32>
    %172 = vector.multi_reduction <maximumf>, %171, %cst_52 [1] : vector<8x8xf32> to vector<8xf32>
    %173 = vector.shape_cast %172 : vector<8xf32> to vector<8x1xf32>
    %174 = vector.broadcast %173 : vector<8x1xf32> to vector<8x8xf32>
    %175 = arith.subf %171, %174 : vector<8x8xf32>
    %176 = math.exp %175 : vector<8x8xf32>
    %cst_53 = arith.constant dense<0.000000e+00> : vector<8xf32>
    %177 = vector.multi_reduction <add>, %176, %cst_53 [1] : vector<8x8xf32> to vector<8xf32>
    %178 = vector.shape_cast %177 : vector<8xf32> to vector<8x1xf32>
    %179 = tpu.reciprocal %178 {approx = true} : vector<8x1xf32> -> vector<8x1xf32>
    %180 = vector.broadcast %179 : vector<8x1xf32> to vector<8x8xf32>
    %181 = arith.mulf %176, %180 : vector<8x8xf32>
    %cst_54 = arith.constant dense<0.000000e+00> : vector<8x8xf32>
    %182 = tpu.matmul %181, %165, %cst_54 {dimension_numbers = #tpu.dot_dimension_numbers<[1], [0], [0], [1], [0, 0, 1, 1], [], []>} : vector<8x8xf32>, vector<8x8xf32>, vector<8x8xf32> -> vector<8x8xf32>
    %183 = vector.extract_strided_slice %37 {offsets = [8, 24], sizes = [8, 8], strides = [1, 1]} : vector<16x32xf32> to vector<8x8xf32>
    %184 = vector.extract_strided_slice %38 {offsets = [8, 24], sizes = [8, 8], strides = [1, 1]} : vector<16x32xf32> to vector<8x8xf32>
    %185 = vector.extract_strided_slice %39 {offsets = [8, 24], sizes = [8, 8], strides = [1, 1]} : vector<16x32xf32> to vector<8x8xf32>
    %186 = tpu.transpose %184, [1, 0] : vector<8x8xf32> -> vector<8x8xf32>
    %cst_55 = arith.constant dense<0.000000e+00> : vector<8x8xf32>
    %187 = tpu.matmul %183, %186, %cst_55 {dimension_numbers = #tpu.dot_dimension_numbers<[1], [0], [0], [1], [0, 0, 1, 1], [], []>} : vector<8x8xf32>, vector<8x8xf32>, vector<8x8xf32> -> vector<8x8xf32>
    %cst_56 = arith.constant 0.353553385 : f32
    %188 = vector.broadcast %cst_56 : f32 to vector<8x8xf32>
    %189 = arith.mulf %187, %188 : vector<8x8xf32>
    %190 = vector.broadcast %122 : vector<1x8xf32> to vector<8x8xf32>
    %191 = arith.addf %189, %190 : vector<8x8xf32>
    %cst_57 = arith.constant dense<0xFF800000> : vector<8xf32>
    %192 = vector.multi_reduction <maximumf>, %191, %cst_57 [1] : vector<8x8xf32> to vector<8xf32>
    %193 = vector.shape_cast %192 : vector<8xf32> to vector<8x1xf32>
    %194 = vector.broadcast %193 : vector<8x1xf32> to vector<8x8xf32>
    %195 = arith.subf %191, %194 : vector<8x8xf32>
    %196 = math.exp %195 : vector<8x8xf32>
    %cst_58 = arith.constant dense<0.000000e+00> : vector<8xf32>
    %197 = vector.multi_reduction <add>, %196, %cst_58 [1] : vector<8x8xf32> to vector<8xf32>
    %198 = vector.shape_cast %197 : vector<8xf32> to vector<8x1xf32>
    %199 = tpu.reciprocal %198 {approx = true} : vector<8x1xf32> -> vector<8x1xf32>
    %200 = vector.broadcast %199 : vector<8x1xf32> to vector<8x8xf32>
    %201 = arith.mulf %196, %200 : vector<8x8xf32>
    %cst_59 = arith.constant dense<0.000000e+00> : vector<8x8xf32>
    %202 = tpu.matmul %201, %185, %cst_59 {dimension_numbers = #tpu.dot_dimension_numbers<[1], [0], [0], [1], [0, 0, 1, 1], [], []>} : vector<8x8xf32>, vector<8x8xf32>, vector<8x8xf32> -> vector<8x8xf32>
    %203 = tpu.concatenate %142, %162, %182, %202 in 1 : vector<8x8xf32>, vector<8x8xf32>, vector<8x8xf32>, vector<8x8xf32> -> vector<8x32xf32>
    %204 = tpu.concatenate %121, %203 in 0 : vector<8x32xf32>, vector<8x32xf32> -> vector<16x32xf32>
    %c0_60 = arith.constant 0 : index
    %c0_61 = arith.constant 0 : index
    %c0_62 = arith.constant 0 : index
    %205 = vector.load %arg6[%c0_60, %c0_61, %c0_62] : memref<2x32x32xf32, #tpu.memory_space<vmem>>, vector<1x32x32xf32>
    %206 = vector.shape_cast %205 : vector<1x32x32xf32> to vector<32x32xf32>
    %cst_63 = arith.constant dense<0.000000e+00> : vector<16x32xf32>
    %207 = tpu.matmul %204, %206, %cst_63 {dimension_numbers = #tpu.dot_dimension_numbers<[1], [0], [0], [1], [0, 0, 1, 1], [], []>} : vector<16x32xf32>, vector<32x32xf32>, vector<16x32xf32> -> vector<16x32xf32>
    %c0_64 = arith.constant 0 : index
    %c0_65 = arith.constant 0 : index
    %c0_66 = arith.constant 0 : index
    %208 = vector.load %arg7[%c0_64, %c0_65, %c0_66] : memref<2x1x32xf32, #tpu.memory_space<vmem>>, vector<1x1x32xf32>
    %209 = vector.shape_cast %208 : vector<1x1x32xf32> to vector<1x32xf32>
    %210 = vector.broadcast %209 : vector<1x32xf32> to vector<16x32xf32>
    %211 = arith.addf %207, %210 : vector<16x32xf32>
    %212 = arith.addf %211, %24 : vector<16x32xf32>
    %c0_67 = arith.constant 0 : index
    %c0_68 = arith.constant 0 : index
    %c0_69 = arith.constant 0 : index
    %213 = vector.load %arg8[%c0_67, %c0_68, %c0_69] : memref<2x1x32xf32, #tpu.memory_space<vmem>>, vector<1x1x32xf32>
    %214 = vector.shape_cast %213 : vector<1x1x32xf32> to vector<1x32xf32>
    %c0_70 = arith.constant 0 : index
    %c0_71 = arith.constant 0 : index
    %c0_72 = arith.constant 0 : index
    %215 = vector.load %arg9[%c0_70, %c0_71, %c0_72] : memref<2x1x32xf32, #tpu.memory_space<vmem>>, vector<1x1x32xf32>
    %216 = vector.shape_cast %215 : vector<1x1x32xf32> to vector<1x32xf32>
    %cst_73 = arith.constant dense<0.000000e+00> : vector<16xf32>
    %217 = vector.multi_reduction <add>, %212, %cst_73 [1] : vector<16x32xf32> to vector<16xf32>
    %218 = vector.shape_cast %217 : vector<16xf32> to vector<16x1xf32>
    %cst_74 = arith.constant 3.200000e+01 : f32
    %219 = vector.broadcast %cst_74 : f32 to vector<16x1xf32>
    %220 = arith.divf %218, %219 : vector<16x1xf32>
    %221 = vector.broadcast %220 : vector<16x1xf32> to vector<16x32xf32>
    %222 = arith.subf %212, %221 : vector<16x32xf32>
    %223 = arith.mulf %222, %222 : vector<16x32xf32>
    %cst_75 = arith.constant dense<0.000000e+00> : vector<16xf32>
    %224 = vector.multi_reduction <add>, %223, %cst_75 [1] : vector<16x32xf32> to vector<16xf32>
    %225 = vector.shape_cast %224 : vector<16xf32> to vector<16x1xf32>
    %cst_76 = arith.constant 3.200000e+01 : f32
    %226 = vector.broadcast %cst_76 : f32 to vector<16x1xf32>
    %227 = arith.divf %225, %226 : vector<16x1xf32>
    %228 = vector.broadcast %220 : vector<16x1xf32> to vector<16x32xf32>
    %229 = arith.subf %212, %228 : vector<16x32xf32>
    %cst_77 = arith.constant 9.99999996E-13 : f32
    %230 = vector.broadcast %cst_77 : f32 to vector<16x1xf32>
    %231 = arith.addf %227, %230 : vector<16x1xf32>
    %232 = math.rsqrt %231 : vector<16x1xf32>
    %233 = vector.broadcast %232 : vector<16x1xf32> to vector<16x32xf32>
    %234 = arith.mulf %229, %233 : vector<16x32xf32>
    %235 = vector.broadcast %214 : vector<1x32xf32> to vector<16x32xf32>
    %236 = arith.mulf %234, %235 : vector<16x32xf32>
    %237 = vector.broadcast %216 : vector<1x32xf32> to vector<16x32xf32>
    %238 = arith.addf %236, %237 : vector<16x32xf32>
    %c0_78 = arith.constant 0 : index
    %c0_79 = arith.constant 0 : index
    %c0_80 = arith.constant 0 : index
    %239 = vector.load %arg10[%c0_78, %c0_79, %c0_80] : memref<2x32x64xf32, #tpu.memory_space<vmem>>, vector<1x32x64xf32>
    %240 = vector.shape_cast %239 : vector<1x32x64xf32> to vector<32x64xf32>
    %cst_81 = arith.constant dense<0.000000e+00> : vector<16x64xf32>
    %241 = tpu.matmul %238, %240, %cst_81 {dimension_numbers = #tpu.dot_dimension_numbers<[1], [0], [0], [1], [0, 0, 1, 1], [], []>} : vector<16x32xf32>, vector<32x64xf32>, vector<16x64xf32> -> vector<16x64xf32>
    %c0_82 = arith.constant 0 : index
    %c0_83 = arith.constant 0 : index
    %c0_84 = arith.constant 0 : index
    %242 = vector.load %arg11[%c0_82, %c0_83, %c0_84] : memref<2x1x64xf32, #tpu.memory_space<vmem>>, vector<1x1x64xf32>
    %243 = vector.shape_cast %242 : vector<1x1x64xf32> to vector<1x64xf32>
    %244 = vector.broadcast %243 : vector<1x64xf32> to vector<16x64xf32>
    %245 = arith.addf %241, %244 : vector<16x64xf32>
    %cst_85 = arith.constant 5.000000e-01 : f32
    %246 = vector.broadcast %cst_85 : f32 to vector<16x64xf32>
    %247 = arith.mulf %246, %245 : vector<16x64xf32>
    %cst_86 = arith.constant 4.471500e-02 : f32
    %248 = vector.broadcast %cst_86 : f32 to vector<16x64xf32>
    %249 = arith.mulf %248, %245 : vector<16x64xf32>
    %250 = arith.mulf %249, %245 : vector<16x64xf32>
    %251 = arith.mulf %250, %245 : vector<16x64xf32>
    %252 = arith.addf %245, %251 : vector<16x64xf32>
    %cst_87 = arith.constant 0.797884583 : f32
    %253 = vector.broadcast %cst_87 : f32 to vector<16x64xf32>
    %254 = arith.mulf %253, %252 : vector<16x64xf32>
    %255 = math.tanh %254 : vector<16x64xf32>
    %cst_88 = arith.constant 1.000000e+00 : f32
    %256 = vector.broadcast %cst_88 : f32 to vector<16x64xf32>
    %257 = arith.addf %256, %255 : vector<16x64xf32>
    %258 = arith.mulf %247, %257 : vector<16x64xf32>
    %c0_89 = arith.constant 0 : index
    %c0_90 = arith.constant 0 : index
    %c0_91 = arith.constant 0 : index
    %259 = vector.load %arg12[%c0_89, %c0_90, %c0_91] : memref<2x64x32xf32, #tpu.memory_space<vmem>>, vector<1x64x32xf32>
    %260 = vector.shape_cast %259 : vector<1x64x32xf32> to vector<64x32xf32>
    %cst_92 = arith.constant dense<0.000000e+00> : vector<16x32xf32>
    %261 = tpu.matmul %258, %260, %cst_92 {dimension_numbers = #tpu.dot_dimension_numbers<[1], [0], [0], [1], [0, 0, 1, 1], [], []>} : vector<16x64xf32>, vector<64x32xf32>, vector<16x32xf32> -> vector<16x32xf32>
    %c0_93 = arith.constant 0 : index
    %c0_94 = arith.constant 0 : index
    %c0_95 = arith.constant 0 : index
    %262 = vector.load %arg13[%c0_93, %c0_94, %c0_95] : memref<2x1x32xf32, #tpu.memory_space<vmem>>, vector<1x1x32xf32>
    %263 = vector.shape_cast %262 : vector<1x1x32xf32> to vector<1x32xf32>
    %264 = vector.broadcast %263 : vector<1x32xf32> to vector<16x32xf32>
    %265 = arith.addf %261, %264 : vector<16x32xf32>
    %266 = arith.addf %265, %238 : vector<16x32xf32>
    %c0_96 = arith.constant 0 : index
    %c0_97 = arith.constant 0 : index
    %c0_98 = arith.constant 0 : index
    %267 = vector.load %arg14[%c0_96, %c0_97, %c0_98] : memref<2x1x32xf32, #tpu.memory_space<vmem>>, vector<1x1x32xf32>
    %268 = vector.shape_cast %267 : vector<1x1x32xf32> to vector<1x32xf32>
    %c0_99 = arith.constant 0 : index
    %c0_100 = arith.constant 0 : index
    %c0_101 = arith.constant 0 : index
    %269 = vector.load %arg15[%c0_99, %c0_100, %c0_101] : memref<2x1x32xf32, #tpu.memory_space<vmem>>, vector<1x1x32xf32>
    %270 = vector.shape_cast %269 : vector<1x1x32xf32> to vector<1x32xf32>
    %cst_102 = arith.constant dense<0.000000e+00> : vector<16xf32>
    %271 = vector.multi_reduction <add>, %266, %cst_102 [1] : vector<16x32xf32> to vector<16xf32>
    %272 = vector.shape_cast %271 : vector<16xf32> to vector<16x1xf32>
    %cst_103 = arith.constant 3.200000e+01 : f32
    %273 = vector.broadcast %cst_103 : f32 to vector<16x1xf32>
    %274 = arith.divf %272, %273 : vector<16x1xf32>
    %275 = vector.broadcast %274 : vector<16x1xf32> to vector<16x32xf32>
    %276 = arith.subf %266, %275 : vector<16x32xf32>
    %277 = arith.mulf %276, %276 : vector<16x32xf32>
    %cst_104 = arith.constant dense<0.000000e+00> : vector<16xf32>
    %278 = vector.multi_reduction <add>, %277, %cst_104 [1] : vector<16x32xf32> to vector<16xf32>
    %279 = vector.shape_cast %278 : vector<16xf32> to vector<16x1xf32>
    %cst_105 = arith.constant 3.200000e+01 : f32
    %280 = vector.broadcast %cst_105 : f32 to vector<16x1xf32>
    %281 = arith.divf %279, %280 : vector<16x1xf32>
    %282 = vector.broadcast %274 : vector<16x1xf32> to vector<16x32xf32>
    %283 = arith.subf %266, %282 : vector<16x32xf32>
    %cst_106 = arith.constant 9.99999996E-13 : f32
    %284 = vector.broadcast %cst_106 : f32 to vector<16x1xf32>
    %285 = arith.addf %281, %284 : vector<16x1xf32>
    %286 = math.rsqrt %285 : vector<16x1xf32>
    %287 = vector.broadcast %286 : vector<16x1xf32> to vector<16x32xf32>
    %288 = arith.mulf %283, %287 : vector<16x32xf32>
    %289 = vector.broadcast %268 : vector<1x32xf32> to vector<16x32xf32>
    %290 = arith.mulf %288, %289 : vector<16x32xf32>
    %291 = vector.broadcast %270 : vector<1x32xf32> to vector<16x32xf32>
    %292 = arith.addf %290, %291 : vector<16x32xf32>
    %c1 = arith.constant 1 : index
    %c0_107 = arith.constant 0 : index
    %c0_108 = arith.constant 0 : index
    %293 = vector.load %arg4[%c1, %c0_107, %c0_108] : memref<2x32x96xf32, #tpu.memory_space<vmem>>, vector<1x32x96xf32>
    %294 = vector.shape_cast %293 : vector<1x32x96xf32> to vector<32x96xf32>
    %cst_109 = arith.constant dense<0.000000e+00> : vector<16x96xf32>
    %295 = tpu.matmul %292, %294, %cst_109 {dimension_numbers = #tpu.dot_dimension_numbers<[1], [0], [0], [1], [0, 0, 1, 1], [], []>} : vector<16x32xf32>, vector<32x96xf32>, vector<16x96xf32> -> vector<16x96xf32>
    %c1_110 = arith.constant 1 : index
    %c0_111 = arith.constant 0 : index
    %c0_112 = arith.constant 0 : index
    %296 = vector.load %arg5[%c1_110, %c0_111, %c0_112] : memref<2x1x96xf32, #tpu.memory_space<vmem>>, vector<1x1x96xf32>
    %297 = vector.shape_cast %296 : vector<1x1x96xf32> to vector<1x96xf32>
    %298 = vector.broadcast %297 : vector<1x96xf32> to vector<16x96xf32>
    %299 = arith.addf %295, %298 : vector<16x96xf32>
    %300 = vector.extract_strided_slice %299 {offsets = [0, 0], sizes = [16, 32], strides = [1, 1]} : vector<16x96xf32> to vector<16x32xf32>
    %301 = vector.extract_strided_slice %299 {offsets = [0, 32], sizes = [16, 32], strides = [1, 1]} : vector<16x96xf32> to vector<16x32xf32>
    %302 = vector.extract_strided_slice %299 {offsets = [0, 64], sizes = [16, 32], strides = [1, 1]} : vector<16x96xf32> to vector<16x32xf32>
    %303 = vector.extract_strided_slice %29 {offsets = [0, 0], sizes = [1, 8], strides = [1, 1]} : vector<2x8xf32> to vector<1x8xf32>
    %304 = vector.extract_strided_slice %300 {offsets = [0, 0], sizes = [8, 8], strides = [1, 1]} : vector<16x32xf32> to vector<8x8xf32>
    %305 = vector.extract_strided_slice %301 {offsets = [0, 0], sizes = [8, 8], strides = [1, 1]} : vector<16x32xf32> to vector<8x8xf32>
    %306 = vector.extract_strided_slice %302 {offsets = [0, 0], sizes = [8, 8], strides = [1, 1]} : vector<16x32xf32> to vector<8x8xf32>
    %307 = tpu.transpose %305, [1, 0] : vector<8x8xf32> -> vector<8x8xf32>
    %cst_113 = arith.constant dense<0.000000e+00> : vector<8x8xf32>
    %308 = tpu.matmul %304, %307, %cst_113 {dimension_numbers = #tpu.dot_dimension_numbers<[1], [0], [0], [1], [0, 0, 1, 1], [], []>} : vector<8x8xf32>, vector<8x8xf32>, vector<8x8xf32> -> vector<8x8xf32>
    %cst_114 = arith.constant 0.353553385 : f32
    %309 = vector.broadcast %cst_114 : f32 to vector<8x8xf32>
    %310 = arith.mulf %308, %309 : vector<8x8xf32>
    %311 = vector.broadcast %303 : vector<1x8xf32> to vector<8x8xf32>
    %312 = arith.addf %310, %311 : vector<8x8xf32>
    %cst_115 = arith.constant dense<0xFF800000> : vector<8xf32>
    %313 = vector.multi_reduction <maximumf>, %312, %cst_115 [1] : vector<8x8xf32> to vector<8xf32>
    %314 = vector.shape_cast %313 : vector<8xf32> to vector<8x1xf32>
    %315 = vector.broadcast %314 : vector<8x1xf32> to vector<8x8xf32>
    %316 = arith.subf %312, %315 : vector<8x8xf32>
    %317 = math.exp %316 : vector<8x8xf32>
    %cst_116 = arith.constant dense<0.000000e+00> : vector<8xf32>
    %318 = vector.multi_reduction <add>, %317, %cst_116 [1] : vector<8x8xf32> to vector<8xf32>
    %319 = vector.shape_cast %318 : vector<8xf32> to vector<8x1xf32>
    %320 = tpu.reciprocal %319 {approx = true} : vector<8x1xf32> -> vector<8x1xf32>
    %321 = vector.broadcast %320 : vector<8x1xf32> to vector<8x8xf32>
    %322 = arith.mulf %317, %321 : vector<8x8xf32>
    %cst_117 = arith.constant dense<0.000000e+00> : vector<8x8xf32>
    %323 = tpu.matmul %322, %306, %cst_117 {dimension_numbers = #tpu.dot_dimension_numbers<[1], [0], [0], [1], [0, 0, 1, 1], [], []>} : vector<8x8xf32>, vector<8x8xf32>, vector<8x8xf32> -> vector<8x8xf32>
    %324 = vector.extract_strided_slice %300 {offsets = [0, 8], sizes = [8, 8], strides = [1, 1]} : vector<16x32xf32> to vector<8x8xf32>
    %325 = vector.extract_strided_slice %301 {offsets = [0, 8], sizes = [8, 8], strides = [1, 1]} : vector<16x32xf32> to vector<8x8xf32>
    %326 = vector.extract_strided_slice %302 {offsets = [0, 8], sizes = [8, 8], strides = [1, 1]} : vector<16x32xf32> to vector<8x8xf32>
    %327 = tpu.transpose %325, [1, 0] : vector<8x8xf32> -> vector<8x8xf32>
    %cst_118 = arith.constant dense<0.000000e+00> : vector<8x8xf32>
    %328 = tpu.matmul %324, %327, %cst_118 {dimension_numbers = #tpu.dot_dimension_numbers<[1], [0], [0], [1], [0, 0, 1, 1], [], []>} : vector<8x8xf32>, vector<8x8xf32>, vector<8x8xf32> -> vector<8x8xf32>
    %cst_119 = arith.constant 0.353553385 : f32
    %329 = vector.broadcast %cst_119 : f32 to vector<8x8xf32>
    %330 = arith.mulf %328, %329 : vector<8x8xf32>
    %331 = vector.broadcast %303 : vector<1x8xf32> to vector<8x8xf32>
    %332 = arith.addf %330, %331 : vector<8x8xf32>
    %cst_120 = arith.constant dense<0xFF800000> : vector<8xf32>
    %333 = vector.multi_reduction <maximumf>, %332, %cst_120 [1] : vector<8x8xf32> to vector<8xf32>
    %334 = vector.shape_cast %333 : vector<8xf32> to vector<8x1xf32>
    %335 = vector.broadcast %334 : vector<8x1xf32> to vector<8x8xf32>
    %336 = arith.subf %332, %335 : vector<8x8xf32>
    %337 = math.exp %336 : vector<8x8xf32>
    %cst_121 = arith.constant dense<0.000000e+00> : vector<8xf32>
    %338 = vector.multi_reduction <add>, %337, %cst_121 [1] : vector<8x8xf32> to vector<8xf32>
    %339 = vector.shape_cast %338 : vector<8xf32> to vector<8x1xf32>
    %340 = tpu.reciprocal %339 {approx = true} : vector<8x1xf32> -> vector<8x1xf32>
    %341 = vector.broadcast %340 : vector<8x1xf32> to vector<8x8xf32>
    %342 = arith.mulf %337, %341 : vector<8x8xf32>
    %cst_122 = arith.constant dense<0.000000e+00> : vector<8x8xf32>
    %343 = tpu.matmul %342, %326, %cst_122 {dimension_numbers = #tpu.dot_dimension_numbers<[1], [0], [0], [1], [0, 0, 1, 1], [], []>} : vector<8x8xf32>, vector<8x8xf32>, vector<8x8xf32> -> vector<8x8xf32>
    %344 = vector.extract_strided_slice %300 {offsets = [0, 16], sizes = [8, 8], strides = [1, 1]} : vector<16x32xf32> to vector<8x8xf32>
    %345 = vector.extract_strided_slice %301 {offsets = [0, 16], sizes = [8, 8], strides = [1, 1]} : vector<16x32xf32> to vector<8x8xf32>
    %346 = vector.extract_strided_slice %302 {offsets = [0, 16], sizes = [8, 8], strides = [1, 1]} : vector<16x32xf32> to vector<8x8xf32>
    %347 = tpu.transpose %345, [1, 0] : vector<8x8xf32> -> vector<8x8xf32>
    %cst_123 = arith.constant dense<0.000000e+00> : vector<8x8xf32>
    %348 = tpu.matmul %344, %347, %cst_123 {dimension_numbers = #tpu.dot_dimension_numbers<[1], [0], [0], [1], [0, 0, 1, 1], [], []>} : vector<8x8xf32>, vector<8x8xf32>, vector<8x8xf32> -> vector<8x8xf32>
    %cst_124 = arith.constant 0.353553385 : f32
    %349 = vector.broadcast %cst_124 : f32 to vector<8x8xf32>
    %350 = arith.mulf %348, %349 : vector<8x8xf32>
    %351 = vector.broadcast %303 : vector<1x8xf32> to vector<8x8xf32>
    %352 = arith.addf %350, %351 : vector<8x8xf32>
    %cst_125 = arith.constant dense<0xFF800000> : vector<8xf32>
    %353 = vector.multi_reduction <maximumf>, %352, %cst_125 [1] : vector<8x8xf32> to vector<8xf32>
    %354 = vector.shape_cast %353 : vector<8xf32> to vector<8x1xf32>
    %355 = vector.broadcast %354 : vector<8x1xf32> to vector<8x8xf32>
    %356 = arith.subf %352, %355 : vector<8x8xf32>
    %357 = math.exp %356 : vector<8x8xf32>
    %cst_126 = arith.constant dense<0.000000e+00> : vector<8xf32>
    %358 = vector.multi_reduction <add>, %357, %cst_126 [1] : vector<8x8xf32> to vector<8xf32>
    %359 = vector.shape_cast %358 : vector<8xf32> to vector<8x1xf32>
    %360 = tpu.reciprocal %359 {approx = true} : vector<8x1xf32> -> vector<8x1xf32>
    %361 = vector.broadcast %360 : vector<8x1xf32> to vector<8x8xf32>
    %362 = arith.mulf %357, %361 : vector<8x8xf32>
    %cst_127 = arith.constant dense<0.000000e+00> : vector<8x8xf32>
    %363 = tpu.matmul %362, %346, %cst_127 {dimension_numbers = #tpu.dot_dimension_numbers<[1], [0], [0], [1], [0, 0, 1, 1], [], []>} : vector<8x8xf32>, vector<8x8xf32>, vector<8x8xf32> -> vector<8x8xf32>
    %364 = vector.extract_strided_slice %300 {offsets = [0, 24], sizes = [8, 8], strides = [1, 1]} : vector<16x32xf32> to vector<8x8xf32>
    %365 = vector.extract_strided_slice %301 {offsets = [0, 24], sizes = [8, 8], strides = [1, 1]} : vector<16x32xf32> to vector<8x8xf32>
    %366 = vector.extract_strided_slice %302 {offsets = [0, 24], sizes = [8, 8], strides = [1, 1]} : vector<16x32xf32> to vector<8x8xf32>
    %367 = tpu.transpose %365, [1, 0] : vector<8x8xf32> -> vector<8x8xf32>
    %cst_128 = arith.constant dense<0.000000e+00> : vector<8x8xf32>
    %368 = tpu.matmul %364, %367, %cst_128 {dimension_numbers = #tpu.dot_dimension_numbers<[1], [0], [0], [1], [0, 0, 1, 1], [], []>} : vector<8x8xf32>, vector<8x8xf32>, vector<8x8xf32> -> vector<8x8xf32>
    %cst_129 = arith.constant 0.353553385 : f32
    %369 = vector.broadcast %cst_129 : f32 to vector<8x8xf32>
    %370 = arith.mulf %368, %369 : vector<8x8xf32>
    %371 = vector.broadcast %303 : vector<1x8xf32> to vector<8x8xf32>
    %372 = arith.addf %370, %371 : vector<8x8xf32>
    %cst_130 = arith.constant dense<0xFF800000> : vector<8xf32>
    %373 = vector.multi_reduction <maximumf>, %372, %cst_130 [1] : vector<8x8xf32> to vector<8xf32>
    %374 = vector.shape_cast %373 : vector<8xf32> to vector<8x1xf32>
    %375 = vector.broadcast %374 : vector<8x1xf32> to vector<8x8xf32>
    %376 = arith.subf %372, %375 : vector<8x8xf32>
    %377 = math.exp %376 : vector<8x8xf32>
    %cst_131 = arith.constant dense<0.000000e+00> : vector<8xf32>
    %378 = vector.multi_reduction <add>, %377, %cst_131 [1] : vector<8x8xf32> to vector<8xf32>
    %379 = vector.shape_cast %378 : vector<8xf32> to vector<8x1xf32>
    %380 = tpu.reciprocal %379 {approx = true} : vector<8x1xf32> -> vector<8x1xf32>
    %381 = vector.broadcast %380 : vector<8x1xf32> to vector<8x8xf32>
    %382 = arith.mulf %377, %381 : vector<8x8xf32>
    %cst_132 = arith.constant dense<0.000000e+00> : vector<8x8xf32>
    %383 = tpu.matmul %382, %366, %cst_132 {dimension_numbers = #tpu.dot_dimension_numbers<[1], [0], [0], [1], [0, 0, 1, 1], [], []>} : vector<8x8xf32>, vector<8x8xf32>, vector<8x8xf32> -> vector<8x8xf32>
    %384 = tpu.concatenate %323, %343, %363, %383 in 1 : vector<8x8xf32>, vector<8x8xf32>, vector<8x8xf32>, vector<8x8xf32> -> vector<8x32xf32>
    %385 = vector.extract_strided_slice %29 {offsets = [1, 0], sizes = [1, 8], strides = [1, 1]} : vector<2x8xf32> to vector<1x8xf32>
    %386 = vector.extract_strided_slice %300 {offsets = [8, 0], sizes = [8, 8], strides = [1, 1]} : vector<16x32xf32> to vector<8x8xf32>
    %387 = vector.extract_strided_slice %301 {offsets = [8, 0], sizes = [8, 8], strides = [1, 1]} : vector<16x32xf32> to vector<8x8xf32>
    %388 = vector.extract_strided_slice %302 {offsets = [8, 0], sizes = [8, 8], strides = [1, 1]} : vector<16x32xf32> to vector<8x8xf32>
    %389 = tpu.transpose %387, [1, 0] : vector<8x8xf32> -> vector<8x8xf32>
    %cst_133 = arith.constant dense<0.000000e+00> : vector<8x8xf32>
    %390 = tpu.matmul %386, %389, %cst_133 {dimension_numbers = #tpu.dot_dimension_numbers<[1], [0], [0], [1], [0, 0, 1, 1], [], []>} : vector<8x8xf32>, vector<8x8xf32>, vector<8x8xf32> -> vector<8x8xf32>
    %cst_134 = arith.constant 0.353553385 : f32
    %391 = vector.broadcast %cst_134 : f32 to vector<8x8xf32>
    %392 = arith.mulf %390, %391 : vector<8x8xf32>
    %393 = vector.broadcast %385 : vector<1x8xf32> to vector<8x8xf32>
    %394 = arith.addf %392, %393 : vector<8x8xf32>
    %cst_135 = arith.constant dense<0xFF800000> : vector<8xf32>
    %395 = vector.multi_reduction <maximumf>, %394, %cst_135 [1] : vector<8x8xf32> to vector<8xf32>
    %396 = vector.shape_cast %395 : vector<8xf32> to vector<8x1xf32>
    %397 = vector.broadcast %396 : vector<8x1xf32> to vector<8x8xf32>
    %398 = arith.subf %394, %397 : vector<8x8xf32>
    %399 = math.exp %398 : vector<8x8xf32>
    %cst_136 = arith.constant dense<0.000000e+00> : vector<8xf32>
    %400 = vector.multi_reduction <add>, %399, %cst_136 [1] : vector<8x8xf32> to vector<8xf32>
    %401 = vector.shape_cast %400 : vector<8xf32> to vector<8x1xf32>
    %402 = tpu.reciprocal %401 {approx = true} : vector<8x1xf32> -> vector<8x1xf32>
    %403 = vector.broadcast %402 : vector<8x1xf32> to vector<8x8xf32>
    %404 = arith.mulf %399, %403 : vector<8x8xf32>
    %cst_137 = arith.constant dense<0.000000e+00> : vector<8x8xf32>
    %405 = tpu.matmul %404, %388, %cst_137 {dimension_numbers = #tpu.dot_dimension_numbers<[1], [0], [0], [1], [0, 0, 1, 1], [], []>} : vector<8x8xf32>, vector<8x8xf32>, vector<8x8xf32> -> vector<8x8xf32>
    %406 = vector.extract_strided_slice %300 {offsets = [8, 8], sizes = [8, 8], strides = [1, 1]} : vector<16x32xf32> to vector<8x8xf32>
    %407 = vector.extract_strided_slice %301 {offsets = [8, 8], sizes = [8, 8], strides = [1, 1]} : vector<16x32xf32> to vector<8x8xf32>
    %408 = vector.extract_strided_slice %302 {offsets = [8, 8], sizes = [8, 8], strides = [1, 1]} : vector<16x32xf32> to vector<8x8xf32>
    %409 = tpu.transpose %407, [1, 0] : vector<8x8xf32> -> vector<8x8xf32>
    %cst_138 = arith.constant dense<0.000000e+00> : vector<8x8xf32>
    %410 = tpu.matmul %406, %409, %cst_138 {dimension_numbers = #tpu.dot_dimension_numbers<[1], [0], [0], [1], [0, 0, 1, 1], [], []>} : vector<8x8xf32>, vector<8x8xf32>, vector<8x8xf32> -> vector<8x8xf32>
    %cst_139 = arith.constant 0.353553385 : f32
    %411 = vector.broadcast %cst_139 : f32 to vector<8x8xf32>
    %412 = arith.mulf %410, %411 : vector<8x8xf32>
    %413 = vector.broadcast %385 : vector<1x8xf32> to vector<8x8xf32>
    %414 = arith.addf %412, %413 : vector<8x8xf32>
    %cst_140 = arith.constant dense<0xFF800000> : vector<8xf32>
    %415 = vector.multi_reduction <maximumf>, %414, %cst_140 [1] : vector<8x8xf32> to vector<8xf32>
    %416 = vector.shape_cast %415 : vector<8xf32> to vector<8x1xf32>
    %417 = vector.broadcast %416 : vector<8x1xf32> to vector<8x8xf32>
    %418 = arith.subf %414, %417 : vector<8x8xf32>
    %419 = math.exp %418 : vector<8x8xf32>
    %cst_141 = arith.constant dense<0.000000e+00> : vector<8xf32>
    %420 = vector.multi_reduction <add>, %419, %cst_141 [1] : vector<8x8xf32> to vector<8xf32>
    %421 = vector.shape_cast %420 : vector<8xf32> to vector<8x1xf32>
    %422 = tpu.reciprocal %421 {approx = true} : vector<8x1xf32> -> vector<8x1xf32>
    %423 = vector.broadcast %422 : vector<8x1xf32> to vector<8x8xf32>
    %424 = arith.mulf %419, %423 : vector<8x8xf32>
    %cst_142 = arith.constant dense<0.000000e+00> : vector<8x8xf32>
    %425 = tpu.matmul %424, %408, %cst_142 {dimension_numbers = #tpu.dot_dimension_numbers<[1], [0], [0], [1], [0, 0, 1, 1], [], []>} : vector<8x8xf32>, vector<8x8xf32>, vector<8x8xf32> -> vector<8x8xf32>
    %426 = vector.extract_strided_slice %300 {offsets = [8, 16], sizes = [8, 8], strides = [1, 1]} : vector<16x32xf32> to vector<8x8xf32>
    %427 = vector.extract_strided_slice %301 {offsets = [8, 16], sizes = [8, 8], strides = [1, 1]} : vector<16x32xf32> to vector<8x8xf32>
    %428 = vector.extract_strided_slice %302 {offsets = [8, 16], sizes = [8, 8], strides = [1, 1]} : vector<16x32xf32> to vector<8x8xf32>
    %429 = tpu.transpose %427, [1, 0] : vector<8x8xf32> -> vector<8x8xf32>
    %cst_143 = arith.constant dense<0.000000e+00> : vector<8x8xf32>
    %430 = tpu.matmul %426, %429, %cst_143 {dimension_numbers = #tpu.dot_dimension_numbers<[1], [0], [0], [1], [0, 0, 1, 1], [], []>} : vector<8x8xf32>, vector<8x8xf32>, vector<8x8xf32> -> vector<8x8xf32>
    %cst_144 = arith.constant 0.353553385 : f32
    %431 = vector.broadcast %cst_144 : f32 to vector<8x8xf32>
    %432 = arith.mulf %430, %431 : vector<8x8xf32>
    %433 = vector.broadcast %385 : vector<1x8xf32> to vector<8x8xf32>
    %434 = arith.addf %432, %433 : vector<8x8xf32>
    %cst_145 = arith.constant dense<0xFF800000> : vector<8xf32>
    %435 = vector.multi_reduction <maximumf>, %434, %cst_145 [1] : vector<8x8xf32> to vector<8xf32>
    %436 = vector.shape_cast %435 : vector<8xf32> to vector<8x1xf32>
    %437 = vector.broadcast %436 : vector<8x1xf32> to vector<8x8xf32>
    %438 = arith.subf %434, %437 : vector<8x8xf32>
    %439 = math.exp %438 : vector<8x8xf32>
    %cst_146 = arith.constant dense<0.000000e+00> : vector<8xf32>
    %440 = vector.multi_reduction <add>, %439, %cst_146 [1] : vector<8x8xf32> to vector<8xf32>
    %441 = vector.shape_cast %440 : vector<8xf32> to vector<8x1xf32>
    %442 = tpu.reciprocal %441 {approx = true} : vector<8x1xf32> -> vector<8x1xf32>
    %443 = vector.broadcast %442 : vector<8x1xf32> to vector<8x8xf32>
    %444 = arith.mulf %439, %443 : vector<8x8xf32>
    %cst_147 = arith.constant dense<0.000000e+00> : vector<8x8xf32>
    %445 = tpu.matmul %444, %428, %cst_147 {dimension_numbers = #tpu.dot_dimension_numbers<[1], [0], [0], [1], [0, 0, 1, 1], [], []>} : vector<8x8xf32>, vector<8x8xf32>, vector<8x8xf32> -> vector<8x8xf32>
    %446 = vector.extract_strided_slice %300 {offsets = [8, 24], sizes = [8, 8], strides = [1, 1]} : vector<16x32xf32> to vector<8x8xf32>
    %447 = vector.extract_strided_slice %301 {offsets = [8, 24], sizes = [8, 8], strides = [1, 1]} : vector<16x32xf32> to vector<8x8xf32>
    %448 = vector.extract_strided_slice %302 {offsets = [8, 24], sizes = [8, 8], strides = [1, 1]} : vector<16x32xf32> to vector<8x8xf32>
    %449 = tpu.transpose %447, [1, 0] : vector<8x8xf32> -> vector<8x8xf32>
    %cst_148 = arith.constant dense<0.000000e+00> : vector<8x8xf32>
    %450 = tpu.matmul %446, %449, %cst_148 {dimension_numbers = #tpu.dot_dimension_numbers<[1], [0], [0], [1], [0, 0, 1, 1], [], []>} : vector<8x8xf32>, vector<8x8xf32>, vector<8x8xf32> -> vector<8x8xf32>
    %cst_149 = arith.constant 0.353553385 : f32
    %451 = vector.broadcast %cst_149 : f32 to vector<8x8xf32>
    %452 = arith.mulf %450, %451 : vector<8x8xf32>
    %453 = vector.broadcast %385 : vector<1x8xf32> to vector<8x8xf32>
    %454 = arith.addf %452, %453 : vector<8x8xf32>
    %cst_150 = arith.constant dense<0xFF800000> : vector<8xf32>
    %455 = vector.multi_reduction <maximumf>, %454, %cst_150 [1] : vector<8x8xf32> to vector<8xf32>
    %456 = vector.shape_cast %455 : vector<8xf32> to vector<8x1xf32>
    %457 = vector.broadcast %456 : vector<8x1xf32> to vector<8x8xf32>
    %458 = arith.subf %454, %457 : vector<8x8xf32>
    %459 = math.exp %458 : vector<8x8xf32>
    %cst_151 = arith.constant dense<0.000000e+00> : vector<8xf32>
    %460 = vector.multi_reduction <add>, %459, %cst_151 [1] : vector<8x8xf32> to vector<8xf32>
    %461 = vector.shape_cast %460 : vector<8xf32> to vector<8x1xf32>
    %462 = tpu.reciprocal %461 {approx = true} : vector<8x1xf32> -> vector<8x1xf32>
    %463 = vector.broadcast %462 : vector<8x1xf32> to vector<8x8xf32>
    %464 = arith.mulf %459, %463 : vector<8x8xf32>
    %cst_152 = arith.constant dense<0.000000e+00> : vector<8x8xf32>
    %465 = tpu.matmul %464, %448, %cst_152 {dimension_numbers = #tpu.dot_dimension_numbers<[1], [0], [0], [1], [0, 0, 1, 1], [], []>} : vector<8x8xf32>, vector<8x8xf32>, vector<8x8xf32> -> vector<8x8xf32>
    %466 = tpu.concatenate %405, %425, %445, %465 in 1 : vector<8x8xf32>, vector<8x8xf32>, vector<8x8xf32>, vector<8x8xf32> -> vector<8x32xf32>
    %467 = tpu.concatenate %384, %466 in 0 : vector<8x32xf32>, vector<8x32xf32> -> vector<16x32xf32>
    %c1_153 = arith.constant 1 : index
    %c0_154 = arith.constant 0 : index
    %c0_155 = arith.constant 0 : index
    %468 = vector.load %arg6[%c1_153, %c0_154, %c0_155] : memref<2x32x32xf32, #tpu.memory_space<vmem>>, vector<1x32x32xf32>
    %469 = vector.shape_cast %468 : vector<1x32x32xf32> to vector<32x32xf32>
    %cst_156 = arith.constant dense<0.000000e+00> : vector<16x32xf32>
    %470 = tpu.matmul %467, %469, %cst_156 {dimension_numbers = #tpu.dot_dimension_numbers<[1], [0], [0], [1], [0, 0, 1, 1], [], []>} : vector<16x32xf32>, vector<32x32xf32>, vector<16x32xf32> -> vector<16x32xf32>
    %c1_157 = arith.constant 1 : index
    %c0_158 = arith.constant 0 : index
    %c0_159 = arith.constant 0 : index
    %471 = vector.load %arg7[%c1_157, %c0_158, %c0_159] : memref<2x1x32xf32, #tpu.memory_space<vmem>>, vector<1x1x32xf32>
    %472 = vector.shape_cast %471 : vector<1x1x32xf32> to vector<1x32xf32>
    %473 = vector.broadcast %472 : vector<1x32xf32> to vector<16x32xf32>
    %474 = arith.addf %470, %473 : vector<16x32xf32>
    %475 = arith.addf %474, %292 : vector<16x32xf32>
    %c1_160 = arith.constant 1 : index
    %c0_161 = arith.constant 0 : index
    %c0_162 = arith.constant 0 : index
    %476 = vector.load %arg8[%c1_160, %c0_161, %c0_162] : memref<2x1x32xf32, #tpu.memory_space<vmem>>, vector<1x1x32xf32>
    %477 = vector.shape_cast %476 : vector<1x1x32xf32> to vector<1x32xf32>
    %c1_163 = arith.constant 1 : index
    %c0_164 = arith.constant 0 : index
    %c0_165 = arith.constant 0 : index
    %478 = vector.load %arg9[%c1_163, %c0_164, %c0_165] : memref<2x1x32xf32, #tpu.memory_space<vmem>>, vector<1x1x32xf32>
    %479 = vector.shape_cast %478 : vector<1x1x32xf32> to vector<1x32xf32>
    %cst_166 = arith.constant dense<0.000000e+00> : vector<16xf32>
    %480 = vector.multi_reduction <add>, %475, %cst_166 [1] : vector<16x32xf32> to vector<16xf32>
    %481 = vector.shape_cast %480 : vector<16xf32> to vector<16x1xf32>
    %cst_167 = arith.constant 3.200000e+01 : f32
    %482 = vector.broadcast %cst_167 : f32 to vector<16x1xf32>
    %483 = arith.divf %481, %482 : vector<16x1xf32>
    %484 = vector.broadcast %483 : vector<16x1xf32> to vector<16x32xf32>
    %485 = arith.subf %475, %484 : vector<16x32xf32>
    %486 = arith.mulf %485, %485 : vector<16x32xf32>
    %cst_168 = arith.constant dense<0.000000e+00> : vector<16xf32>
    %487 = vector.multi_reduction <add>, %486, %cst_168 [1] : vector<16x32xf32> to vector<16xf32>
    %488 = vector.shape_cast %487 : vector<16xf32> to vector<16x1xf32>
    %cst_169 = arith.constant 3.200000e+01 : f32
    %489 = vector.broadcast %cst_169 : f32 to vector<16x1xf32>
    %490 = arith.divf %488, %489 : vector<16x1xf32>
    %491 = vector.broadcast %483 : vector<16x1xf32> to vector<16x32xf32>
    %492 = arith.subf %475, %491 : vector<16x32xf32>
    %cst_170 = arith.constant 9.99999996E-13 : f32
    %493 = vector.broadcast %cst_170 : f32 to vector<16x1xf32>
    %494 = arith.addf %490, %493 : vector<16x1xf32>
    %495 = math.rsqrt %494 : vector<16x1xf32>
    %496 = vector.broadcast %495 : vector<16x1xf32> to vector<16x32xf32>
    %497 = arith.mulf %492, %496 : vector<16x32xf32>
    %498 = vector.broadcast %477 : vector<1x32xf32> to vector<16x32xf32>
    %499 = arith.mulf %497, %498 : vector<16x32xf32>
    %500 = vector.broadcast %479 : vector<1x32xf32> to vector<16x32xf32>
    %501 = arith.addf %499, %500 : vector<16x32xf32>
    %c1_171 = arith.constant 1 : index
    %c0_172 = arith.constant 0 : index
    %c0_173 = arith.constant 0 : index
    %502 = vector.load %arg10[%c1_171, %c0_172, %c0_173] : memref<2x32x64xf32, #tpu.memory_space<vmem>>, vector<1x32x64xf32>
    %503 = vector.shape_cast %502 : vector<1x32x64xf32> to vector<32x64xf32>
    %cst_174 = arith.constant dense<0.000000e+00> : vector<16x64xf32>
    %504 = tpu.matmul %501, %503, %cst_174 {dimension_numbers = #tpu.dot_dimension_numbers<[1], [0], [0], [1], [0, 0, 1, 1], [], []>} : vector<16x32xf32>, vector<32x64xf32>, vector<16x64xf32> -> vector<16x64xf32>
    %c1_175 = arith.constant 1 : index
    %c0_176 = arith.constant 0 : index
    %c0_177 = arith.constant 0 : index
    %505 = vector.load %arg11[%c1_175, %c0_176, %c0_177] : memref<2x1x64xf32, #tpu.memory_space<vmem>>, vector<1x1x64xf32>
    %506 = vector.shape_cast %505 : vector<1x1x64xf32> to vector<1x64xf32>
    %507 = vector.broadcast %506 : vector<1x64xf32> to vector<16x64xf32>
    %508 = arith.addf %504, %507 : vector<16x64xf32>
    %cst_178 = arith.constant 5.000000e-01 : f32
    %509 = vector.broadcast %cst_178 : f32 to vector<16x64xf32>
    %510 = arith.mulf %509, %508 : vector<16x64xf32>
    %cst_179 = arith.constant 4.471500e-02 : f32
    %511 = vector.broadcast %cst_179 : f32 to vector<16x64xf32>
    %512 = arith.mulf %511, %508 : vector<16x64xf32>
    %513 = arith.mulf %512, %508 : vector<16x64xf32>
    %514 = arith.mulf %513, %508 : vector<16x64xf32>
    %515 = arith.addf %508, %514 : vector<16x64xf32>
    %cst_180 = arith.constant 0.797884583 : f32
    %516 = vector.broadcast %cst_180 : f32 to vector<16x64xf32>
    %517 = arith.mulf %516, %515 : vector<16x64xf32>
    %518 = math.tanh %517 : vector<16x64xf32>
    %cst_181 = arith.constant 1.000000e+00 : f32
    %519 = vector.broadcast %cst_181 : f32 to vector<16x64xf32>
    %520 = arith.addf %519, %518 : vector<16x64xf32>
    %521 = arith.mulf %510, %520 : vector<16x64xf32>
    %c1_182 = arith.constant 1 : index
    %c0_183 = arith.constant 0 : index
    %c0_184 = arith.constant 0 : index
    %522 = vector.load %arg12[%c1_182, %c0_183, %c0_184] : memref<2x64x32xf32, #tpu.memory_space<vmem>>, vector<1x64x32xf32>
    %523 = vector.shape_cast %522 : vector<1x64x32xf32> to vector<64x32xf32>
    %cst_185 = arith.constant dense<0.000000e+00> : vector<16x32xf32>
    %524 = tpu.matmul %521, %523, %cst_185 {dimension_numbers = #tpu.dot_dimension_numbers<[1], [0], [0], [1], [0, 0, 1, 1], [], []>} : vector<16x64xf32>, vector<64x32xf32>, vector<16x32xf32> -> vector<16x32xf32>
    %c1_186 = arith.constant 1 : index
    %c0_187 = arith.constant 0 : index
    %c0_188 = arith.constant 0 : index
    %525 = vector.load %arg13[%c1_186, %c0_187, %c0_188] : memref<2x1x32xf32, #tpu.memory_space<vmem>>, vector<1x1x32xf32>
    %526 = vector.shape_cast %525 : vector<1x1x32xf32> to vector<1x32xf32>
    %527 = vector.broadcast %526 : vector<1x32xf32> to vector<16x32xf32>
    %528 = arith.addf %524, %527 : vector<16x32xf32>
    %529 = arith.addf %528, %501 : vector<16x32xf32>
    %c1_189 = arith.constant 1 : index
    %c0_190 = arith.constant 0 : index
    %c0_191 = arith.constant 0 : index
    %530 = vector.load %arg14[%c1_189, %c0_190, %c0_191] : memref<2x1x32xf32, #tpu.memory_space<vmem>>, vector<1x1x32xf32>
    %531 = vector.shape_cast %530 : vector<1x1x32xf32> to vector<1x32xf32>
    %c1_192 = arith.constant 1 : index
    %c0_193 = arith.constant 0 : index
    %c0_194 = arith.constant 0 : index
    %532 = vector.load %arg15[%c1_192, %c0_193, %c0_194] : memref<2x1x32xf32, #tpu.memory_space<vmem>>, vector<1x1x32xf32>
    %533 = vector.shape_cast %532 : vector<1x1x32xf32> to vector<1x32xf32>
    %cst_195 = arith.constant dense<0.000000e+00> : vector<16xf32>
    %534 = vector.multi_reduction <add>, %529, %cst_195 [1] : vector<16x32xf32> to vector<16xf32>
    %535 = vector.shape_cast %534 : vector<16xf32> to vector<16x1xf32>
    %cst_196 = arith.constant 3.200000e+01 : f32
    %536 = vector.broadcast %cst_196 : f32 to vector<16x1xf32>
    %537 = arith.divf %535, %536 : vector<16x1xf32>
    %538 = vector.broadcast %537 : vector<16x1xf32> to vector<16x32xf32>
    %539 = arith.subf %529, %538 : vector<16x32xf32>
    %540 = arith.mulf %539, %539 : vector<16x32xf32>
    %cst_197 = arith.constant dense<0.000000e+00> : vector<16xf32>
    %541 = vector.multi_reduction <add>, %540, %cst_197 [1] : vector<16x32xf32> to vector<16xf32>
    %542 = vector.shape_cast %541 : vector<16xf32> to vector<16x1xf32>
    %cst_198 = arith.constant 3.200000e+01 : f32
    %543 = vector.broadcast %cst_198 : f32 to vector<16x1xf32>
    %544 = arith.divf %542, %543 : vector<16x1xf32>
    %545 = vector.broadcast %537 : vector<16x1xf32> to vector<16x32xf32>
    %546 = arith.subf %529, %545 : vector<16x32xf32>
    %cst_199 = arith.constant 9.99999996E-13 : f32
    %547 = vector.broadcast %cst_199 : f32 to vector<16x1xf32>
    %548 = arith.addf %544, %547 : vector<16x1xf32>
    %549 = math.rsqrt %548 : vector<16x1xf32>
    %550 = vector.broadcast %549 : vector<16x1xf32> to vector<16x32xf32>
    %551 = arith.mulf %546, %550 : vector<16x32xf32>
    %552 = vector.broadcast %531 : vector<1x32xf32> to vector<16x32xf32>
    %553 = arith.mulf %551, %552 : vector<16x32xf32>
    %554 = vector.broadcast %533 : vector<1x32xf32> to vector<16x32xf32>
    %555 = arith.addf %553, %554 : vector<16x32xf32>
    %c0_200 = arith.constant 0 : index
    %c0_201 = arith.constant 0 : index
    %556 = vector.load %arg16[%c0_200, %c0_201] : memref<32x24xf32, #tpu.memory_space<vmem>>, vector<32x24xf32>
    %cst_202 = arith.constant dense<0.000000e+00> : vector<16x24xf32>
    %557 = tpu.matmul %555, %556, %cst_202 {dimension_numbers = #tpu.dot_dimension_numbers<[1], [0], [0], [1], [0, 0, 1, 1], [], []>} : vector<16x32xf32>, vector<32x24xf32>, vector<16x24xf32> -> vector<16x24xf32>
    %c0_203 = arith.constant 0 : index
    %c0_204 = arith.constant 0 : index
    %558 = vector.load %arg17[%c0_203, %c0_204] : memref<1x24xf32, #tpu.memory_space<vmem>>, vector<1x24xf32>
    %559 = vector.broadcast %558 : vector<1x24xf32> to vector<16x24xf32>
    %560 = arith.addf %557, %559 : vector<16x24xf32>
    %cst_205 = arith.constant 0.000000e+00 : f32
    %561 = vector.broadcast %cst_205 : f32 to vector<16x24xf32>
    %562 = arith.maximumf %560, %561 : vector<16x24xf32>
    %c0_206 = arith.constant 0 : index
    %c0_207 = arith.constant 0 : index
    %563 = vector.load %arg18[%c0_206, %c0_207] : memref<24x1xf32, #tpu.memory_space<vmem>>, vector<24x1xf32>
    %cst_208 = arith.constant dense<0.000000e+00> : vector<16x1xf32>
    %564 = tpu.matmul %562, %563, %cst_208 {dimension_numbers = #tpu.dot_dimension_numbers<[1], [0], [0], [1], [0, 0, 1, 1], [], []>} : vector<16x24xf32>, vector<24x1xf32>, vector<16x1xf32> -> vector<16x1xf32>
    %565 = vector.extract_strided_slice %564 {offsets = [0, 0], sizes = [8, 1], strides = [1, 1]} : vector<16x1xf32> to vector<8x1xf32>
    %cst_209 = arith.constant dense<0xFF800000> : vector<1xf32>
    %566 = vector.multi_reduction <maximumf>, %565, %cst_209 [0] : vector<8x1xf32> to vector<1xf32>
    %567 = vector.shape_cast %566 : vector<1xf32> to vector<1x1xf32>
    %568 = vector.broadcast %567 : vector<1x1xf32> to vector<8x1xf32>
    %569 = arith.subf %565, %568 : vector<8x1xf32>
    %570 = math.exp %569 : vector<8x1xf32>
    %cst_210 = arith.constant dense<0.000000e+00> : vector<1xf32>
    %571 = vector.multi_reduction <add>, %570, %cst_210 [0] : vector<8x1xf32> to vector<1xf32>
    %572 = vector.shape_cast %571 : vector<1xf32> to vector<1x1xf32>
    %573 = tpu.reciprocal %572 {approx = true} : vector<1x1xf32> -> vector<1x1xf32>
    %574 = vector.broadcast %573 : vector<1x1xf32> to vector<8x1xf32>
    %575 = arith.mulf %570, %574 : vector<8x1xf32>
    %576 = vector.extract_strided_slice %555 {offsets = [0, 0], sizes = [8, 32], strides = [1, 1]} : vector<16x32xf32> to vector<8x32xf32>
    %577 = vector.broadcast %575 : vector<8x1xf32> to vector<8x32xf32>
    %578 = arith.mulf %576, %577 : vector<8x32xf32>
    %cst_211 = arith.constant dense<0.000000e+00> : vector<32xf32>
    %579 = vector.multi_reduction <add>, %578, %cst_211 [0] : vector<8x32xf32> to vector<32xf32>
    %580 = vector.shape_cast %579 : vector<32xf32> to vector<1x32xf32>
    %581 = vector.extract_strided_slice %564 {offsets = [8, 0], sizes = [8, 1], strides = [1, 1]} : vector<16x1xf32> to vector<8x1xf32>
    %cst_212 = arith.constant dense<0xFF800000> : vector<1xf32>
    %582 = vector.multi_reduction <maximumf>, %581, %cst_212 [0] : vector<8x1xf32> to vector<1xf32>
    %583 = vector.shape_cast %582 : vector<1xf32> to vector<1x1xf32>
    %584 = vector.broadcast %583 : vector<1x1xf32> to vector<8x1xf32>
    %585 = arith.subf %581, %584 : vector<8x1xf32>
    %586 = math.exp %585 : vector<8x1xf32>
    %cst_213 = arith.constant dense<0.000000e+00> : vector<1xf32>
    %587 = vector.multi_reduction <add>, %586, %cst_213 [0] : vector<8x1xf32> to vector<1xf32>
    %588 = vector.shape_cast %587 : vector<1xf32> to vector<1x1xf32>
    %589 = tpu.reciprocal %588 {approx = true} : vector<1x1xf32> -> vector<1x1xf32>
    %590 = vector.broadcast %589 : vector<1x1xf32> to vector<8x1xf32>
    %591 = arith.mulf %586, %590 : vector<8x1xf32>
    %592 = vector.extract_strided_slice %555 {offsets = [8, 0], sizes = [8, 32], strides = [1, 1]} : vector<16x32xf32> to vector<8x32xf32>
    %593 = vector.broadcast %591 : vector<8x1xf32> to vector<8x32xf32>
    %594 = arith.mulf %592, %593 : vector<8x32xf32>
    %cst_214 = arith.constant dense<0.000000e+00> : vector<32xf32>
    %595 = vector.multi_reduction <add>, %594, %cst_214 [0] : vector<8x32xf32> to vector<32xf32>
    %596 = vector.shape_cast %595 : vector<32xf32> to vector<1x32xf32>
    %597 = tpu.concatenate %580, %596 in 0 : vector<1x32xf32>, vector<1x32xf32> -> vector<2x32xf32>
    %c0_215 = arith.constant 0 : index
    %c0_216 = arith.constant 0 : index
    %598 = vector.load %arg19[%c0_215, %c0_216] : memref<32x3xf32, #tpu.memory_space<vmem>>, vector<32x3xf32>
    %cst_217 = arith.constant dense<0.000000e+00> : vector<2x3xf32>
    %599 = tpu.matmul %597, %598, %cst_217 {dimension_numbers = #tpu.dot_dimension_numbers<[1], [0], [0], [1], [0, 0, 1, 1], [], []>} : vector<2x32xf32>, vector<32x3xf32>, vector<2x3xf32> -> vector<2x3xf32>
    %c0_218 = arith.constant 0 : index
    %c0_219 = arith.constant 0 : index
    %600 = vector.load %arg20[%c0_218, %c0_219] : memref<1x3xf32, #tpu.memory_space<vmem>>, vector<1x3xf32>
    %601 = vector.broadcast %600 : vector<1x3xf32> to vector<2x3xf32>
    %602 = arith.addf %599, %601 : vector<2x3xf32>
    %c0_220 = arith.constant 0 : index
    %c0_221 = arith.constant 0 : index
    %603 = vector.load %arg21[%c0_220, %c0_221] : memref<2x3xf32, #tpu.memory_space<vmem>>, vector<2x3xf32>
    tpu.vector_store %arg21[%c0_220, %c0_221], %602 {strides = array<i32>} : memref<2x3xf32, #tpu.memory_space<vmem>>, vector<2x3xf32>,
    return
  }
}

</mosaic_0001>

<bundles_post_ra>
// kernel: forward.1
= control target key start
LH: loop header
LB: loop body
LE: loop exit
PB: predicated region body
PF: predicated region fallthrough
CT: control target
= control target key end

     0   :  { %s5768_s0 = inlined_call_operand.vmem [shape: f32[16,32], index: 0, kind: input, shape index: {}]   ;;  %s5769_s1 = inlined_call_operand.vmem [shape: f32[2,8], index: 1, kind: input, shape index: {}]   ;;  %s5770_s2 = inlined_call_operand.vmem [shape: f32[1,32], index: 2, kind: input, shape index: {}]   ;;  %s5771_s3 = inlined_call_operand.vmem [shape: f32[1,32], index: 3, kind: input, shape index: {}]   ;;  %s5772_s4 = inlined_call_operand.vmem [shape: f32[2,32,96], index: 4, kind: input, shape index: {}]   ;;  %s5773_s5 = inlined_call_operand.vmem [shape: f32[2,1,96], index: 5, kind: input, shape index: {}]   ;;  %s5774_s6 = inlined_call_operand.vmem [shape: f32[2,32,32], index: 6, kind: input, shape index: {}]   ;;  %s5775_s7 = inlined_call_operand.vmem [shape: f32[2,1,32], index: 7, kind: input, shape index: {}]   ;;  %s5776_s8 = inlined_call_operand.vmem [shape: f32[2,1,32], index: 8, kind: input, shape index: {}]   ;;  %s5777_s9 = inlined_call_operand.vmem [shape: f32[2,1,32], index: 9, kind: input, shape index: {}]   ;;  %s5778_s10 = inlined_call_operand.vmem [shape: f32[2,32,64], index: 10, kind: input, shape index: {}]   ;;  %s5779_s11 = inlined_call_operand.vmem [shape: f32[2,1,64], index: 11, kind: input, shape index: {}]   ;;  %s5780_s12 = inlined_call_operand.vmem [shape: f32[2,64,32], index: 12, kind: input, shape index: {}]   ;;  %s5781_s13 = inlined_call_operand.vmem [shape: f32[2,1,32], index: 13, kind: input, shape index: {}]   ;;  %s5782_s14 = inlined_call_operand.vmem [shape: f32[2,1,32], index: 14, kind: input, shape index: {}]   ;;  %s5783_s15 = inlined_call_operand.vmem [shape: f32[2,1,32], index: 15, kind: input, shape index: {}]   ;;  %s5784_s16 = inlined_call_operand.vmem [shape: f32[32,24], index: 16, kind: input, shape index: {}]   ;;  %s5785_s17 = inlined_call_operand.vmem [shape: f32[1,24], index: 17, kind: input, shape index: {}]   ;;  %s5786_s18 = inlined_call_operand.vmem [shape: f32[24,1], index: 18, kind: input, shape index: {}]   ;;  %s5787_s19 = inlined_call_operand.vmem [shape: f32[32,3], index: 19, kind: input, shape index: {}]   ;;  %s5788_s20 = inlined_call_operand.vmem [shape: f32[1,3], index: 20, kind: input, shape index: {}]   ;;  %s5789_s21 = inlined_call_operand.hbm [shape: f32[2,3], index: 21, kind: output, shape index: {}]  }
   0x1   :  { %5815 = sst [smem:[#allocation5_spill]] %s5768_s0 }
   0x2   :  { %5816 = sst [smem:[#allocation6_spill]] %s5769_s1 }
   0x3   :  { %5817 = sst [smem:[#allocation7_spill]] %s5770_s2 }
   0x4   :  { %5818 = sst [smem:[#allocation8_spill]] %s5771_s3 }
   0x5   :  { %5819 = sst [smem:[#allocation9_spill]] %s5772_s4 }
   0x6   :  { %5820 = sst [smem:[#allocation10_spill]] %s5773_s5 }
   0x7   :  { %s5821_s26 = sld [smem:[#allocation5_spill]]  ;;  %vm73_vm0 = vcmask 261120  }
   0xd   :  { %v69_v0 = vld [vmem:[%s5821_s26] sm:$0xff]  ;;  %v70_v1 = vld [vmem:[%s5821_s26 + $0x8] sm:$0xff] }
   0xe   :  { %26 = vsyncpa [#allocation3], 0  ;;  %v74_v2 = vsel %vm73_vm0, %v69_v0, 0.0  ;;  %v77_v3 = vsel %vm73_vm0, %v70_v1, 0.0  ;;  %s5822_s0 = sld [smem:[#allocation9_spill]]  ;;  %s5823_s25 = sld [smem:[#allocation7_spill]]  ;;  %v291_v56 = vlaneseq }
   0xf   :  { %75 = vadd.xlane.f32.xlu0 %v74_v2  ;;  %s5824_s3 = sld [smem:[#allocation8_spill]]  ;;  %v4972_v36 = vmov 0.0   ;;  %vm4973_vm1 = vmmov 0   ;;  %s5825_s4 = sld [smem:[#allocation10_spill]]  ;;  %vm215_vm2 = vcmask 64512   ;;  %vm897_vm3 = vcmask 130048  }
  0x10   :  { %4450 = vmatprep.subr.mxu1 %v4972_v36  ;;  %4452 = vmatprep.mubr.msk.f32.mxu1 %vm4973_vm1, %v4972_v36  ;;  %s4974_s30 = smov 88   ;;  %s4975_s5 = smov 96   ;;  %v292_v59 = vshrl.u32 %v291_v56, 7  ;;  %vm899_vm4 = vcmask 195584   ;;  %vm1850_vm5 = vcmask 523264   ;;  %vm4014_vm6 = vcmask 7168  }
  0x11   :  { %s4976_s22 = smov 120   ;;  %s5807_s23 = smov 112   ;;  %vm4079_vm7 = vcmask 1040384   ;;  %vm4165_vm8 = vcmask 17408  }
  0x12   :  { %s5805_s1 = smov 80   ;;  %s5803_s24 = smov 104   ;;  %v293_v61 = vsub.s32 0, %v292_v59 }
  0x13   :  { %78 = vadd.xlane.f32.xlu0 %v77_v3  ;;  %s5801_s2 = smov 72   ;;  %s5826_s27 = sld [smem:[#allocation6_spill]] }
  0x14   :  { %v120_v14 = vld [vmem:[%s5822_s0] sm:$0xff]  ;;  %v121_v15 = vld [vmem:[%s5822_s0 + $0x8] sm:$0xff]  ;;  %v122_v16 = vld [vmem:[%s5822_s0 + $0x10] sm:$0xff]  ;;  %s5797_s28 = smov 48   ;;  %s5795_s29 = smov 40  }
  0x15   :  { %v4729_v17 = vpack.c.bf16 %v121_v15, %v120_v14  ;;  %v123_v18 = vld [vmem:[%s5822_s0 + $0x18] sm:$0xff]  ;;  %v4181_v27 = vld [vmem:[%s5823_s25] ss:$0 sm:$0xff]  ;;  %s5793_s25 = smov 56   ;;  %s5813_s26 = smov 8  }
  0x16   :  { %v4733_v19 = vpack.c.bf16 %v123_v18, %v122_v16  ;;  %v4182_v29 = vld [vmem:[%s5824_s3] ss:$0 sm:$0xff]  ;;  %s5799_s3 = smov 64  }
  0x17   :  { %4730 = vmatprep.subr.bf16.mxu0 %v4729_v17  ;;  %v4183_v37 = vld [vmem:[%s5825_s4] ss:$0 sm:$0xff] }
  0x18   :  { %4732 = vmatpush3.bf16.msra.mxu0 %v4729_v17 }
  0x19   :  { %4734 = vmatprep.subr.bf16.mxu0 %v4733_v19  ;;  %v117_v57 = vld [vmem:[%s5826_s27] sm:$0x3]  ;;  %s5836_s27 = smov 16  }
  0x1a   :  { %v118_v58 = vsub.f32 1.0, %v117_v57 }
  0x1c   :  { %4736 = vmatpush3.bf16.msra.mxu0 %v4733_v19  ;;  %v119_v60 = vmul.f32 -10000.0, %v118_v58 }
  0x1d   :  { %4445 = vmatprep.subr.mxu0 %v4972_v36 }
  0x1e   :  { %v5220_v62 = vrot.slane %v119_v60, %v293_v61 }
  0x9c   :  { %v76_v4 = vpop.xlane.xlu0 %75 }
  0x9d   :  { %v81_v5 = vmul.f32 0.03125, %v76_v4 }
  0x9f   :  { %v83_v6 = vsub.f32 %v69_v0, %v81_v5 }
  0xa0   :  { %v79_v7 = vpop.xlane.xlu0 %78 }
  0xa1   :  { %v82_v8 = vmul.f32 0.03125, %v79_v7  ;;  %v85_v9 = vmul.f32 %v83_v6, %v83_v6 }
  0xa3   :  { %v84_v10 = vsub.f32 %v70_v1, %v82_v8  ;;  %v87_v11 = vsel %vm73_vm0, %v85_v9, 0.0 }
  0xa4   :  { %88 = vadd.xlane.f32.xlu1 %v87_v11 }
  0xa5   :  { %v86_v12 = vmul.f32 %v84_v10, %v84_v10 }
  0xa7   :  { %v90_v13 = vsel %vm73_vm0, %v86_v12, 0.0 }
  0xa8   :  { %91 = vadd.xlane.f32.xlu1 %v90_v13  ;;  %v981_v13 = vsub.s32 1, %v292_v59 }
  0xaa   :  { %v5232_v19 = vrot.slane %v119_v60, %v981_v13 }
 0x131   :  { %v89_v20 = vpop.xlane.xlu1 %88 }
 0x132   :  { %v93_v21 = vmul.f32 0.03125, %v89_v20 }
 0x134   :  { %v95_v22 = vadd.f32 1e-12, %v93_v21 }
 0x135   :  { %v92_v23 = vpop.xlane.xlu1 %91 }
 0x136   :  { %4848 = vrsqrt.f32 %v95_v22  ;;  %v94_v24 = vmul.f32 0.03125, %v92_v23 }
 0x138   :  { %v96_v25 = vadd.f32 1e-12, %v94_v24 }
 0x13a   :  { %4850 = vrsqrt.f32 %v96_v25 }
 0x140   :  { %v4849_v26 = vpop.eup %4848 }
 0x141   :  { %v99_v28 = vmul.f32 %v4849_v26, %v83_v6 }
 0x143   :  { %v107_v30 = vmul.f32 %v4181_v27, %v99_v28 }
 0x144   :  { %v4851_v31 = vpop.eup %4850 }
 0x145   :  { %v100_v32 = vmul.f32 %v4851_v31, %v84_v10  ;;  %v5129_v33 = vadd.f32 %v4182_v29, %v107_v30 }
 0x147   :  { %v108_v34 = vmul.f32 %v4181_v27, %v100_v32  ;;  %4442 = vmatprep.mubr.msk.f32.mxu0 %vm73_vm0, %v5129_v33 }
 0x149   :  { %v5133_v35 = vadd.f32 %v4182_v29, %v108_v34 }
 0x14b   :  { %4443 = vmatmul.mubr.msk.f32.vlgmr.msra.gmra.mrb[0].mxu0 %vm73_vm0, %v5133_v35 }
 0x14c   :  { %4447 = vmatprep.mubr.msk.f32.mxu0 %vm4973_vm1, %v4972_v36 }
 0x21e   :  { %v4444_v38 = vpop.f32.mrb[0].mxu0 }
 0x21f   :  { %v203_v39 = vpop.f32.mrb[1].mxu0  ;;  %v5160_v41 = vadd.f32 %v4444_v38, %v4183_v37 }
 0x220   :  { %v5146_v40 = vadd.f32 %v4183_v37, %v203_v39 }
 0x222   :  { %385 = vrot.lane.b32.xlu1 %v5146_v40, %s4974_s30  ;;  %213 = vrot.lane.b32.xlu0 %v5146_v40, %s4975_s5 }
 0x226   :  { %383 = vrot.lane.b32.xlu1 %v5146_v40, %s4976_s22  ;;  %550 = vrot.lane.b32.xlu0 %v5146_v40, %s5807_s23 }
 0x22a   :  { %552 = vrot.lane.b32.xlu1 %v5146_v40, %s5805_s1  ;;  %717 = vrot.lane.b32.xlu0 %v5146_v40, %s5803_s24 }
 0x22e   :  { %719 = vrot.lane.b32.xlu1 %v5146_v40, %s5801_s2  ;;  %1073 = vrot.lane.b32.xlu0 %v5160_v41, %s4974_s30 }
 0x232   :  { %902 = vrot.lane.b32.xlu1 %v5160_v41, %s4975_s5  ;;  %1240 = vrot.lane.b32.xlu0 %v5160_v41, %s5805_s1  ;;  %s5827_s1 = smov 112  }
 0x236   :  { %1071 = vrot.lane.b32.xlu1 %v5160_v41, %s4976_s22  ;;  %1407 = vrot.lane.b32.xlu0 %v5160_v41, %s5801_s2  ;;  %s5830_s2 = smov 72  }
 0x23a   :  { %1238 = vrot.lane.b32.xlu1 %v5160_v41, %s5807_s23  ;;  %s4990_s23 = smov [#allocation2]  }
 0x23e   :  { %1405 = vrot.lane.b32.xlu1 %v5160_v41, %s5803_s24  ;;  %s5828_s24 = smov 80  }
 0x294   :  { %v386_v42 = vpop.permute.xlu1 %385  ;;  %v214_v43 = vpop.permute.xlu0 %213 }
 0x295   :  { %4446 = vmatpush3.xpose.msk.msra.mxu0 %vm215_vm2, %v214_v43 }
 0x296   :  { %4455 = vmatprep.subr.mxu0 %v4972_v36 }
 0x298   :  { %v384_v44 = vpop.permute.xlu1 %383  ;;  %4448 = vmatmul.mubr.msk.f32.vlgmr.msra.gmra.mrb[2].mxu0 %vm215_vm2, %v5146_v40  ;;  %v551_v45 = vpop.permute.xlu0 %550 }
 0x299   :  { %4456 = vmatpush3.xpose.msk.msra.mxu0 %vm215_vm2, %v386_v42  ;;  %4457 = vmatprep.mubr.msk.f32.mxu0 %vm4973_vm1, %v4972_v36 }
 0x29a   :  { %4465 = vmatprep.subr.mxu0 %v4972_v36 }
 0x29c   :  { %v553_v46 = vpop.permute.xlu1 %552  ;;  %4458 = vmatmul.mubr.msk.f32.vlgmr.msra.gmra.mrb[4].mxu0 %vm215_vm2, %v384_v44  ;;  %v718_v47 = vpop.permute.xlu0 %717 }
 0x29d   :  { %4466 = vmatpush3.xpose.msk.msra.mxu0 %vm215_vm2, %v553_v46  ;;  %4467 = vmatprep.mubr.msk.f32.mxu0 %vm4973_vm1, %v4972_v36 }
 0x29e   :  { %4475 = vmatprep.subr.mxu0 %v4972_v36 }
 0x2a0   :  { %v720_v48 = vpop.permute.xlu1 %719  ;;  %4468 = vmatmul.mubr.msk.f32.vlgmr.msra.gmra.mrb[6].mxu0 %vm215_vm2, %v551_v45  ;;  %v1074_v49 = vpop.permute.xlu0 %1073 }
 0x2a1   :  { %4476 = vmatpush3.xpose.msk.msra.mxu0 %vm215_vm2, %v720_v48  ;;  %4477 = vmatprep.mubr.msk.f32.mxu0 %vm4973_vm1, %v4972_v36 }
 0x2a2   :  { %4485 = vmatprep.subr.mxu0 %v4972_v36 }
 0x2a4   :  { %v903_v50 = vpop.permute.xlu1 %902  ;;  %4478 = vmatmul.mubr.msk.f32.vlgmr.msra.gmra.mrb[8].mxu0 %vm215_vm2, %v718_v47  ;;  %v1241_v52 = vpop.permute.xlu0 %1240 }
 0x2a5   :  { %4486 = vmatpush3.xpose.msk.msra.mxu0 %vm215_vm2, %v903_v50  ;;  %4487 = vmatprep.mubr.msk.f32.mxu0 %vm4973_vm1, %v4972_v36 }
 0x2a6   :  { %4495 = vmatprep.subr.mxu0 %v4972_v36 }
 0x2a8   :  { %v1072_v51 = vpop.permute.xlu1 %1071  ;;  %4488 = vmatmul.mubr.msk.f32.vlgmr.msra.gmra.mrb[10].mxu0 %vm215_vm2, %v5160_v41  ;;  %v1408_v54 = vpop.permute.xlu0 %1407 }
 0x2a9   :  { %4496 = vmatpush3.xpose.msk.msra.mxu0 %vm215_vm2, %v1074_v49  ;;  %4497 = vmatprep.mubr.msk.f32.mxu0 %vm4973_vm1, %v4972_v36 }
 0x2aa   :  { %4505 = vmatprep.subr.mxu0 %v4972_v36 }
 0x2ac   :  { %4498 = vmatmul.mubr.msk.f32.vlgmr.msra.gmra.mrb[12].mxu0 %vm215_vm2, %v1072_v51  ;;  %v1239_v53 = vpop.permute.xlu1 %1238 }
 0x2ad   :  { %4506 = vmatpush3.xpose.msk.msra.mxu0 %vm215_vm2, %v1241_v52  ;;  %4507 = vmatprep.mubr.msk.f32.mxu0 %vm4973_vm1, %v4972_v36 }
 0x2ae   :  { %4515 = vmatprep.subr.mxu0 %v4972_v36 }
 0x2b0   :  { %4508 = vmatmul.mubr.msk.f32.vlgmr.msra.gmra.mrb[14].mxu0 %vm215_vm2, %v1239_v53  ;;  %v1406_v55 = vpop.permute.xlu1 %1405 }
 0x2b1   :  { %4516 = vmatpush3.xpose.msk.msra.mxu0 %vm215_vm2, %v1408_v54  ;;  %4517 = vmatprep.mubr.msk.f32.mxu0 %vm4973_vm1, %v4972_v36 }
 0x2b4   :  { %4518 = vmatmul.mubr.msk.f32.vlgmr.msra.gmra.mrb[16].mxu0 %vm215_vm2, %v1406_v55 }
 0x36b   :  { %v286_v63 = vpop.f32.mrb[2].mxu0 }
 0x36c   :  { %v290_v0 = vmul.f32 0.35355338, %v286_v63  ;;  %v4449_v1 = vpop.f32.mrb[3].mxu0 }
 0x36e   :  { %v295_v2 = vadd.f32 %v5220_v62, %v290_v0 }
 0x36f   :  { %v457_v3 = vpop.f32.mrb[4].mxu0 }
 0x370   :  { %v461_v4 = vmul.f32 0.35355338, %v457_v3  ;;  %v4459_v5 = vpop.f32.mrb[5].mxu0  ;;  %v296_v6 = vsel %vm215_vm2, %v295_v2, -inf }
 0x371   :  { %297 = vmax.xlane.f32.xlu0 %v296_v6 }
 0x372   :  { %v462_v7 = vadd.f32 %v461_v4, %v5220_v62 }
 0x373   :  { %v624_v8 = vpop.f32.mrb[6].mxu0 }
 0x374   :  { %v628_v9 = vmul.f32 0.35355338, %v624_v8  ;;  %v4469_v10 = vpop.f32.mrb[7].mxu0  ;;  %v463_v11 = vsel %vm215_vm2, %v462_v7, -inf }
 0x375   :  { %464 = vmax.xlane.f32.xlu1 %v463_v11 }
 0x376   :  { %v5227_v12 = vadd.f32 %v628_v9, %v5220_v62 }
 0x377   :  { %v791_v14 = vpop.f32.mrb[8].mxu0 }
 0x378   :  { %v795_v15 = vmul.f32 0.35355338, %v791_v14  ;;  %v4479_v16 = vpop.f32.mrb[9].mxu0  ;;  %v630_v17 = vsel %vm215_vm2, %v5227_v12, -inf }
 0x379   :  { %631 = vmax.xlane.f32.xlu0 %v630_v17 }
 0x37a   :  { %v796_v18 = vadd.f32 %v795_v15, %v5220_v62 }
 0x37b   :  { %v974_v20 = vpop.f32.mrb[10].mxu0 }
 0x37c   :  { %v978_v21 = vmul.f32 0.35355338, %v974_v20  ;;  %v4489_v22 = vpop.f32.mrb[11].mxu0  ;;  %v797_v23 = vsel %vm215_vm2, %v796_v18, -inf }
 0x37d   :  { %798 = vmax.xlane.f32.xlu0 %v797_v23 }
 0x37e   :  { %v5236_v24 = vadd.f32 %v5232_v19, %v978_v21 }
 0x37f   :  { %v1145_v25 = vpop.f32.mrb[12].mxu0 }
 0x380   :  { %v1149_v26 = vmul.f32 0.35355338, %v1145_v25  ;;  %v4499_v27 = vpop.f32.mrb[13].mxu0  ;;  %v984_v28 = vsel %vm215_vm2, %v5236_v24, -inf }
 0x381   :  { %985 = vmax.xlane.f32.xlu0 %v984_v28 }
 0x382   :  { %v1150_v29 = vadd.f32 %v1149_v26, %v5232_v19 }
 0x383   :  { %v1312_v30 = vpop.f32.mrb[14].mxu0 }
 0x384   :  { %v1316_v31 = vmul.f32 0.35355338, %v1312_v30  ;;  %v4509_v32 = vpop.f32.mrb[15].mxu0  ;;  %v1151_v34 = vsel %vm215_vm2, %v1150_v29, -inf }
 0x385   :  { %1152 = vmax.xlane.f32.xlu1 %v1151_v34 }
 0x386   :  { %v1317_v37 = vadd.f32 %v1316_v31, %v5232_v19 }
 0x387   :  { %v1479_v38 = vpop.f32.mrb[16].mxu0 }
 0x388   :  { %v4519_v39 = vpop.f32.mrb[17].mxu0  ;;  %v1318_v42 = vsel %vm215_vm2, %v1317_v37, -inf  ;;  %v1483_v43 = vmul.f32 0.35355338, %v1479_v38 }
 0x389   :  { %1319 = vmax.xlane.f32.xlu0 %v1318_v42 }
 0x38a   :  { %v1484_v44 = vadd.f32 %v1483_v43, %v5232_v19 }
 0x38c   :  { %v1485_v45 = vsel %vm215_vm2, %v1484_v44, -inf }
 0x396   :  { %307 = vrot.lane.b32.xlu1 %v5146_v40, %s5799_s3 }
 0x3ba   :  { %1486 = vmax.xlane.f32.xlu1 %v1485_v45 }
 0x3cb   :  { %641 = vrot.lane.b32.xlu1 %v5146_v40, %s5797_s28 }
 0x3cf   :  { %808 = vrot.lane.b32.xlu1 %v5146_v40, %s5795_s29 }
 0x3d3   :  { %995 = vrot.lane.b32.xlu1 %v5160_v41, %s5799_s3  ;;  %s5811_s3 = smov 16  }
 0x3fe   :  { %v298_v46 = vpop.xlane.xlu0 %297 }
 0x3ff   :  { %v299_v47 = vsub.f32 %v295_v2, %v298_v46 }
 0x401   :  { %v300_v48 = vmul.f32 1.442695, %v299_v47 }
 0x402   :  { %v465_v49 = vpop.xlane.xlu1 %464 }
 0x403   :  { %4852 = vpow2.f32 %v300_v48  ;;  %v466_v50 = vsub.f32 %v462_v7, %v465_v49 }
 0x405   :  { %v467_v51 = vmul.f32 1.442695, %v466_v50 }
 0x406   :  { %v632_v52 = vpop.xlane.xlu0 %631 }
 0x407   :  { %4854 = vpow2.f32 %v467_v51  ;;  %v633_v1 = vsub.f32 %v5227_v12, %v632_v52 }
 0x409   :  { %v634_v3 = vmul.f32 1.442695, %v633_v1  ;;  %v1588_v1 = vld [vmem:[%s5774_s6 + $0x8] sm:$0xff] }
 0x40a   :  { %v799_v53 = vpop.xlane.xlu0 %798 }
 0x40b   :  { %v800_v54 = vsub.f32 %v796_v18, %v799_v53 }
 0x40d   :  { %v4853_v55 = vpop.eup %4852  ;;  %v801_v56 = vmul.f32 1.442695, %v800_v54 }
 0x40e   :  { %v302_v57 = vsel %vm215_vm2, %v4853_v55, 0.0  ;;  %v986_v2 = vpop.xlane.xlu0 %985 }
 0x40f   :  { %4856 = vpow2.f32 %v801_v56  ;;  %303 = vadd.xlane.f32.xlu0 %v302_v57  ;;  %v987_v4 = vsub.f32 %v5236_v24, %v986_v2 }
 0x410   :  { %4858 = vpow2.f32 %v634_v3 }
 0x411   :  { %v4855_v58 = vpop.eup %4854  ;;  %v988_v6 = vmul.f32 1.442695, %v987_v4 }
 0x412   :  { %v1153_v59 = vpop.xlane.xlu1 %1152  ;;  %v469_v60 = vsel %vm215_vm2, %v4855_v58, 0.0 }
 0x413   :  { %470 = vadd.xlane.f32.xlu1 %v469_v60  ;;  %4860 = vpow2.f32 %v988_v6  ;;  %v1154_v8 = vsub.f32 %v1150_v29, %v1153_v59  ;;  %v1590_v6 = vld [vmem:[%s5774_s6 + $0x18] sm:$0xff] }
 0x415   :  { %v1155_v10 = vmul.f32 1.442695, %v1154_v8 }
 0x416   :  { %v308_v61 = vpop.permute.xlu1 %307  ;;  %v1320_v5 = vpop.xlane.xlu0 %1319 }
 0x417   :  { %4451 = vmatpush3.msra.mxu1 %v308_v61  ;;  %v1321_v7 = vsub.f32 %v1317_v37, %v1320_v5  ;;  %v1589_v5 = vld [vmem:[%s5774_s6 + $0x10] sm:$0xff] }
 0x418   :  { %4460 = vmatprep.subr.mxu1 %v4972_v36  ;;  %v4741_v8 = vpack.c.bf16 %v1590_v6, %v1589_v5 }
 0x419   :  { %v5257_v63 = vpop.eup %4856  ;;  %v1322_v9 = vmul.f32 1.442695, %v1321_v7 }
 0x41a   :  { %v803_v0 = vsel %vm215_vm2, %v5257_v63, 0.0  ;;  %v4859_v11 = vpop.eup %4858 }
 0x41b   :  { %804 = vadd.xlane.f32.xlu1 %v803_v0  ;;  %4862 = vpow2.f32 %v1322_v9  ;;  %v1587_v0 = vld [vmem:[%s5774_s6] sm:$0xff] }
 0x41c   :  { %4864 = vpow2.f32 %v1155_v10  ;;  %v4737_v3 = vpack.c.bf16 %v1588_v1, %v1587_v0  ;;  %v4213_v1 = vld [vmem:[%s5776_s8] ss:$0 sm:$0xff] }
 0x41d   :  { %v4861_v13 = vpop.eup %4860 }
 0x41e   :  { %v990_v14 = vsel %vm215_vm2, %v4861_v13, 0.0  ;;  %4738 = vmatprep.subr.bf16.mxu0 %v4737_v3 }
 0x41f   :  { %4740 = vmatpush3.bf16.msra.mxu0 %v4737_v3  ;;  %v4214_v3 = vld [vmem:[%s5777_s9] ss:$0 sm:$0xff] }
 0x420   :  { %4742 = vmatprep.subr.bf16.mxu0 %v4741_v8 }
 0x423   :  { %4744 = vmatpush3.bf16.msra.mxu0 %v4741_v8 }
 0x425   :  { %474 = vrot.lane.b32.xlu0 %v5146_v40, %s5793_s25  ;;  %v636_v40 = vsel %vm215_vm2, %v4859_v11, 0.0  ;;  %v5269_v15 = vpop.eup %4862 }
 0x426   :  { %v1324_v18 = vsel %vm215_vm2, %v5269_v15, 0.0  ;;  %v4865_v20 = vpop.eup %4864 }
 0x427   :  { %v1157_v21 = vsel %vm215_vm2, %v4865_v20, 0.0 }
 0x42c   :  { %1162 = vrot.lane.b32.xlu1 %v5160_v41, %s5793_s25 }
 0x444   :  { %637 = vadd.xlane.f32.xlu0 %v636_v40 }
 0x447   :  { %v1487_v12 = vpop.xlane.xlu1 %1486 }
 0x448   :  { %v1488_v16 = vsub.f32 %v1484_v44, %v1487_v12  ;;  %991 = vadd.xlane.f32.xlu0 %v990_v14 }
 0x44a   :  { %v1489_v17 = vmul.f32 1.442695, %v1488_v16 }
 0x44b   :  { %v642_v24 = vpop.permute.xlu1 %641 }
 0x44c   :  { %4866 = vpow2.f32 %v1489_v17  ;;  %1325 = vadd.xlane.f32.xlu0 %v1324_v18 }
 0x44f   :  { %v809_v25 = vpop.permute.xlu1 %808 }
 0x450   :  { %1158 = vadd.xlane.f32.xlu1 %v1157_v21 }
 0x453   :  { %v996_v26 = vpop.permute.xlu1 %995 }
 0x456   :  { %v5274_v22 = vpop.eup %4866 }
 0x457   :  { %v1491_v23 = vsel %vm215_vm2, %v5274_v22, 0.0 }
 0x458   :  { %1492 = vadd.xlane.f32.xlu0 %v1491_v23 }
 0x461   :  { %1496 = vrot.lane.b32.xlu1 %v5160_v41, %s5795_s29 }
 0x46e   :  { %1329 = vrot.lane.b32.xlu0 %v5160_v41, %s5797_s28  ;;  %s5809_s28 = smov 24  }
 0x49c   :  { %v304_v27 = vpop.xlane.xlu0 %303 }
 0x49d   :  { %4868 = vrcp.f32 %v304_v27 }
 0x4a0   :  { %v471_v28 = vpop.xlane.xlu1 %470  ;;  %v475_v31 = vpop.permute.xlu0 %474 }
 0x4a1   :  { %4870 = vrcp.f32 %v471_v28 }
 0x4a7   :  { %v4869_v29 = vpop.eup %4868 }
 0x4a8   :  { %v306_v30 = vmul.f32 %v4869_v29, %v4853_v55  ;;  %v805_v41 = vpop.xlane.xlu1 %804 }
 0x4aa   :  { %4453 = vmatmul.mubr.msk.f32.vlgmr.msra.gmra.mrb[0].mxu1 %vm215_vm2, %v306_v30  ;;  %v4210_v30 = vld [vmem:[%s5775_s7] ss:$0 sm:$0xff] }
 0x4ab   :  { %v4871_v32 = vpop.eup %4870  ;;  %4461 = vmatpush3.msra.mxu1 %v475_v31  ;;  %4462 = vmatprep.mubr.msk.f32.mxu1 %vm4973_vm1, %v4972_v36 }
 0x4ac   :  { %v473_v34 = vmul.f32 %v4871_v32, %v4855_v58  ;;  %4470 = vmatprep.subr.mxu1 %v4972_v36  ;;  %v1163_v39 = vpop.permute.xlu1 %1162 }
 0x4ae   :  { %4463 = vmatmul.mubr.msk.f32.vlgmr.msra.gmra.mrb[2].mxu1 %vm215_vm2, %v473_v34 }
 0x4af   :  { %4471 = vmatpush3.msra.mxu1 %v642_v24  ;;  %4472 = vmatprep.mubr.msk.f32.mxu1 %vm4973_vm1, %v4972_v36 }
 0x4b0   :  { %4480 = vmatprep.subr.mxu1 %v4972_v36 }
 0x4d1   :  { %v638_v37 = vpop.xlane.xlu0 %637 }
 0x4d2   :  { %4872 = vrcp.f32 %v638_v37 }
 0x4d3   :  { %4874 = vrcp.f32 %v805_v41 }
 0x4d5   :  { %v992_v38 = vpop.xlane.xlu0 %991 }
 0x4d6   :  { %4876 = vrcp.f32 %v992_v38 }
 0x4d9   :  { %v1326_v44 = vpop.xlane.xlu0 %1325 }
 0x4dc   :  { %v4873_v42 = vpop.eup %4872 }
 0x4dd   :  { %v640_v43 = vmul.f32 %v4873_v42, %v4859_v11  ;;  %v1159_v45 = vpop.xlane.xlu1 %1158  ;;  %v4875_v46 = vpop.eup %4874 }
 0x4de   :  { %4878 = vrcp.f32 %v1159_v45  ;;  %v807_v47 = vmul.f32 %v4875_v46, %v5257_v63 }
 0x4df   :  { %4473 = vmatmul.mubr.msk.f32.vlgmr.msra.gmra.mrb[4].mxu1 %vm215_vm2, %v640_v43  ;;  %4880 = vrcp.f32 %v1326_v44 }
 0x4e0   :  { %4481 = vmatpush3.msra.mxu1 %v809_v25  ;;  %4482 = vmatprep.mubr.msk.f32.mxu1 %vm4973_vm1, %v4972_v36  ;;  %v4877_v48 = vpop.eup %4876 }
 0x4e1   :  { %4490 = vmatprep.subr.mxu1 %v4972_v36  ;;  %v994_v49 = vmul.f32 %v4877_v48, %v4861_v13  ;;  %v1497_v56 = vpop.permute.xlu1 %1496 }
 0x4e3   :  { %4483 = vmatmul.mubr.msk.f32.vlgmr.msra.gmra.mrb[6].mxu1 %vm215_vm2, %v807_v47 }
 0x4e4   :  { %4491 = vmatpush3.msra.mxu1 %v996_v26  ;;  %4492 = vmatprep.mubr.msk.f32.mxu1 %vm4973_vm1, %v4972_v36 }
 0x4e5   :  { %v1493_v50 = vpop.xlane.xlu0 %1492  ;;  %4500 = vmatprep.subr.mxu1 %v4972_v36 }
 0x4e6   :  { %4882 = vrcp.f32 %v1493_v50 }
 0x4e7   :  { %4493 = vmatmul.mubr.msk.f32.vlgmr.msra.gmra.mrb[8].mxu1 %vm215_vm2, %v994_v49 }
 0x4e8   :  { %v4879_v51 = vpop.eup %4878  ;;  %4501 = vmatpush3.msra.mxu1 %v1163_v39  ;;  %4502 = vmatprep.mubr.msk.f32.mxu1 %vm4973_vm1, %v4972_v36 }
 0x4e9   :  { %v1161_v52 = vmul.f32 %v4879_v51, %v4865_v20  ;;  %v1330_v53 = vpop.permute.xlu0 %1329  ;;  %4510 = vmatprep.subr.mxu1 %v4972_v36  ;;  %v4881_v54 = vpop.eup %4880 }
 0x4ea   :  { %v1328_v55 = vmul.f32 %v4881_v54, %v5269_v15  ;;  %v1727_v54 = vld [vmem:[%s5778_s10 + $0x10] sm:$0xff] }
 0x4eb   :  { %4503 = vmatmul.mubr.msk.f32.vlgmr.msra.gmra.mrb[10].mxu1 %vm215_vm2, %v1161_v52  ;;  %v1726_v52 = vld [vmem:[%s5778_s10 + $0x8] sm:$0xff] }
 0x4ec   :  { %4511 = vmatpush3.msra.mxu1 %v1330_v53  ;;  %4512 = vmatprep.mubr.msk.f32.mxu1 %vm4973_vm1, %v4972_v36 }
 0x4ed   :  { %4520 = vmatprep.subr.mxu1 %v4972_v36 }
 0x4ef   :  { %4513 = vmatmul.mubr.msk.f32.vlgmr.msra.gmra.mrb[12].mxu1 %vm215_vm2, %v1328_v55  ;;  %v1728_v55 = vld [vmem:[%s5778_s10 + $0x18] sm:$0xff] }
 0x4f0   :  { %v4883_v57 = vpop.eup %4882  ;;  %4521 = vmatpush3.msra.mxu1 %v1497_v56  ;;  %4522 = vmatprep.mubr.msk.f32.mxu1 %vm4973_vm1, %v4972_v36  ;;  %v4749_v56 = vpack.c.bf16 %v1728_v55, %v1727_v54 }
 0x4f1   :  { %v1495_v58 = vmul.f32 %v4883_v57, %v5274_v22 }
 0x4f3   :  { %4523 = vmatmul.mubr.msk.f32.vlgmr.msra.gmra.mrb[14].mxu1 %vm215_vm2, %v1495_v58 }
 0x57d   :  { %v379_v59 = vpop.f32.mrb[0].mxu1 }
 0x57e   :  { %v4454_v60 = vpop.f32.mrb[1].mxu1 }
 0x581   :  { %v546_v61 = vpop.f32.mrb[2].mxu1 }
 0x582   :  { %885 = vrot.lane.b32.xlu0 %v546_v61, %s5813_s26  ;;  %v4464_v63 = vpop.f32.mrb[3].mxu1 }
 0x5b2   :  { %v713_v2 = vpop.f32.mrb[4].mxu1 }
 0x5b3   :  { %889 = vrot.lane.b32.xlu1 %v713_v2, %s5811_s3  ;;  %v4474_v4 = vpop.f32.mrb[5].mxu1 }
 0x5b6   :  { %v880_v7 = vpop.f32.mrb[6].mxu1 }
 0x5b7   :  { %893 = vrot.lane.b32.xlu1 %v880_v7, %s5809_s28  ;;  %v4484_v9 = vpop.f32.mrb[7].mxu1 }
 0x5ba   :  { %v1067_v10 = vpop.f32.mrb[8].mxu1 }
 0x5bb   :  { %v4494_v11 = vpop.f32.mrb[9].mxu1 }
 0x5bc   :  { %v1836_v11 = vld [vmem:[%s5780_s12 + $0x8] sm:$0xff] }
 0x5be   :  { %v1234_v40 = vpop.f32.mrb[10].mxu1 }
 0x5bf   :  { %1573 = vrot.lane.b32.xlu0 %v1234_v40, %s5813_s26  ;;  %v4504_v13 = vpop.f32.mrb[11].mxu1  ;;  %s5835_s26 = smov 8  }
 0x5c0   :  { %v1837_v13 = vld [vmem:[%s5780_s12 + $0x10] sm:$0xff] }
 0x5c2   :  { %v1401_v12 = vpop.f32.mrb[12].mxu1 }
 0x5c3   :  { %1577 = vrot.lane.b32.xlu0 %v1401_v12, %s5811_s3  ;;  %v4514_v14 = vpop.f32.mrb[13].mxu1  ;;  %v1838_v12 = vld [vmem:[%s5780_s12 + $0x18] sm:$0xff]  ;;  %s5834_s3 = smov 56  }
 0x5c4   :  { %v4757_v14 = vpack.c.bf16 %v1838_v12, %v1837_v13 }
 0x5c6   :  { %v1568_v15 = vpop.f32.mrb[14].mxu1 }
 0x5c7   :  { %1581 = vrot.lane.b32.xlu1 %v1568_v15, %s5809_s28  ;;  %v4524_v16 = vpop.f32.mrb[15].mxu1  ;;  %v1839_v15 = vld [vmem:[%s5780_s12 + $0x20] sm:$0xff] }
 0x5c8   :  { %v1840_v16 = vld [vmem:[%s5780_s12 + $0x28] sm:$0xff] }
 0x5f4   :  { %v886_v17 = vpop.permute.xlu0 %885 }
 0x5f5   :  { %v896_v20 = vsel %vm215_vm2, %v379_v59, %v886_v17  ;;  %v4761_v17 = vpack.c.bf16 %v1840_v16, %v1839_v15  ;;  %v4221_v15 = vld [vmem:[%s5782_s14] ss:$0 sm:$0xff] }
 0x625   :  { %v890_v18 = vpop.permute.xlu1 %889 }
 0x626   :  { %v898_v21 = vsel %vm897_vm3, %v896_v20, %v890_v18  ;;  %v1841_v18 = vld [vmem:[%s5780_s12 + $0x30] sm:$0xff]  ;;  %v1842_v20 = vld [vmem:[%s5780_s12 + $0x38] sm:$0xff] }
 0x629   :  { %v894_v22 = vpop.permute.xlu1 %893 }
 0x62a   :  { %v900_v23 = vsel %vm899_vm4, %v898_v21, %v894_v22  ;;  %v4765_v21 = vpack.c.bf16 %v1842_v20, %v1841_v18  ;;  %v4215_v22 = vld [vmem:[%s5779_s11] ss:$0 sm:$0xff] }
 0x62b   :  { %4533 = vmatprep.mubr.msk.f32.mxu0 %vm73_vm0, %v900_v23  ;;  %v4222_v20 = vld [vmem:[%s5783_s15] ss:$0 sm:$0xff] }
 0x631   :  { %v1574_v24 = vpop.permute.xlu0 %1573 }
 0x632   :  { %v1584_v26 = vsel %vm215_vm2, %v1067_v10, %v1574_v24  ;;  %v1835_v10 = vld [vmem:[%s5780_s12] sm:$0xff] }
 0x633   :  { %v4753_v40 = vpack.c.bf16 %v1836_v11, %v1835_v10 }
 0x635   :  { %v1578_v25 = vpop.permute.xlu0 %1577  ;;  %4754 = vmatprep.subr.bf16.mxu0 %v4753_v40 }
 0x636   :  { %v1585_v27 = vsel %vm897_vm3, %v1584_v26, %v1578_v25 }
 0x639   :  { %v1582_v28 = vpop.permute.xlu1 %1581 }
 0x63a   :  { %v1586_v29 = vsel %vm899_vm4, %v1585_v27, %v1582_v28 }
 0x63b   :  { %4534 = vmatmul.mubr.msk.f32.vlgmr.msra.gmra.mrb[18].mxu0 %vm73_vm0, %v1586_v29 }
 0x63c   :  { %4756 = vmatpush3.bf16.msra.mxu0 %v4753_v40 }
 0x63d   :  { %4758 = vmatprep.subr.bf16.mxu0 %v4757_v14 }
 0x640   :  { %4760 = vmatpush3.bf16.msra.mxu0 %v4757_v14 }
 0x641   :  { %4762 = vmatprep.subr.bf16.mxu0 %v4761_v17 }
 0x644   :  { %4764 = vmatpush3.bf16.msra.mxu0 %v4761_v17 }
 0x645   :  { %4766 = vmatprep.subr.bf16.mxu0 %v4765_v21 }
 0x648   :  { %4768 = vmatpush3.bf16.msra.mxu0 %v4765_v21 }
 0x649   :  { %4587 = vmatprep.subr.mxu0 %v4972_v36 }
 0x70e   :  { %v4535_v31 = vpop.f32.mrb[18].mxu0 }
 0x70f   :  { %v1676_v32 = vadd.f32 %v4535_v31, %v4210_v30  ;;  %v1670_v34 = vpop.f32.mrb[19].mxu0 }
 0x710   :  { %v1671_v41 = vadd.f32 %v4210_v30, %v1670_v34 }
 0x711   :  { %v1680_v37 = vadd.f32 %v1676_v32, %v5133_v35 }
 0x712   :  { %v1679_v38 = vadd.f32 %v1671_v41, %v5129_v33  ;;  %v1725_v33 = vld [vmem:[%s5778_s10] sm:$0xff] }
 0x713   :  { %v1686_v39 = vsel %vm73_vm0, %v1680_v37, 0.0  ;;  %v4745_v53 = vpack.c.bf16 %v1726_v52, %v1725_v33 }
 0x714   :  { %1687 = vadd.xlane.f32.xlu1 %v1686_v39  ;;  %v1683_v42 = vsel %vm73_vm0, %v1679_v38, 0.0 }
 0x715   :  { %1684 = vadd.xlane.f32.xlu0 %v1683_v42  ;;  %4746 = vmatprep.subr.bf16.mxu1 %v4745_v53 }
 0x716   :  { %4748 = vmatpush3.bf16.msra.mxu1 %v4745_v53 }
 0x717   :  { %4750 = vmatprep.subr.bf16.mxu1 %v4749_v56 }
 0x71a   :  { %4752 = vmatpush3.bf16.msra.mxu1 %v4749_v56 }
 0x7a1   :  { %v1688_v43 = vpop.xlane.xlu1 %1687 }
 0x7a2   :  { %v1690_v44 = vmul.f32 0.03125, %v1688_v43  ;;  %v1685_v45 = vpop.xlane.xlu0 %1684 }
 0x7a3   :  { %v1689_v46 = vmul.f32 0.03125, %v1685_v45 }
 0x7a4   :  { %v1692_v47 = vsub.f32 %v1680_v37, %v1690_v44 }
 0x7a5   :  { %v1691_v48 = vsub.f32 %v1679_v38, %v1689_v46 }
 0x7a6   :  { %v1694_v51 = vmul.f32 %v1692_v47, %v1692_v47 }
 0x7a7   :  { %v1693_v49 = vmul.f32 %v1691_v48, %v1691_v48 }
 0x7a8   :  { %v1698_v35 = vsel %vm73_vm0, %v1694_v51, 0.0 }
 0x7a9   :  { %v1695_v50 = vsel %vm73_vm0, %v1693_v49, 0.0  ;;  %v4218_v49 = vld [vmem:[%s5781_s13] ss:$0 sm:$0xff] }
 0x7aa   :  { %1696 = vadd.xlane.f32.xlu0 %v1695_v50 }
 0x7ae   :  { %1699 = vadd.xlane.f32.xlu0 %v1698_v35 }
 0x837   :  { %v1697_v57 = vpop.xlane.xlu0 %1696 }
 0x838   :  { %v1701_v58 = vmul.f32 0.03125, %v1697_v57 }
 0x83a   :  { %v1703_v59 = vadd.f32 1e-12, %v1701_v58 }
 0x83b   :  { %v1700_v60 = vpop.xlane.xlu0 %1699 }
 0x83c   :  { %4884 = vrsqrt.f32 %v1703_v59  ;;  %v1702_v61 = vmul.f32 0.03125, %v1700_v60 }
 0x83e   :  { %v1704_v63 = vadd.f32 1e-12, %v1702_v61 }
 0x840   :  { %4886 = vrsqrt.f32 %v1704_v63 }
 0x846   :  { %v4885_v0 = vpop.eup %4884 }
 0x847   :  { %v1707_v2 = vmul.f32 %v4885_v0, %v1691_v48 }
 0x849   :  { %v1715_v4 = vmul.f32 %v4213_v1, %v1707_v2 }
 0x84a   :  { %v4887_v5 = vpop.eup %4886 }
 0x84b   :  { %v1708_v6 = vmul.f32 %v4887_v5, %v1692_v47  ;;  %v1723_v7 = vadd.f32 %v4214_v3, %v1715_v4  ;;  %v4224_v4 = vld [vmem:[%s5822_s0 + $0x28] sm:$0xff] }
 0x84d   :  { %v1716_v8 = vmul.f32 %v4213_v1, %v1708_v6  ;;  %4544 = vmatprep.mubr.msk.f32.mxu1 %vm73_vm0, %v1723_v7  ;;  %v4225_v6 = vld [vmem:[%s5822_s0 + $0x30] sm:$0xff] }
 0x84f   :  { %v1724_v9 = vadd.f32 %v4214_v3, %v1716_v8  ;;  %v4223_v3 = vld [vmem:[%s5822_s0 + $0x20] sm:$0xff] }
 0x850   :  { %v4769_v5 = vpack.c.bf16 %v4224_v4, %v4223_v3 }
 0x851   :  { %4545 = vmatmul.mubr.msk.f32.vlgmr.msra.gmra.mrb[16].mxu1 %vm73_vm0, %v1724_v9 }
 0x852   :  { %4770 = vmatprep.subr.bf16.mxu1 %v4769_v5 }
 0x853   :  { %4772 = vmatpush3.bf16.msra.mxu1 %v4769_v5 }
 0x924   :  { %v4546_v23 = vpop.f32.mrb[16].mxu1 }
 0x925   :  { %v1814_v24 = vadd.f32 %v4546_v23, %v4215_v22  ;;  %v1808_v25 = vpop.f32.mrb[17].mxu1 }
 0x926   :  { %v1809_v26 = vadd.f32 %v4215_v22, %v1808_v25  ;;  %v4228_v25 = vld [vmem:[%s5825_s4 + $0x1] ss:$0 sm:$0xff]  ;;  %s5829_s4 = smov 104  }
 0x927   :  { %v1820_v27 = vmul.f32 0.044715, %v1814_v24  ;;  %v1818_v46 = vmul.f32 0.5, %v1814_v24 }
 0x928   :  { %v1819_v28 = vmul.f32 0.044715, %v1809_v26  ;;  %v1817_v44 = vmul.f32 0.5, %v1809_v26 }
 0x929   :  { %v1822_v29 = vmul.f32 %v1820_v27, %v1814_v24 }
 0x92a   :  { %v1821_v30 = vmul.f32 %v1819_v28, %v1809_v26 }
 0x92b   :  { %v1824_v31 = vmul.f32 %v1822_v29, %v1814_v24 }
 0x92c   :  { %v1823_v32 = vmul.f32 %v1821_v30, %v1809_v26 }
 0x92d   :  { %v1826_v34 = vadd.f32 %v1824_v31, %v1814_v24 }
 0x92e   :  { %v1825_v41 = vadd.f32 %v1823_v32, %v1809_v26 }
 0x92f   :  { %v1828_v37 = vmul.f32 0.7978846, %v1826_v34 }
 0x930   :  { %v1827_v38 = vmul.f32 0.7978846, %v1825_v41 }
 0x931   :  { %4888 = vtanh.f32 %v1828_v37 }
 0x932   :  { %4890 = vtanh.f32 %v1827_v38 }
 0x93b   :  { %v4889_v39 = vpop.eup %4888 }
 0x93c   :  { %v4891_v42 = vpop.eup %4890  ;;  %v1832_v43 = vadd.f32 1.0, %v4889_v39 }
 0x93d   :  { %v1831_v45 = vadd.f32 1.0, %v4891_v42 }
 0x93e   :  { %v1834_v48 = vmul.f32 %v1832_v43, %v1818_v46 }
 0x93f   :  { %v1833_v47 = vmul.f32 %v1831_v45, %v1817_v44 }
 0x941   :  { %4563 = vmatprep.mubr.msk.f32.mxu0 %vm1850_vm5, %v1833_v47 }
 0x942   :  { %4564 = vmatmul.mubr.msk.f32.vlgmr.msra.gmra.mrb[20].mxu0 %vm1850_vm5, %v1834_v48 }
 0x943   :  { %4589 = vmatprep.mubr.msk.f32.mxu0 %vm4973_vm1, %v4972_v36 }
 0xa15   :  { %v4565_v50 = vpop.f32.mrb[20].mxu0 }
 0xa16   :  { %v1929_v51 = vadd.f32 %v4565_v50, %v4218_v49  ;;  %v1923_v35 = vpop.f32.mrb[21].mxu0 }
 0xa17   :  { %v1924_v33 = vadd.f32 %v4218_v49, %v1923_v35 }
 0xa18   :  { %v1933_v52 = vadd.f32 %v1929_v51, %v1724_v9 }
 0xa19   :  { %v1932_v53 = vadd.f32 %v1924_v33, %v1723_v7  ;;  %v4226_v7 = vld [vmem:[%s5822_s0 + $0x38] sm:$0xff] }
 0xa1a   :  { %v1939_v54 = vsel %vm73_vm0, %v1933_v52, 0.0  ;;  %v4773_v8 = vpack.c.bf16 %v4226_v7, %v4225_v6 }
 0xa1b   :  { %1940 = vadd.xlane.f32.xlu1 %v1939_v54  ;;  %v1936_v55 = vsel %vm73_vm0, %v1932_v53, 0.0 }
 0xa1c   :  { %1937 = vadd.xlane.f32.xlu0 %v1936_v55  ;;  %4774 = vmatprep.subr.bf16.mxu1 %v4773_v8 }
 0xa1d   :  { %4776 = vmatpush3.bf16.msra.mxu1 %v4773_v8 }
 0xa1e   :  { %4577 = vmatprep.subr.mxu1 %v4972_v36 }
 0xaa8   :  { %v1941_v56 = vpop.xlane.xlu1 %1940 }
 0xaa9   :  { %v1943_v57 = vmul.f32 0.03125, %v1941_v56  ;;  %v1938_v58 = vpop.xlane.xlu0 %1937 }
 0xaaa   :  { %v1942_v59 = vmul.f32 0.03125, %v1938_v58 }
 0xaab   :  { %v1945_v60 = vsub.f32 %v1933_v52, %v1943_v57 }
 0xaac   :  { %v1944_v61 = vsub.f32 %v1932_v53, %v1942_v59 }
 0xaad   :  { %v1947_v63 = vmul.f32 %v1945_v60, %v1945_v60 }
 0xaae   :  { %v1946_v0 = vmul.f32 %v1944_v61, %v1944_v61 }
 0xaaf   :  { %v1951_v1 = vsel %vm73_vm0, %v1947_v63, 0.0 }
 0xab0   :  { %1952 = vadd.xlane.f32.xlu1 %v1951_v1  ;;  %v1948_v2 = vsel %vm73_vm0, %v1946_v0, 0.0 }
 0xab1   :  { %1949 = vadd.xlane.f32.xlu0 %v1948_v2 }
 0xb3d   :  { %v1953_v9 = vpop.xlane.xlu1 %1952 }
 0xb3e   :  { %v1955_v10 = vmul.f32 0.03125, %v1953_v9  ;;  %v1950_v11 = vpop.xlane.xlu0 %1949 }
 0xb3f   :  { %v1954_v40 = vmul.f32 0.03125, %v1950_v11 }
 0xb40   :  { %v1957_v13 = vadd.f32 1e-12, %v1955_v10 }
 0xb41   :  { %v1956_v12 = vadd.f32 1e-12, %v1954_v40 }
 0xb42   :  { %4892 = vrsqrt.f32 %v1957_v13 }
 0xb43   :  { %4894 = vrsqrt.f32 %v1956_v12 }
 0xb4c   :  { %v4893_v14 = vpop.eup %4892 }
 0xb4d   :  { %v4895_v16 = vpop.eup %4894  ;;  %v1961_v17 = vmul.f32 %v4893_v14, %v1945_v60 }
 0xb4e   :  { %v1960_v18 = vmul.f32 %v4895_v16, %v1944_v61 }
 0xb4f   :  { %v1969_v21 = vmul.f32 %v4221_v15, %v1961_v17 }
 0xb50   :  { %v1968_v22 = vmul.f32 %v4221_v15, %v1960_v18 }
 0xb51   :  { %v5428_v24 = vadd.f32 %v4222_v20, %v1969_v21 }
 0xb52   :  { %v5426_v23 = vadd.f32 %v4222_v20, %v1968_v22 }
 0xb54   :  { %4574 = vmatprep.mubr.msk.f32.mxu1 %vm73_vm0, %v5426_v23 }
 0xb55   :  { %4575 = vmatmul.mubr.msk.f32.vlgmr.msra.gmra.mrb[18].mxu1 %vm73_vm0, %v5428_v24 }
 0xb56   :  { %4579 = vmatprep.mubr.msk.f32.mxu1 %vm4973_vm1, %v4972_v36 }
 0xc28   :  { %v4576_v26 = vpop.f32.mrb[18].mxu1 }
 0xc29   :  { %v2063_v27 = vpop.f32.mrb[19].mxu1  ;;  %v5453_v29 = vadd.f32 %v4576_v26, %v4228_v25 }
 0xc2a   :  { %v5439_v28 = vadd.f32 %v4228_v25, %v2063_v27 }
 0xc2c   :  { %2240 = vrot.lane.b32.xlu1 %v5439_v28, %s4974_s30  ;;  %2073 = vrot.lane.b32.xlu0 %v5439_v28, %s4975_s5 }
 0xc30   :  { %2238 = vrot.lane.b32.xlu1 %v5439_v28, %s4976_s22  ;;  %2405 = vrot.lane.b32.xlu0 %v5439_v28, %s5827_s1 }
 0xc34   :  { %2407 = vrot.lane.b32.xlu1 %v5439_v28, %s5828_s24  ;;  %2572 = vrot.lane.b32.xlu0 %v5439_v28, %s5829_s4 }
 0xc38   :  { %2574 = vrot.lane.b32.xlu1 %v5439_v28, %s5830_s2  ;;  %2922 = vrot.lane.b32.xlu0 %v5453_v29, %s4974_s30  ;;  %s5831_s30 = smov 64  }
 0xc3c   :  { %2755 = vrot.lane.b32.xlu1 %v5453_v29, %s4975_s5  ;;  %3089 = vrot.lane.b32.xlu0 %v5453_v29, %s5828_s24  ;;  %s5832_s5 = smov 48  }
 0xc40   :  { %2920 = vrot.lane.b32.xlu1 %v5453_v29, %s4976_s22  ;;  %3256 = vrot.lane.b32.xlu0 %v5453_v29, %s5830_s2  ;;  %s5833_s22 = smov 40   ;;  %s5837_s2 = smov 24  }
 0xc44   :  { %3087 = vrot.lane.b32.xlu1 %v5453_v29, %s5827_s1  ;;  %s4173_s1 = sshll.u32 %s4990_s23, 4  ;;  %s4174_s1 = int_to_ptr.vmem [resolvable:$true] %s4173_s1 }
 0xc45   :  { %p4953_p1 = scmp.lt.s32.totalorder %s4174_s1, %s4174_s1 }
 0xc48   :  { %3254 = vrot.lane.b32.xlu1 %v5453_v29, %s5829_s4 }
 0xc9e   :  { %v2241_v30 = vpop.permute.xlu1 %2240  ;;  %v2074_v31 = vpop.permute.xlu0 %2073 }
 0xc9f   :  { %4578 = vmatpush3.xpose.msk.msra.mxu1 %vm215_vm2, %v2074_v31  ;;  %4588 = vmatpush3.xpose.msk.msra.mxu0 %vm215_vm2, %v2241_v30 }
 0xca0   :  { %4597 = vmatprep.subr.mxu0 %v4972_v36  ;;  %4582 = vmatprep.subr.mxu1 %v4972_v36 }
 0xca2   :  { %v2239_v32 = vpop.permute.xlu1 %2238  ;;  %4580 = vmatmul.mubr.msk.f32.vlgmr.msra.gmra.mrb[20].mxu1 %vm215_vm2, %v5439_v28  ;;  %v2406_v34 = vpop.permute.xlu0 %2405 }
 0xca3   :  { %4590 = vmatmul.mubr.msk.f32.vlgmr.msra.gmra.mrb[22].mxu0 %vm215_vm2, %v2239_v32  ;;  %4584 = vmatprep.mubr.msk.f32.mxu1 %vm4973_vm1, %v4972_v36 }
 0xca4   :  { %4599 = vmatprep.mubr.msk.f32.mxu0 %vm4973_vm1, %v4972_v36 }
 0xca6   :  { %v2408_v41 = vpop.permute.xlu1 %2407  ;;  %v2573_v37 = vpop.permute.xlu0 %2572 }
 0xca7   :  { %4598 = vmatpush3.xpose.msk.msra.mxu0 %vm215_vm2, %v2408_v41 }
 0xca8   :  { %4607 = vmatprep.subr.mxu0 %v4972_v36 }
 0xcaa   :  { %v2575_v38 = vpop.permute.xlu1 %2574  ;;  %4600 = vmatmul.mubr.msk.f32.vlgmr.msra.gmra.mrb[24].mxu0 %vm215_vm2, %v2406_v34  ;;  %v2923_v39 = vpop.permute.xlu0 %2922 }
 0xcab   :  { %4608 = vmatpush3.xpose.msk.msra.mxu0 %vm215_vm2, %v2575_v38  ;;  %4609 = vmatprep.mubr.msk.f32.mxu0 %vm4973_vm1, %v4972_v36 }
 0xcac   :  { %4617 = vmatprep.subr.mxu0 %v4972_v36 }
 0xcae   :  { %v2756_v42 = vpop.permute.xlu1 %2755  ;;  %4610 = vmatmul.mubr.msk.f32.vlgmr.msra.gmra.mrb[26].mxu0 %vm215_vm2, %v2573_v37  ;;  %v3090_v44 = vpop.permute.xlu0 %3089 }
 0xcaf   :  { %4618 = vmatpush3.xpose.msk.msra.mxu0 %vm215_vm2, %v2756_v42  ;;  %4619 = vmatprep.mubr.msk.f32.mxu0 %vm4973_vm1, %v4972_v36 }
 0xcb0   :  { %4627 = vmatprep.subr.mxu0 %v4972_v36 }
 0xcb2   :  { %v2921_v43 = vpop.permute.xlu1 %2920  ;;  %4620 = vmatmul.mubr.msk.f32.vlgmr.msra.gmra.mrb[28].mxu0 %vm215_vm2, %v5453_v29  ;;  %v3257_v46 = vpop.permute.xlu0 %3256 }
 0xcb3   :  { %4628 = vmatpush3.xpose.msk.msra.mxu0 %vm215_vm2, %v2923_v39  ;;  %4629 = vmatprep.mubr.msk.f32.mxu0 %vm4973_vm1, %v4972_v36 }
 0xcb4   :  { %4637 = vmatprep.subr.mxu0 %v4972_v36 }
 0xcb6   :  { %4630 = vmatmul.mubr.msk.f32.vlgmr.msra.gmra.mrb[30].mxu0 %vm215_vm2, %v2921_v43  ;;  %v3088_v45 = vpop.permute.xlu1 %3087 }
 0xcb7   :  { %4638 = vmatpush3.xpose.msk.msra.mxu0 %vm215_vm2, %v3090_v44  ;;  %4639 = vmatprep.mubr.msk.f32.mxu0 %vm4973_vm1, %v4972_v36 }
 0xcb8   :  { %4647 = vmatprep.subr.mxu0 %v4972_v36 }
 0xcba   :  { %4640 = vmatmul.mubr.msk.f32.vlgmr.msra.gmra.mrb[32].mxu0 %vm215_vm2, %v3088_v45  ;;  %v3255_v47 = vpop.permute.xlu1 %3254 }
 0xcbb   :  { %4648 = vmatpush3.xpose.msk.msra.mxu0 %vm215_vm2, %v3257_v46  ;;  %4649 = vmatprep.mubr.msk.f32.mxu0 %vm4973_vm1, %v4972_v36 }
 0xcbe   :  { %4650 = vmatmul.mubr.msk.f32.vlgmr.msra.gmra.mrb[34].mxu0 %vm215_vm2, %v3255_v47 }
 0xd75   :  { %v2145_v48 = vpop.f32.mrb[20].mxu1 }
 0xd76   :  { %v2149_v49 = vmul.f32 0.35355338, %v2145_v48  ;;  %v4581_v50 = vpop.f32.mrb[21].mxu1  ;;  %v2312_v51 = vpop.f32.mrb[22].mxu0 }
 0xd77   :  { %v2316_v35 = vmul.f32 0.35355338, %v2312_v51  ;;  %v4591_v33 = vpop.f32.mrb[23].mxu0 }
 0xd78   :  { %v2150_v52 = vadd.f32 %v2149_v49, %v5220_v62 }
 0xd79   :  { %v2317_v53 = vadd.f32 %v2316_v35, %v5220_v62 }
 0xd7a   :  { %v2151_v54 = vsel %vm215_vm2, %v2150_v52, -inf }
 0xd7b   :  { %2152 = vmax.xlane.f32.xlu0 %v2151_v54  ;;  %v2318_v55 = vsel %vm215_vm2, %v2317_v53, -inf }
 0xd7c   :  { %2319 = vmax.xlane.f32.xlu1 %v2318_v55 }
 0xd7d   :  { %v2479_v56 = vpop.f32.mrb[24].mxu0 }
 0xd7e   :  { %v2483_v57 = vmul.f32 0.35355338, %v2479_v56  ;;  %v4601_v58 = vpop.f32.mrb[25].mxu0 }
 0xd80   :  { %v5515_v59 = vadd.f32 %v2483_v57, %v5220_v62 }
 0xd81   :  { %v2646_v60 = vpop.f32.mrb[26].mxu0 }
 0xd82   :  { %v2650_v61 = vmul.f32 0.35355338, %v2646_v60  ;;  %v4611_v63 = vpop.f32.mrb[27].mxu0  ;;  %v2485_v0 = vsel %vm215_vm2, %v5515_v59, -inf }
 0xd83   :  { %2486 = vmax.xlane.f32.xlu0 %v2485_v0 }
 0xd84   :  { %v2651_v1 = vadd.f32 %v2650_v61, %v5220_v62 }
 0xd85   :  { %v2827_v2 = vpop.f32.mrb[28].mxu0 }
 0xd86   :  { %v2831_v3 = vmul.f32 0.35355338, %v2827_v2  ;;  %v4621_v4 = vpop.f32.mrb[29].mxu0  ;;  %v2652_v5 = vsel %vm215_vm2, %v2651_v1, -inf }
 0xd87   :  { %2653 = vmax.xlane.f32.xlu0 %v2652_v5 }
 0xd88   :  { %v2832_v6 = vadd.f32 %v2831_v3, %v5232_v19 }
 0xd89   :  { %v2994_v7 = vpop.f32.mrb[30].mxu0 }
 0xd8a   :  { %v2998_v8 = vmul.f32 0.35355338, %v2994_v7  ;;  %v4631_v9 = vpop.f32.mrb[31].mxu0  ;;  %v2833_v10 = vsel %vm215_vm2, %v2832_v6, -inf }
 0xd8b   :  { %2834 = vmax.xlane.f32.xlu0 %v2833_v10 }
 0xd8c   :  { %v2999_v11 = vadd.f32 %v2998_v8, %v5232_v19 }
 0xd8d   :  { %v3161_v40 = vpop.f32.mrb[32].mxu0 }
 0xd8e   :  { %v3165_v13 = vmul.f32 0.35355338, %v3161_v40  ;;  %v4641_v12 = vpop.f32.mrb[33].mxu0  ;;  %v3000_v62 = vsel %vm215_vm2, %v2999_v11, -inf }
 0xd8f   :  { %3001 = vmax.xlane.f32.xlu1 %v3000_v62 }
 0xd90   :  { %v3166_v14 = vadd.f32 %v3165_v13, %v5232_v19 }
 0xd91   :  { %v3328_v15 = vpop.f32.mrb[34].mxu0 }
 0xd92   :  { %v4651_v16 = vpop.f32.mrb[35].mxu0  ;;  %v3167_v17 = vsel %vm215_vm2, %v3166_v14, -inf  ;;  %v3332_v18 = vmul.f32 0.35355338, %v3328_v15 }
 0xd93   :  { %3168 = vmax.xlane.f32.xlu0 %v3167_v17 }
 0xd94   :  { %v3333_v20 = vadd.f32 %v3332_v18, %v5232_v19 }
 0xd96   :  { %v3334_v21 = vsel %vm215_vm2, %v3333_v20, -inf }
 0xda0   :  { %2162 = vrot.lane.b32.xlu1 %v5439_v28, %s5831_s30 }
 0xdc4   :  { %3335 = vmax.xlane.f32.xlu1 %v3334_v21 }
 0xdd5   :  { %2496 = vrot.lane.b32.xlu1 %v5439_v28, %s5832_s5 }
 0xdd9   :  { %2663 = vrot.lane.b32.xlu1 %v5439_v28, %s5833_s22 }
 0xddd   :  { %2844 = vrot.lane.b32.xlu1 %v5453_v29, %s5831_s30 }
 0xe08   :  { %v2153_v22 = vpop.xlane.xlu0 %2152 }
 0xe09   :  { %v2154_v25 = vsub.f32 %v2150_v52, %v2153_v22  ;;  %v2320_v26 = vpop.xlane.xlu1 %2319 }
 0xe0a   :  { %v2321_v27 = vsub.f32 %v2317_v53, %v2320_v26 }
 0xe0b   :  { %v2155_v30 = vmul.f32 1.442695, %v2154_v25 }
 0xe0c   :  { %v2322_v31 = vmul.f32 1.442695, %v2321_v27 }
 0xe0d   :  { %4896 = vpow2.f32 %v2155_v30 }
 0xe0e   :  { %4898 = vpow2.f32 %v2322_v31 }
 0xe10   :  { %v2487_v19 = vpop.xlane.xlu0 %2486 }
 0xe11   :  { %v2488_v47 = vsub.f32 %v5515_v59, %v2487_v19 }
 0xe13   :  { %v2489_v49 = vmul.f32 1.442695, %v2488_v47 }
 0xe14   :  { %v2654_v32 = vpop.xlane.xlu0 %2653 }
 0xe15   :  { %v2655_v34 = vsub.f32 %v2651_v1, %v2654_v32 }
 0xe17   :  { %v4897_v41 = vpop.eup %4896  ;;  %v2656_v37 = vmul.f32 1.442695, %v2655_v34 }
 0xe18   :  { %v5537_v38 = vpop.eup %4898  ;;  %v2157_v39 = vsel %vm215_vm2, %v4897_v41, 0.0  ;;  %v2835_v48 = vpop.xlane.xlu0 %2834 }
 0xe19   :  { %4900 = vpow2.f32 %v2656_v37  ;;  %2158 = vadd.xlane.f32.xlu0 %v2157_v39  ;;  %v2324_v42 = vsel %vm215_vm2, %v5537_v38, 0.0  ;;  %v2836_v50 = vsub.f32 %v2832_v6, %v2835_v48 }
 0xe1a   :  { %2325 = vadd.xlane.f32.xlu1 %v2324_v42  ;;  %4902 = vpow2.f32 %v2489_v49  ;;  %v4257_v49 = vld [vmem:[%s5774_s6 + $0x30] sm:$0xff] }
 0xe1b   :  { %v2837_v35 = vmul.f32 1.442695, %v2836_v50  ;;  %v4258_v50 = vld [vmem:[%s5774_s6 + $0x38] sm:$0xff] }
 0xe1c   :  { %v3002_v43 = vpop.xlane.xlu1 %3001 }
 0xe1d   :  { %4904 = vpow2.f32 %v2837_v35  ;;  %v3003_v52 = vsub.f32 %v2999_v11, %v3002_v43  ;;  %v4781_v35 = vpack.c.bf16 %v4258_v50, %v4257_v49 }
 0xe1f   :  { %v3004_v54 = vmul.f32 1.442695, %v3003_v52 }
 0xe20   :  { %v2163_v44 = vpop.permute.xlu1 %2162  ;;  %v3169_v51 = vpop.xlane.xlu0 %3168 }
 0xe21   :  { %4583 = vmatpush3.msra.mxu1 %v2163_v44  ;;  %v3170_v33 = vsub.f32 %v3166_v14, %v3169_v51  ;;  %v4255_v44 = vld [vmem:[%s5774_s6 + $0x20] sm:$0xff] }
 0xe22   :  { %4592 = vmatprep.subr.mxu1 %v4972_v36 }
 0xe23   :  { %v5543_v45 = vpop.eup %4900  ;;  %v3171_v53 = vmul.f32 1.442695, %v3170_v33 }
 0xe24   :  { %v2658_v46 = vsel %vm215_vm2, %v5543_v45, 0.0  ;;  %v4903_v55 = vpop.eup %4902 }
 0xe25   :  { %2659 = vadd.xlane.f32.xlu1 %v2658_v46  ;;  %4906 = vpow2.f32 %v3171_v53 }
 0xe26   :  { %4908 = vpow2.f32 %v3004_v54 }
 0xe27   :  { %v4905_v56 = vpop.eup %4904 }
 0xe28   :  { %v2839_v58 = vsel %vm215_vm2, %v4905_v56, 0.0 }
 0xe2f   :  { %2329 = vrot.lane.b32.xlu0 %v5439_v28, %s5834_s3  ;;  %v2491_v28 = vsel %vm215_vm2, %v4903_v55, 0.0  ;;  %v5554_v59 = vpop.eup %4906 }
 0xe30   :  { %v3173_v63 = vsel %vm215_vm2, %v5554_v59, 0.0  ;;  %v4909_v0 = vpop.eup %4908 }
 0xe31   :  { %v3006_v1 = vsel %vm215_vm2, %v4909_v0, 0.0 }
 0xe36   :  { %3011 = vrot.lane.b32.xlu1 %v5453_v29, %s5834_s3 }
 0xe4e   :  { %2492 = vadd.xlane.f32.xlu0 %v2491_v28 }
 0xe51   :  { %v3336_v57 = vpop.xlane.xlu1 %3335 }
 0xe52   :  { %v3337_v60 = vsub.f32 %v3333_v20, %v3336_v57  ;;  %2840 = vadd.xlane.f32.xlu0 %v2839_v58 }
 0xe54   :  { %v3338_v61 = vmul.f32 1.442695, %v3337_v60 }
 0xe55   :  { %v2497_v4 = vpop.permute.xlu1 %2496 }
 0xe56   :  { %4910 = vpow2.f32 %v3338_v61  ;;  %3174 = vadd.xlane.f32.xlu0 %v3173_v63 }
 0xe59   :  { %v2664_v5 = vpop.permute.xlu1 %2663 }
 0xe5a   :  { %3007 = vadd.xlane.f32.xlu1 %v3006_v1 }
 0xe5d   :  { %v2845_v6 = vpop.permute.xlu1 %2844 }
 0xe60   :  { %v5559_v2 = vpop.eup %4910 }
 0xe61   :  { %v3340_v3 = vsel %vm215_vm2, %v5559_v2, 0.0 }
 0xe62   :  { %3341 = vadd.xlane.f32.xlu0 %v3340_v3 }
 0xe6b   :  { %3345 = vrot.lane.b32.xlu1 %v5453_v29, %s5833_s22 }
 0xe78   :  { %3178 = vrot.lane.b32.xlu0 %v5453_v29, %s5832_s5 }
 0xea6   :  { %v2159_v7 = vpop.xlane.xlu0 %2158 }
 0xea7   :  { %4912 = vrcp.f32 %v2159_v7  ;;  %v2326_v8 = vpop.xlane.xlu1 %2325 }
 0xea8   :  { %4914 = vrcp.f32 %v2326_v8  ;;  %v4260_v8 = vld [vmem:[%s5775_s7 + $0x1] ss:$0 sm:$0xff] }
 0xeaa   :  { %v2330_v40 = vpop.permute.xlu0 %2329 }
 0xeb1   :  { %v4913_v9 = vpop.eup %4912 }
 0xeb2   :  { %v2161_v10 = vmul.f32 %v4913_v9, %v4897_v41  ;;  %v4915_v11 = vpop.eup %4914  ;;  %v2660_v29 = vpop.xlane.xlu1 %2659 }
 0xeb3   :  { %v2328_v13 = vmul.f32 %v4915_v11, %v5537_v38 }
 0xeb4   :  { %4585 = vmatmul.mubr.msk.f32.vlgmr.msra.gmra.mrb[22].mxu1 %vm215_vm2, %v2161_v10 }
 0xeb5   :  { %4593 = vmatpush3.msra.mxu1 %v2330_v40  ;;  %4594 = vmatprep.mubr.msk.f32.mxu1 %vm4973_vm1, %v4972_v36 }
 0xeb6   :  { %4602 = vmatprep.subr.mxu1 %v4972_v36  ;;  %v3012_v14 = vpop.permute.xlu1 %3011 }
 0xeb8   :  { %4595 = vmatmul.mubr.msk.f32.vlgmr.msra.gmra.mrb[24].mxu1 %vm215_vm2, %v2328_v13 }
 0xeb9   :  { %4603 = vmatpush3.msra.mxu1 %v2497_v4  ;;  %4604 = vmatprep.mubr.msk.f32.mxu1 %vm4973_vm1, %v4972_v36 }
 0xeba   :  { %4612 = vmatprep.subr.mxu1 %v4972_v36 }
 0xedb   :  { %v2493_v12 = vpop.xlane.xlu0 %2492 }
 0xedc   :  { %4916 = vrcp.f32 %v2493_v12 }
 0xedd   :  { %4918 = vrcp.f32 %v2660_v29 }
 0xedf   :  { %v2841_v62 = vpop.xlane.xlu0 %2840 }
 0xee0   :  { %4920 = vrcp.f32 %v2841_v62 }
 0xee3   :  { %v3175_v17 = vpop.xlane.xlu0 %3174 }
 0xee6   :  { %v4917_v15 = vpop.eup %4916 }
 0xee7   :  { %v2495_v16 = vmul.f32 %v4917_v15, %v4903_v55  ;;  %v3008_v18 = vpop.xlane.xlu1 %3007  ;;  %v4919_v20 = vpop.eup %4918 }
 0xee8   :  { %4922 = vrcp.f32 %v3008_v18  ;;  %v2662_v21 = vmul.f32 %v4919_v20, %v5543_v45  ;;  %v4256_v45 = vld [vmem:[%s5774_s6 + $0x28] sm:$0xff] }
 0xee9   :  { %4605 = vmatmul.mubr.msk.f32.vlgmr.msra.gmra.mrb[26].mxu1 %vm215_vm2, %v2495_v16  ;;  %4924 = vrcp.f32 %v3175_v17  ;;  %v4777_v47 = vpack.c.bf16 %v4256_v45, %v4255_v44  ;;  %v4266_v45 = vld [vmem:[%s5777_s9 + $0x1] ss:$0 sm:$0xff] }
 0xeea   :  { %4613 = vmatpush3.msra.mxu1 %v2664_v5  ;;  %4614 = vmatprep.mubr.msk.f32.mxu1 %vm4973_vm1, %v4972_v36  ;;  %v4921_v22 = vpop.eup %4920 }
 0xeeb   :  { %4622 = vmatprep.subr.mxu1 %v4972_v36  ;;  %v2843_v25 = vmul.f32 %v4921_v22, %v4905_v56  ;;  %v3346_v34 = vpop.permute.xlu1 %3345  ;;  %4778 = vmatprep.subr.bf16.mxu0 %v4777_v47 }
 0xeec   :  { %4780 = vmatpush3.bf16.msra.mxu0 %v4777_v47 }
 0xeed   :  { %4615 = vmatmul.mubr.msk.f32.vlgmr.msra.gmra.mrb[28].mxu1 %vm215_vm2, %v2662_v21  ;;  %4782 = vmatprep.subr.bf16.mxu0 %v4781_v35 }
 0xeee   :  { %4623 = vmatpush3.msra.mxu1 %v2845_v6  ;;  %4624 = vmatprep.mubr.msk.f32.mxu1 %vm4973_vm1, %v4972_v36 }
 0xeef   :  { %v3342_v26 = vpop.xlane.xlu0 %3341  ;;  %4632 = vmatprep.subr.mxu1 %v4972_v36 }
 0xef0   :  { %4926 = vrcp.f32 %v3342_v26  ;;  %4784 = vmatpush3.bf16.msra.mxu0 %v4781_v35  ;;  %v4268_v26 = vld [vmem:[%s5778_s10 + $0x28] sm:$0xff]  ;;  %v4275_v35 = vld [vmem:[%s5780_s12 + $0x40] sm:$0xff] }
 0xef1   :  { %4625 = vmatmul.mubr.msk.f32.vlgmr.msra.gmra.mrb[30].mxu1 %vm215_vm2, %v2843_v25 }
 0xef2   :  { %v4923_v27 = vpop.eup %4922  ;;  %4633 = vmatpush3.msra.mxu1 %v3012_v14  ;;  %4634 = vmatprep.mubr.msk.f32.mxu1 %vm4973_vm1, %v4972_v36 }
 0xef3   :  { %v3010_v30 = vmul.f32 %v4923_v27, %v4909_v0  ;;  %v3179_v31 = vpop.permute.xlu0 %3178  ;;  %4642 = vmatprep.subr.mxu1 %v4972_v36  ;;  %v4925_v19 = vpop.eup %4924 }
 0xef4   :  { %v3177_v32 = vmul.f32 %v4925_v19, %v5554_v59 }
 0xef5   :  { %4635 = vmatmul.mubr.msk.f32.vlgmr.msra.gmra.mrb[32].mxu1 %vm215_vm2, %v3010_v30  ;;  %v4269_v30 = vld [vmem:[%s5778_s10 + $0x30] sm:$0xff] }
 0xef6   :  { %4643 = vmatpush3.msra.mxu1 %v3179_v31  ;;  %4644 = vmatprep.mubr.msk.f32.mxu1 %vm4973_vm1, %v4972_v36  ;;  %v4270_v31 = vld [vmem:[%s5778_s10 + $0x38] sm:$0xff] }
 0xef7   :  { %4652 = vmatprep.subr.mxu1 %v4972_v36  ;;  %v4789_v19 = vpack.c.bf16 %v4270_v31, %v4269_v30 }
 0xef9   :  { %4645 = vmatmul.mubr.msk.f32.vlgmr.msra.gmra.mrb[34].mxu1 %vm215_vm2, %v3177_v32 }
 0xefa   :  { %v4927_v41 = vpop.eup %4926  ;;  %4653 = vmatpush3.msra.mxu1 %v3346_v34  ;;  %4654 = vmatprep.mubr.msk.f32.mxu1 %vm4973_vm1, %v4972_v36 }
 0xefb   :  { %v3344_v37 = vmul.f32 %v4927_v41, %v5559_v2 }
 0xefd   :  { %4655 = vmatmul.mubr.msk.f32.vlgmr.msra.gmra.mrb[36].mxu1 %vm215_vm2, %v3344_v37 }
 0xf87   :  { %v2234_v38 = vpop.f32.mrb[22].mxu1 }
 0xf88   :  { %v4586_v39 = vpop.f32.mrb[23].mxu1 }
 0xf8b   :  { %v2401_v42 = vpop.f32.mrb[24].mxu1 }
 0xf8c   :  { %2740 = vrot.lane.b32.xlu0 %v2401_v42, %s5835_s26  ;;  %v4596_v43 = vpop.f32.mrb[25].mxu1 }
 0xf8d   :  { %v4265_v43 = vld [vmem:[%s5776_s8 + $0x1] ss:$0 sm:$0xff] }
 0xfbc   :  { %v2568_v46 = vpop.f32.mrb[26].mxu1 }
 0xfbd   :  { %2744 = vrot.lane.b32.xlu1 %v2568_v46, %s5836_s27  ;;  %v4606_v48 = vpop.f32.mrb[27].mxu1 }
 0xfc0   :  { %v2735_v51 = vpop.f32.mrb[28].mxu1 }
 0xfc1   :  { %2748 = vrot.lane.b32.xlu1 %v2735_v51, %s5837_s2  ;;  %v4616_v33 = vpop.f32.mrb[29].mxu1 }
 0xfc2   :  { %v4276_v33 = vld [vmem:[%s5780_s12 + $0x48] sm:$0xff] }
 0xfc4   :  { %v2916_v52 = vpop.f32.mrb[30].mxu1 }
 0xfc5   :  { %v4626_v53 = vpop.f32.mrb[31].mxu1 }
 0xfc6   :  { %v4277_v53 = vld [vmem:[%s5780_s12 + $0x50] sm:$0xff] }
 0xfc8   :  { %v3083_v54 = vpop.f32.mrb[32].mxu1 }
 0xfc9   :  { %3422 = vrot.lane.b32.xlu0 %v3083_v54, %s5835_s26  ;;  %v4636_v55 = vpop.f32.mrb[33].mxu1  ;;  %v4278_v54 = vld [vmem:[%s5780_s12 + $0x58] sm:$0xff] }
 0xfca   :  { %v4797_v55 = vpack.c.bf16 %v4278_v54, %v4277_v53  ;;  %v4289_v54 = vld [vmem:[%s5782_s14 + $0x1] ss:$0 sm:$0xff] }
 0xfcc   :  { %v3250_v28 = vpop.f32.mrb[34].mxu1 }
 0xfcd   :  { %3426 = vrot.lane.b32.xlu0 %v3250_v28, %s5836_s27  ;;  %v4646_v56 = vpop.f32.mrb[35].mxu1  ;;  %v4279_v28 = vld [vmem:[%s5780_s12 + $0x60] sm:$0xff] }
 0xfce   :  { %v4280_v56 = vld [vmem:[%s5780_s12 + $0x68] sm:$0xff] }
 0xfd0   :  { %v3417_v57 = vpop.f32.mrb[36].mxu1 }
 0xfd1   :  { %3430 = vrot.lane.b32.xlu1 %v3417_v57, %s5837_s2  ;;  %v4656_v58 = vpop.f32.mrb[37].mxu1  ;;  %v4801_v57 = vpack.c.bf16 %v4280_v56, %v4279_v28 }
 0xfd2   :  { %v4281_v58 = vld [vmem:[%s5780_s12 + $0x70] sm:$0xff] }
 0xffe   :  { %v2741_v59 = vpop.permute.xlu0 %2740 }
 0xfff   :  { %v2751_v61 = vsel %vm215_vm2, %v2234_v38, %v2741_v59  ;;  %v4282_v59 = vld [vmem:[%s5780_s12 + $0x78] sm:$0xff] }
0x102f   :  { %v2745_v60 = vpop.permute.xlu1 %2744 }
0x1030   :  { %v2752_v63 = vsel %vm897_vm3, %v2751_v61, %v2745_v60  ;;  %v4805_v60 = vpack.c.bf16 %v4282_v59, %v4281_v58  ;;  %v4272_v61 = vld [vmem:[%s5779_s11 + $0x1] ss:$0 sm:$0xff] }
0x1033   :  { %v2749_v0 = vpop.permute.xlu1 %2748 }
0x1034   :  { %v2753_v1 = vsel %vm899_vm4, %v2752_v63, %v2749_v0 }
0x1035   :  { %4665 = vmatprep.mubr.msk.f32.mxu0 %vm73_vm0, %v2753_v1 }
0x103b   :  { %v3423_v2 = vpop.permute.xlu0 %3422 }
0x103c   :  { %v3433_v4 = vsel %vm215_vm2, %v2916_v52, %v3423_v2  ;;  %v4793_v52 = vpack.c.bf16 %v4276_v33, %v4275_v35 }
0x103e   :  { %4794 = vmatprep.subr.bf16.mxu0 %v4793_v52 }
0x103f   :  { %v3427_v3 = vpop.permute.xlu0 %3426 }
0x1040   :  { %v3434_v5 = vsel %vm897_vm3, %v3433_v4, %v3427_v3 }
0x1043   :  { %v3431_v6 = vpop.permute.xlu1 %3430 }
0x1044   :  { %v3435_v7 = vsel %vm899_vm4, %v3434_v5, %v3431_v6 }
0x1045   :  { %4666 = vmatmul.mubr.msk.f32.vlgmr.msra.gmra.mrb[36].mxu0 %vm73_vm0, %v3435_v7 }
0x1046   :  { %4796 = vmatpush3.bf16.msra.mxu0 %v4793_v52 }
0x1047   :  { %4798 = vmatprep.subr.bf16.mxu0 %v4797_v55 }
0x104a   :  { %4800 = vmatpush3.bf16.msra.mxu0 %v4797_v55 }
0x104b   :  { %4802 = vmatprep.subr.bf16.mxu0 %v4801_v57 }
0x104e   :  { %4804 = vmatpush3.bf16.msra.mxu0 %v4801_v57  ;;  %v4290_v57 = vld [vmem:[%s5783_s15 + $0x1] ss:$0 sm:$0xff] }
0x104f   :  { %4806 = vmatprep.subr.bf16.mxu0 %v4805_v60 }
0x1052   :  { %4808 = vmatpush3.bf16.msra.mxu0 %v4805_v60 }
0x1118   :  { %v4667_v9 = vpop.f32.mrb[36].mxu0 }
0x1119   :  { %v3527_v10 = vadd.f32 %v4667_v9, %v4260_v8  ;;  %v3521_v11 = vpop.f32.mrb[37].mxu0 }
0x111a   :  { %v3522_v40 = vadd.f32 %v4260_v8, %v3521_v11 }
0x111b   :  { %v3531_v13 = vadd.f32 %v3527_v10, %v5428_v24 }
0x111c   :  { %v3530_v29 = vadd.f32 %v3522_v40, %v5426_v23  ;;  %v4267_v23 = vld [vmem:[%s5778_s10 + $0x20] sm:$0xff]  ;;  %s4948_s10 = scalar_lea.vmem %s4174_s1, 32 }
0x111d   :  { %v3539_v12 = vsel %vm73_vm0, %v3531_v13, 0.0  ;;  %v4785_v27 = vpack.c.bf16 %v4268_v26, %v4267_v23  ;;  %p4949_p0 = scmp.ne.s32.totalorder %s4174_s1, %s4948_s10  ;;  %p4954_p2 = scmp.lt.s32.totalorder %s4948_s10, %s4948_s10 }
0x111e   :  { %3540 = vadd.xlane.f32.xlu1 %v3539_v12  ;;  %v3536_v62 = vsel %vm73_vm0, %v3530_v29, 0.0 }
0x111f   :  { %3537 = vadd.xlane.f32.xlu0 %v3536_v62  ;;  %4786 = vmatprep.subr.bf16.mxu1 %v4785_v27  ;;  %p4955_p3 = por %p4954_p2, %p4953_p1 }
0x1120   :  { %4788 = vmatpush3.bf16.msra.mxu1 %v4785_v27 }
0x1121   :  { %4790 = vmatprep.subr.bf16.mxu1 %v4789_v19  ;;  %p4956_p4 = pnand %p4955_p3, %p4949_p0 }
0x1124   :  { %4792 = vmatpush3.bf16.msra.mxu1 %v4789_v19 }
0x11ab   :  { %v3541_v14 = vpop.xlane.xlu1 %3540 }
0x11ac   :  { %v3543_v15 = vmul.f32 0.03125, %v3541_v14  ;;  %v3538_v16 = vpop.xlane.xlu0 %3537 }
0x11ad   :  { %v3542_v17 = vmul.f32 0.03125, %v3538_v16 }
0x11ae   :  { %v3545_v18 = vsub.f32 %v3531_v13, %v3543_v15 }
0x11af   :  { %v3544_v20 = vsub.f32 %v3530_v29, %v3542_v17 }
0x11b0   :  { %v3547_v25 = vmul.f32 %v3545_v18, %v3545_v18 }
0x11b1   :  { %v3546_v21 = vmul.f32 %v3544_v20, %v3544_v20 }
0x11b2   :  { %v3551_v24 = vsel %vm73_vm0, %v3547_v25, 0.0 }
0x11b3   :  { %v3548_v22 = vsel %vm73_vm0, %v3546_v21, 0.0 }
0x11b4   :  { %3549 = vadd.xlane.f32.xlu0 %v3548_v22 }
0x11b8   :  { %3552 = vadd.xlane.f32.xlu0 %v3551_v24 }
0x1241   :  { %v3550_v32 = vpop.xlane.xlu0 %3549 }
0x1242   :  { %v3554_v34 = vmul.f32 0.03125, %v3550_v32 }
0x1244   :  { %v3556_v41 = vadd.f32 1e-12, %v3554_v34 }
0x1245   :  { %v3553_v37 = vpop.xlane.xlu0 %3552 }
0x1246   :  { %4928 = vrsqrt.f32 %v3556_v41  ;;  %v3555_v38 = vmul.f32 0.03125, %v3553_v37 }
0x1248   :  { %v3557_v39 = vadd.f32 1e-12, %v3555_v38 }
0x124a   :  { %4930 = vrsqrt.f32 %v3557_v39 }
0x1250   :  { %v4929_v42 = vpop.eup %4928 }
0x1251   :  { %v3560_v44 = vmul.f32 %v4929_v42, %v3544_v20 }
0x1253   :  { %v3568_v46 = vmul.f32 %v4265_v43, %v3560_v44  ;;  %v3837_v44 = vld [vmem:[%s5784_s16 + $0x8] sm:$0xff] }
0x1254   :  { %v4931_v47 = vpop.eup %4930 }
0x1255   :  { %v3561_v48 = vmul.f32 %v4931_v47, %v3545_v18  ;;  %v3576_v49 = vadd.f32 %v4266_v45, %v3568_v46  ;;  %v4284_v18 = vld [vmem:[%s5781_s13 + $0x1] ss:$0 sm:$0xff]  ;;  %v3838_v46 = vld [vmem:[%s5784_s16 + $0x10] sm:$0xff]  ;;  %v3839_v47 = vld [vmem:[%s5784_s16 + $0x18] sm:$0xff] }
0x1257   :  { %v3569_v50 = vmul.f32 %v4265_v43, %v3561_v48  ;;  %4676 = vmatprep.mubr.msk.f32.mxu1 %vm73_vm0, %v3576_v49  ;;  %v3836_v43 = vld [vmem:[%s5784_s16] sm:$0xff]  ;;  %v4813_v48 = vpack.c.bf16 %v3839_v47, %v3838_v46 }
0x1259   :  { %v3577_v51 = vadd.f32 %v4266_v45, %v3569_v50  ;;  %v4809_v45 = vpack.c.bf16 %v3837_v44, %v3836_v43 }
0x125b   :  { %4677 = vmatmul.mubr.msk.f32.vlgmr.msra.gmra.mrb[38].mxu1 %vm73_vm0, %v3577_v51  ;;  %4810 = vmatprep.subr.bf16.mxu1 %v4809_v45 }
0x125c   :  { %4812 = vmatpush3.bf16.msra.mxu1 %v4809_v45 }
0x125d   :  { %4814 = vmatprep.subr.bf16.mxu1 %v4813_v48 }
0x1260   :  { %4816 = vmatpush3.bf16.msra.mxu1 %v4813_v48 }
0x132e   :  { %v4678_v63 = vpop.f32.mrb[38].mxu1 }
0x132f   :  { %v3669_v0 = vadd.f32 %v4678_v63, %v4272_v61  ;;  %v3663_v1 = vpop.f32.mrb[39].mxu1  ;;  %v3930_v63 = vld [vmem:[%s5786_s18] sm:$0xff] }
0x1330   :  { %v3664_v2 = vadd.f32 %v4272_v61, %v3663_v1 }
0x1331   :  { %v3675_v3 = vmul.f32 0.044715, %v3669_v0  ;;  %v3673_v15 = vmul.f32 0.5, %v3669_v0 }
0x1332   :  { %v3674_v4 = vmul.f32 0.044715, %v3664_v2  ;;  %v3672_v62 = vmul.f32 0.5, %v3664_v2 }
0x1333   :  { %v3677_v5 = vmul.f32 %v3675_v3, %v3669_v0  ;;  %v4291_v3 = vld [vmem:[%s5785_s17] ss:$0 sm:$0xff] }
0x1334   :  { %v3676_v6 = vmul.f32 %v3674_v4, %v3664_v2 }
0x1335   :  { %v3679_v7 = vmul.f32 %v3677_v5, %v3669_v0 }
0x1336   :  { %v3678_v8 = vmul.f32 %v3676_v6, %v3664_v2 }
0x1337   :  { %v3681_v9 = vadd.f32 %v3679_v7, %v3669_v0  ;;  %v3931_v0 = vld [vmem:[%s5786_s18 + $0x8] sm:$0xff] }
0x1338   :  { %v3680_v10 = vadd.f32 %v3678_v8, %v3664_v2  ;;  %v4817_v1 = vpack.c.bf16 %v3931_v0, %v3930_v63  ;;  %v3932_v2 = vld [vmem:[%s5786_s18 + $0x10] sm:$0xff] }
0x1339   :  { %v3683_v11 = vmul.f32 0.7978846, %v3681_v9 }
0x133a   :  { %v3682_v40 = vmul.f32 0.7978846, %v3680_v10  ;;  %4818 = vmatprep.subr.bf16.mxu1 %v4817_v1  ;;  %v4988_v10 = vmov 0  }
0x133b   :  { %4932 = vtanh.f32 %v3683_v11  ;;  %4847 = vset.pattern.permute.xlu1 %v4988_v10  ;;  %4846 = vset.pattern.permute.xlu0 %v4988_v10 }
0x133c   :  { %4934 = vtanh.f32 %v3682_v40 }
0x1345   :  { %v4933_v13 = vpop.eup %4932 }
0x1346   :  { %v4935_v29 = vpop.eup %4934  ;;  %v3687_v12 = vadd.f32 1.0, %v4933_v13 }
0x1347   :  { %v3686_v14 = vadd.f32 1.0, %v4935_v29 }
0x1348   :  { %v3689_v17 = vmul.f32 %v3687_v12, %v3673_v15 }
0x1349   :  { %v3688_v16 = vmul.f32 %v3686_v14, %v3672_v62 }
0x134b   :  { %4695 = vmatprep.mubr.msk.f32.mxu0 %vm1850_vm5, %v3688_v16 }
0x134c   :  { %4696 = vmatmul.mubr.msk.f32.vlgmr.msra.gmra.mrb[38].mxu0 %vm1850_vm5, %v3689_v17 }
0x141f   :  { %v4697_v20 = vpop.f32.mrb[38].mxu0 }
0x1420   :  { %v3785_v21 = vadd.f32 %v4697_v20, %v4284_v18  ;;  %v3779_v22 = vpop.f32.mrb[39].mxu0 }
0x1421   :  { %v3780_v25 = vadd.f32 %v4284_v18, %v3779_v22 }
0x1422   :  { %v3789_v24 = vadd.f32 %v3785_v21, %v3577_v51 }
0x1423   :  { %v3788_v23 = vadd.f32 %v3780_v25, %v3576_v49 }
0x1424   :  { %v3797_v26 = vsel %vm73_vm0, %v3789_v24, 0.0 }
0x1425   :  { %3798 = vadd.xlane.f32.xlu1 %v3797_v26  ;;  %v3794_v27 = vsel %vm73_vm0, %v3788_v23, 0.0 }
0x1426   :  { %3795 = vadd.xlane.f32.xlu0 %v3794_v27 }
0x14b2   :  { %v3799_v30 = vpop.xlane.xlu1 %3798 }
0x14b3   :  { %v3801_v31 = vmul.f32 0.03125, %v3799_v30  ;;  %v3796_v19 = vpop.xlane.xlu0 %3795 }
0x14b4   :  { %v3800_v32 = vmul.f32 0.03125, %v3796_v19 }
0x14b5   :  { %v3803_v34 = vsub.f32 %v3789_v24, %v3801_v31 }
0x14b6   :  { %v3802_v41 = vsub.f32 %v3788_v23, %v3800_v32 }
0x14b7   :  { %v3805_v37 = vmul.f32 %v3803_v34, %v3803_v34 }
0x14b8   :  { %v3804_v38 = vmul.f32 %v3802_v41, %v3802_v41 }
0x14b9   :  { %v3809_v39 = vsel %vm73_vm0, %v3805_v37, 0.0 }
0x14ba   :  { %3810 = vadd.xlane.f32.xlu1 %v3809_v39  ;;  %v3806_v42 = vsel %vm73_vm0, %v3804_v38, 0.0 }
0x14bb   :  { %3807 = vadd.xlane.f32.xlu0 %v3806_v42 }
0x1547   :  { %v3811_v49 = vpop.xlane.xlu1 %3810 }
0x1548   :  { %v3813_v50 = vmul.f32 0.03125, %v3811_v49  ;;  %v3808_v51 = vpop.xlane.xlu0 %3807 }
0x1549   :  { %v3812_v35 = vmul.f32 0.03125, %v3808_v51 }
0x154a   :  { %v3815_v33 = vadd.f32 1e-12, %v3813_v50 }
0x154b   :  { %v3814_v52 = vadd.f32 1e-12, %v3812_v35 }
0x154c   :  { %4936 = vrsqrt.f32 %v3815_v33  ;;  %v4081_v33 = vld [vmem:[%s5787_s19] sm:$0xff] }
0x154d   :  { %4938 = vrsqrt.f32 %v3814_v52  ;;  %v4082_v52 = vld [vmem:[%s5787_s19 + $0x8] sm:$0xff] }
0x1556   :  { %v4937_v53 = vpop.eup %4936 }
0x1557   :  { %v4939_v55 = vpop.eup %4938  ;;  %v3819_v28 = vmul.f32 %v4937_v53, %v3803_v34  ;;  %v4822_v53 = vpack.c.bf16 %v4082_v52, %v4081_v33 }
0x1558   :  { %v3818_v56 = vmul.f32 %v4939_v55, %v3802_v41  ;;  %v4083_v55 = vld [vmem:[%s5787_s19 + $0x10] sm:$0xff] }
0x1559   :  { %v3827_v58 = vmul.f32 %v4289_v54, %v3819_v28  ;;  %v4084_v28 = vld [vmem:[%s5787_s19 + $0x18] sm:$0xff] }
0x155a   :  { %v3826_v59 = vmul.f32 %v4289_v54, %v3818_v56  ;;  %v4989_v54 = vmov 0.0|0.0   ;;  %v4825_v56 = vpack.c.bf16 %v4084_v28, %v4083_v55 }
0x155b   :  { %v5710_v61 = vadd.f32 %v4290_v57, %v3827_v58 }
0x155c   :  { %v5708_v60 = vadd.f32 %v4290_v57, %v3826_v59 }
0x155e   :  { %4706 = vmatprep.mubr.msk.f32.mxu1 %vm73_vm0, %v5708_v60 }
0x155f   :  { %4707 = vmatmul.mubr.msk.f32.vlgmr.msra.gmra.mrb[40].mxu1 %vm73_vm0, %v5710_v61 }
0x1560   :  { %4820 = vmatpush3.bf16.msra.mxu1 %v4817_v1 }
0x1561   :  { %4713 = vmatprep.subr.mxu1 %v3932_v2 }
0x1564   :  { %4714 = vmatpush3.msra.mxu1 %v3932_v2 }
0x1565   :  { %4821 = vmatprep.subr.bf16.mxu1 %v4989_v54 }
0x1632   :  { %v4708_v4 = vpop.f32.mrb[40].mxu1 }
0x1633   :  { %v3925_v5 = vadd.f32 %v4708_v4, %v4291_v3  ;;  %v3919_v6 = vpop.f32.mrb[41].mxu1 }
0x1634   :  { %v3920_v7 = vadd.f32 %v4291_v3, %v3919_v6 }
0x1635   :  { %v3929_v9 = vmax.f32 %v3925_v5, 0.0 }
0x1636   :  { %v3928_v8 = vmax.f32 %v3920_v7, 0.0 }
0x1638   :  { %4715 = vmatprep.mubr.msk.f32.mxu1 %vm899_vm4, %v3928_v8 }
0x1639   :  { %4716 = vmatmul.mubr.msk.f32.vlgmr.msra.gmra.mrb[42].mxu1 %vm899_vm4, %v3929_v9 }
0x163a   :  { %4726 = vmatprep.mubr.msk.f32.mxu1 %vm4973_vm1, %v4972_v36  ;;  %4823 = vmatpush3.bf16.msra.mxu1 %v4822_v53 }
0x163b   :  { %4824 = vmatprep.subr.bf16.mxu1 %v4989_v54 }
0x163e   :  { %4826 = vmatpush3.bf16.msra.mxu1 %v4825_v56 }
0x170c   :  { %v4717_v11 = vpop.f32.mrb[42].mxu1 }
0x170d   :  { %v4047_v40 = vsel %vm4014_vm6, %v4717_v11, -inf  ;;  %v4005_v13 = vpop.f32.mrb[43].mxu1 }
0x170e   :  { %v4048_v29 = vrot.slane %v4047_v40, 4  ;;  %v4015_v12 = vsel %vm4014_vm6, %v4005_v13, -inf }
0x170f   :  { %v4016_v62 = vrot.slane %v4015_v12, 4 }
0x1710   :  { %v4049_v14 = vmax.f32 %v4047_v40, %v4048_v29 }
0x1711   :  { %v4017_v15 = vmax.f32 %v4015_v12, %v4016_v62 }
0x1712   :  { %v4050_v16 = vrot.slane %v4049_v14, 2 }
0x1713   :  { %v4018_v17 = vrot.slane %v4017_v15, 2 }
0x1714   :  { %v4051_v18 = vmax.f32 %v4049_v14, %v4050_v16 }
0x1715   :  { %v4019_v20 = vmax.f32 %v4017_v15, %v4018_v17 }
0x1716   :  { %v4052_v21 = vrot.slane %v4051_v18, 1 }
0x1717   :  { %v4020_v36 = vrot.slane %v4019_v20, 1 }
0x1718   :  { %v4053_v22 = vmax.f32 %v4051_v18, %v4052_v21 }
0x1719   :  { %v4021_v25 = vmax.f32 %v4019_v20, %v4020_v36 }
0x171a   :  { %v4054_v24 = vsub.f32 %v4717_v11, %v4053_v22 }
0x171b   :  { %v4022_v23 = vsub.f32 %v4005_v13, %v4021_v25 }
0x171c   :  { %v4055_v26 = vmul.f32 1.442695, %v4054_v24 }
0x171d   :  { %v4023_v27 = vmul.f32 1.442695, %v4022_v23 }
0x171e   :  { %4940 = vpow2.f32 %v4055_v26 }
0x171f   :  { %4942 = vpow2.f32 %v4023_v27 }
0x1728   :  { %v4941_v30 = vpop.eup %4940 }
0x1729   :  { %v4943_v31 = vpop.eup %4942  ;;  %v4057_v19 = vsel %vm4014_vm6, %v4941_v30, 0.0 }
0x172a   :  { %v4058_v32 = vrot.slane %v4057_v19, 4  ;;  %v4025_v34 = vsel %vm4014_vm6, %v4943_v31, 0.0 }
0x172b   :  { %v4026_v41 = vrot.slane %v4025_v34, 4 }
0x172c   :  { %v4059_v37 = vadd.f32 %v4058_v32, %v4057_v19 }
0x172d   :  { %v4027_v38 = vadd.f32 %v4026_v41, %v4025_v34 }
0x172e   :  { %v4060_v39 = vrot.slane %v4059_v37, 2 }
0x172f   :  { %v4028_v42 = vrot.slane %v4027_v38, 2 }
0x1730   :  { %v4061_v43 = vadd.f32 %v4060_v39, %v4059_v37 }
0x1731   :  { %v4029_v44 = vadd.f32 %v4028_v42, %v4027_v38 }
0x1732   :  { %v4062_v45 = vrot.slane %v4061_v43, 1 }
0x1733   :  { %v4030_v46 = vrot.slane %v4029_v44, 1 }
0x1734   :  { %v4063_v47 = vadd.f32 %v4062_v45, %v4061_v43 }
0x1735   :  { %v4031_v48 = vadd.f32 %v4030_v46, %v4029_v44 }
0x1736   :  { %4944 = vrcp.f32 %v4063_v47 }
0x1737   :  { %4946 = vrcp.f32 %v4031_v48 }
0x1740   :  { %v4945_v49 = vpop.eup %4944 }
0x1741   :  { %v4947_v50 = vpop.eup %4946  ;;  %v4065_v51 = vmul.f32 %v4945_v49, %v4941_v30 }
0x1742   :  { %v4033_v35 = vmul.f32 %v4947_v50, %v4943_v31 }
0x1743   :  { %4068 = vperm.xlu1 %4847, %v4065_v51  }
0x1744   :  { %4036 = vperm.xlu0 %4846, %v4033_v35  }
0x17c2   :  { %v4069_v57 = vpop.permute.xlu1 %4068 }
0x17c3   :  { %v4071_v58 = vmul.f32 %v4069_v57, %v5710_v61  ;;  %v4037_v59 = vpop.permute.xlu0 %4036 }
0x17c4   :  { %v4039_v63 = vmul.f32 %v4037_v59, %v5708_v60  ;;  %v4296_v60 = vld [vmem:[%s5788_s20] ss:$0 sm:$0xff] }
0x17c5   :  { %v4072_v0 = vsel %vm73_vm0, %v4071_v58, 0.0 }
0x17c6   :  { %v4073_v1 = vrot.slane %v4072_v0, 4  ;;  %v4040_v2 = vsel %vm73_vm0, %v4039_v63, 0.0 }
0x17c7   :  { %v4041_v3 = vrot.slane %v4040_v2, 4 }
0x17c8   :  { %v4074_v4 = vadd.f32 %v4073_v1, %v4072_v0 }
0x17c9   :  { %v4042_v5 = vadd.f32 %v4041_v3, %v4040_v2 }
0x17ca   :  { %v4075_v6 = vrot.slane %v4074_v4, 2 }
0x17cb   :  { %v4043_v7 = vrot.slane %v4042_v5, 2 }
0x17cc   :  { %v4076_v8 = vadd.f32 %v4075_v6, %v4074_v4 }
0x17cd   :  { %v4044_v9 = vadd.f32 %v4043_v7, %v4042_v5 }
0x17ce   :  { %v4077_v10 = vrot.slane %v4076_v8, 1 }
0x17cf   :  { %v4045_v11 = vrot.slane %v4044_v9, 1 }
0x17d0   :  { %v4078_v40 = vadd.f32 %v4077_v10, %v4076_v8 }
0x17d1   :  { %v4046_v61 = vadd.f32 %v4045_v11, %v4044_v9 }
0x17d3   :  { %v4080_v13 = vsel %vm4079_vm7, %v4046_v61, %v4078_v40 }
0x17d4   :  { %4727 = vmatmul.mubr.msk.f32.vlgmr.msra.gmra.mrb[44].mxu1 %vm73_vm0, %v4080_v13 }
0x18a7   :  { %v4161_v29 = vpop.f32.mrb[44].mxu1 }
0x18a8   :  { %v4162_v12 = vadd.f32 %v4296_v60, %v4161_v29  ;;  %v4728_v62 = vpop.f32.mrb[45].mxu1 }
0x18aa   :  { %4166 = vst.msk [vmem:[#allocation2] sm:$0x3] %vm4165_vm8, %v4162_v12 }
0x18ab   :  { %4959 = shalt.err (!%p4956_p4)
}
0x18ac   :  { %s4960_s4 = scalar_lea.hbm %s5789_s21, 32 }
0x18ad   :  { %p4961_p5 = scmp.ne.s32.totalorder %s5789_s21, %s4960_s4  ;;  %p4964_p6 = scmp.lt.u32.totalorder %s4960_s4, %s5789_s21 }
0x18af   :  { %p4966_p7 = pnand %p4964_p6, %p4961_p5 }
0x18b1   :  { %4969 = shalt.err (!%p4966_p7)
}
0x18b2   :  { %4176 = dma.vmem_to_hbm [thread:$0]  %s4174_s1, 32, %s5789_s21, [#allocation3]  }
0x18b3   :  { %4970 = dma.done.wait [#allocation3], 32  }
0x18b4   :  { %4971 = vsyncadd [#allocation3], 4294967264 }
0x18b5   :  { %4180 = vsyncpa [#allocation3], 1 }

</bundles_post_ra>
